<compile_context>
chip_gen: v7x
topology: tpu7x:2x2x1
jax: 0.10.0
libtpu: 0.0.40
codegen_flags: <defaults>
</compile_context>

<pallas_src>
import functools
import math

import jax
import jax.numpy as jnp
from jax.experimental import pallas as pl
from jax.experimental.pallas import tpu as pltpu

LN_EPS = 1e-5


# --------------------------------------------------------------------------
# small helpers
# --------------------------------------------------------------------------
def _round_up(x, m):
    return (x + m - 1) // m * m


def _is_v7x_device():
    """True if the default device looks like a v7x (2 TensorCores/chip)."""
    try:
        kind = jax.devices()[0].device_kind.lower()
    except Exception:  # no devices / unknown backend
        return False
    return ("v7" in kind) or ("tpu7" in kind)


def _pad2(w, rows, cols):
    return jnp.pad(w, ((0, rows - w.shape[0]), (0, cols - w.shape[1])))


def _head_pad_cols(w, d, nhead, dp):
    """(r, d) -> (r, dp): column h*dhp + j <- w[:, h*dh + j], zeros elsewhere."""
    dh, dhp = d // nhead, dp // nhead
    parts = []
    for h in range(nhead):
        parts.append(w[:, h * dh:(h + 1) * dh])
        if dhp > dh:
            parts.append(jnp.zeros((w.shape[0], dhp - dh), w.dtype))
    return jnp.concatenate(parts, axis=1)


def _head_pad_rows(w, d, nhead, dp):
    """(d, c) -> (dp, c): row h*dhp + j <- w[h*dh + j, :], zeros elsewhere."""
    return _head_pad_cols(w.T, d, nhead, dp).T


# --------------------------------------------------------------------------
# in-kernel math
# --------------------------------------------------------------------------
def _layer_norm(x, g, b, d_real):
    """nn.LayerNorm over the real d_real lanes of a zero-lane-padded x.

    Pads stay zero because g/b are zero beyond d_real.  Uses E[x^2] - mu^2 so
    the (zero) padded lanes never contaminate the statistics.
    """
    inv_d = 1.0 / d_real
    mu = jnp.sum(x, axis=-1, keepdims=True) * inv_d
    ex2 = jnp.sum(x * x, axis=-1, keepdims=True) * inv_d
    var = ex2 - mu * mu
    return (x - mu) * jax.lax.rsqrt(var + LN_EPS) * g + b


def _mha(q, k, v, wo, nb, tq, tk, nhead, dh):
    """nn.MultiheadAttention core (eval mode, no masks) on padded-head layout.

    q: (nb*tq, DP) f32; k, v: (nb*tk, DP) f32 — head h occupies lanes
    [h*dhp, h*dhp + dh) with dhp = DP/nhead.  wo: (DP, DP) bf16 with input
    rows in the same padded-head layout.  Returns (nb*tq, DP) f32 (out
    projection applied, bias NOT added).
    """
    dp = q.shape[-1]
    dhp = dp // nhead
    scale = 1.0 / math.sqrt(dh)

    # cast once, before any lane slicing (halves relayout bytes)
    qs = (q * scale).astype(jnp.bfloat16)
    ks = k.astype(jnp.bfloat16)
    vs = v.astype(jnp.bfloat16)

    outs = []
    for b in range(nb):  # static (nb is a Python int)
        qb = qs[b * tq:(b + 1) * tq]
        kb = ks[b * tk:(b + 1) * tk]
        vb = vs[b * tk:(b + 1) * tk]
        # TODO(synk): dhp-aligned lane slices + stack kept over a lane-splitting
        # reshape (T,DP)->(T,H,dhp) for Mosaic lowering robustness.
        qh = jnp.stack([qb[:, h * dhp:(h + 1) * dhp] for h in range(nhead)], axis=0)
        kh = jnp.stack([kb[:, h * dhp:(h + 1) * dhp] for h in range(nhead)], axis=0)
        vh = jnp.stack([vb[:, h * dhp:(h + 1) * dhp] for h in range(nhead)], axis=0)

        s = jnp.einsum("hqd,hkd->hqk", qh, kh,
                       preferred_element_type=jnp.float32)       # (H, Tq, Tk)
        s = s - jnp.max(s, axis=-1, keepdims=True)
        p = jnp.exp(s)
        p = p * pl.reciprocal(jnp.sum(p, axis=-1, keepdims=True), approx=True)

        o = jnp.einsum("hqk,hkd->hqd", p.astype(jnp.bfloat16), vh,
                       preferred_element_type=jnp.float32)       # (H, Tq, dhp)
        o = o.astype(jnp.bfloat16)
        outs.append(jnp.concatenate([o[h] for h in range(nhead)], axis=-1))

    o_all = outs[0] if nb == 1 else jnp.concatenate(outs, axis=0)  # (nb*tq, DP)
    return jnp.dot(o_all, wo, preferred_element_type=jnp.float32)


# --------------------------------------------------------------------------
# fused decoder-stack kernel
# --------------------------------------------------------------------------
def _decoder_stack_kernel(nhead, d_real, layer_axis,
                          tgt_ref, mem_ref, qpos_ref, pos_ref,
                          wqk_ref, wdd_ref, w1_ref, w2_ref,
                          vecd_ref, vecf_ref, normgb_ref,
                          hs_ref, hswn_ref):
    """One grid step = one decoder layer (for one batch block).

    The running activation x is carried across the layer grid axis inside the
    hswn (hs_without_norm) output block, which is resident in VMEM because its
    block index does not change along the layer axis.
    """
    l = pl.program_id(layer_axis)
    nl = pl.num_programs(layer_axis)
    nb, t, dp = tgt_ref.shape
    s_len = mem_ref.shape[1]
    dh = d_real // nhead

    @pl.when(l == 0)
    def _():
        hswn_ref[...] = tgt_ref[...]

    # flatten batch into the sublane (row) axis for all projections / FFN
    x = hswn_ref[...].reshape(nb * t, dp)        # (nb*T, DP) f32
    qp = qpos_ref[...].reshape(nb * t, dp)
    mem = mem_ref[...].reshape(nb * s_len, dp)
    ps = pos_ref[...].reshape(nb * s_len, dp)

    # ---- unpack per-layer parameter slabs ----
    wqk = wqk_ref[0]                              # (DP, 2*DP) bf16
    wdd = wdd_ref[0]                              # (6*DP, DP) bf16
    sa_wv, sa_wo = wdd[0 * dp:1 * dp], wdd[1 * dp:2 * dp]
    ca_wq, ca_wk = wdd[2 * dp:3 * dp], wdd[3 * dp:4 * dp]
    ca_wv, ca_wo = wdd[4 * dp:5 * dp], wdd[5 * dp:6 * dp]

    vecs = vecd_ref[0]                            # (16, DP) f32
    sa_bq, sa_bk, sa_bv, sa_bo = vecs[0], vecs[1], vecs[2], vecs[3]
    ca_bq, ca_bk, ca_bv, ca_bo = vecs[4], vecs[5], vecs[6], vecs[7]
    b2 = vecs[8]
    g1, be1 = vecs[9], vecs[10]
    g2, be2 = vecs[11], vecs[12]
    g3, be3 = vecs[13], vecs[14]
    b1 = vecf_ref[0]                              # (1, DFFP) f32

    # ---- self attention (q = k = x + query_pos, v = x), fused QK proj ----
    qk_in = (x + qp).astype(jnp.bfloat16)
    qk = jnp.dot(qk_in, wqk, preferred_element_type=jnp.float32)   # (nb*T, 2*DP)
    q = qk[:, :dp] + sa_bq                        # tile-aligned lane-128 slice
    k = qk[:, dp:] + sa_bk
    v = jnp.dot(x.astype(jnp.bfloat16), sa_wv,
                preferred_element_type=jnp.float32) + sa_bv
    sa = _mha(q, k, v, sa_wo, nb, t, t, nhead, dh) + sa_bo
    x = _layer_norm(x + sa, g1, be1, d_real)

    # ---- cross attention (q = x + query_pos, k = memory + pos, v = memory) ----
    cq = jnp.dot((x + qp).astype(jnp.bfloat16), ca_wq,
                 preferred_element_type=jnp.float32) + ca_bq
    ck = jnp.dot((mem + ps).astype(jnp.bfloat16), ca_wk,
                 preferred_element_type=jnp.float32) + ca_bk
    cv = jnp.dot(mem.astype(jnp.bfloat16), ca_wv,
                 preferred_element_type=jnp.float32) + ca_bv
    ca = _mha(cq, ck, cv, ca_wo, nb, t, s_len, nhead, dh) + ca_bo
    x = _layer_norm(x + ca, g2, be2, d_real)

    # ---- feed-forward (relu, dropout = identity) ----
    h = jnp.maximum(jnp.dot(x.astype(jnp.bfloat16), w1_ref[0],
                            preferred_element_type=jnp.float32) + b1, 0.0)
    ff = jnp.dot(h.astype(jnp.bfloat16), w2_ref[0],
                 preferred_element_type=jnp.float32) + b2
    x = _layer_norm(x + ff, g3, be3, d_real)

    # carry x across layers inside the hswn output block
    hswn_ref[...] = x.reshape(nb, t, dp)

    # ---- last layer: emit the final-LayerNorm'ed hs ----
    @pl.when(l == nl - 1)
    def _():
        ngb = normgb_ref[...]                     # (2, DP)
        hs_ref[...] = _layer_norm(x, ngb[0], ngb[1], d_real).reshape(nb, t, dp)


def run_decoder_stack(tgt_b, mem_b, qpos_b, pos_b, packed, nhead, d_model):
    """One fused pallas_call for all decoder layers + final LayerNorm.

    tgt_b/qpos_b: (B, T, DP); mem_b/pos_b: (B, S, DP) — lane-padded f32.
    """
    B, T, DP = tgt_b.shape
    S = mem_b.shape[1]
    L = packed["wqk"].shape[0]
    DFFP = packed["vecf"].shape[-1]

    assert DP % 128 == 0 and DP % nhead == 0
    assert T % 8 == 0 and S % 8 == 0, \
        "TODO(synk): pad/mask non-multiple-of-8 sequence lengths"

    fold_batch = not _is_v7x_device()   # single-TC chips: fold B into the block

    if fold_batch:
        # v5e / v6e (and fallback): grid = (L,), each layer's weights streamed
        # exactly once, projections/FFN on flattened (B*T, DP).
        grid = (L,)
        semantics = ("arbitrary",)
        layer_axis = 0
        nb = B
        act_idx = lambda l: (0, 0, 0)
        lay_idx = lambda l: (l, 0, 0)
        norm_idx = lambda l: (0, 0)
    else:
        # v7x: keep batch as a "parallel" grid axis (one batch per TensorCore),
        # keep the layer slabs streamed (64 MiB VMEM, 3.2 TB/s HBM).
        grid = (B, L)
        semantics = ("parallel", "arbitrary")
        layer_axis = 1
        nb = 1
        act_idx = lambda b, l: (b, 0, 0)
        lay_idx = lambda b, l: (l, 0, 0)
        norm_idx = lambda b, l: (0, 0)

    in_specs = [
        pl.BlockSpec((nb, T, DP), act_idx),      # tgt
        pl.BlockSpec((nb, S, DP), act_idx),      # memory
        pl.BlockSpec((nb, T, DP), act_idx),      # query_pos
        pl.BlockSpec((nb, S, DP), act_idx),      # pos
        pl.BlockSpec((1, DP, 2 * DP), lay_idx),  # fused self-attn Q/K proj
        pl.BlockSpec((1, 6 * DP, DP), lay_idx),  # packed (DP,DP) weights
        pl.BlockSpec((1, DP, DFFP), lay_idx),    # FFN w1
        pl.BlockSpec((1, DFFP, DP), lay_idx),    # FFN w2
        pl.BlockSpec((1, 16, DP), lay_idx),      # packed bias / gain vectors
        pl.BlockSpec((1, 1, DFFP), lay_idx),     # FFN b1
        pl.BlockSpec((2, DP), norm_idx),         # final norm (g, b)
    ]
    out_specs = [
        pl.BlockSpec((nb, T, DP), act_idx),      # hs (final-normed)
        pl.BlockSpec((nb, T, DP), act_idx),      # hs_without_norm (layer carry)
    ]

    grid_spec = pltpu.PrefetchScalarGridSpec(
        num_scalar_prefetch=0, grid=grid,
        in_specs=in_specs, out_specs=out_specs)

    hs, hswn = pl.pallas_call(
        functools.partial(_decoder_stack_kernel, nhead, d_model, layer_axis),
        out_shape=(jax.ShapeDtypeStruct((B, T, DP), jnp.float32),
                   jax.ShapeDtypeStruct((B, T, DP), jnp.float32)),
        grid_spec=grid_spec,
        compiler_params=pltpu.CompilerParams(dimension_semantics=semantics),
    )(tgt_b, mem_b, qpos_b, pos_b,
      packed["wqk"], packed["wdd"], packed["w1"], packed["w2"],
      packed["vecd"], packed["vecf"], packed["normgb"])
    return hs, hswn


# --------------------------------------------------------------------------
# parameters (synthetic) + packing into kernel slabs
# --------------------------------------------------------------------------
def init_params(key, d_model, nhead, dff, num_layers):
    """Deterministic synthetic params (xavier-uniform 2D weights, zero biases,
    unit LayerNorm gains) mirroring the module's parameter shapes.  Weights are
    stored (d_in, d_out), unpadded f32; pack_params does layout/padding."""
    def xavier(k, shape):  # shape = (out, in) PyTorch convention
        fan_out, fan_in = shape
        a = math.sqrt(6.0 / (fan_in + fan_out))
        return jax.random.uniform(k, shape, jnp.float32, -a, a)

    keys = jax.random.split(key, num_layers)
    layers = []
    for l in range(num_layers):
        ks = jax.random.split(keys[l], 6)
        sa_in = xavier(ks[0], (3 * d_model, d_model))
        sa_wq, sa_wk, sa_wv = jnp.split(sa_in, 3, axis=0)
        sa_wo = xavier(ks[1], (d_model, d_model))
        ca_in = xavier(ks[2], (3 * d_model, d_model))
        ca_wq, ca_wk, ca_wv = jnp.split(ca_in, 3, axis=0)
        ca_wo = xavier(ks[3], (d_model, d_model))
        w1 = xavier(ks[4], (dff, d_model))
        w2 = xavier(ks[5], (d_model, dff))
        zd = jnp.zeros((1, d_model), jnp.float32)
        zf = jnp.zeros((1, dff), jnp.float32)
        od = jnp.ones((1, d_model), jnp.float32)
        layers.append({
            "sa_wq": sa_wq.T, "sa_wk": sa_wk.T, "sa_wv": sa_wv.T, "sa_wo": sa_wo.T,
            "ca_wq": ca_wq.T, "ca_wk": ca_wk.T, "ca_wv": ca_wv.T, "ca_wo": ca_wo.T,
            "w1": w1.T, "w2": w2.T,
            "sa_bq": zd, "sa_bk": zd, "sa_bv": zd, "sa_bo": zd,
            "ca_bq": zd, "ca_bk": zd, "ca_bv": zd, "ca_bo": zd,
            "b1": zf, "b2": zd,
            "g1": od, "be1": zd, "g2": od, "be2": zd, "g3": od, "be3": zd,
        })
    return {"layers": layers,
            "norm_g": jnp.ones((1, d_model), jnp.float32),
            "norm_b": jnp.zeros((1, d_model), jnp.float32)}


def pack_params(params, d_model, nhead, dff, weight_dtype=jnp.bfloat16):
    """Stack per-layer weights into lane-padded (L, ...) slabs.

    d_model / dff are padded to multiples of 128 (DP / DFFP).  Q/K/V projection
    output columns and out-projection input rows use the padded-head layout
    (head h in lanes [h*DP/nhead, h*DP/nhead + dh)).  All matmul weights go to
    bf16; bias / LayerNorm vectors stay f32 in one (L, 16, DP) slab.
    """
    assert d_model % nhead == 0
    DP = _round_up(d_model, 128)
    DFFP = _round_up(dff, 128)
    assert DP % nhead == 0, "TODO(synk): nhead must divide the padded d_model"

    hc = lambda w: _head_pad_cols(w, d_model, nhead, DP)
    hr = lambda w: _head_pad_rows(w, d_model, nhead, DP)

    wqk_l, wdd_l, w1_l, w2_l, vecd_l, vecf_l = [], [], [], [], [], []
    for lp in params["layers"]:
        wq = _pad2(hc(lp["sa_wq"]), DP, DP)
        wk = _pad2(hc(lp["sa_wk"]), DP, DP)
        wqk_l.append(jnp.concatenate([wq, wk], axis=1))              # (DP, 2*DP)
        wdd_l.append(jnp.concatenate([
            _pad2(hc(lp["sa_wv"]), DP, DP),
            _pad2(hr(lp["sa_wo"]), DP, DP),
            _pad2(hc(lp["ca_wq"]), DP, DP),
            _pad2(hc(lp["ca_wk"]), DP, DP),
            _pad2(hc(lp["ca_wv"]), DP, DP),
            _pad2(hr(lp["ca_wo"]), DP, DP)], axis=0))                # (6*DP, DP)
        w1_l.append(_pad2(lp["w1"], DP, DFFP))
        w2_l.append(_pad2(lp["w2"], DFFP, DP))
        vecd_l.append(jnp.concatenate([
            hc(lp["sa_bq"]), hc(lp["sa_bk"]), hc(lp["sa_bv"]),
            _pad2(lp["sa_bo"], 1, DP),
            hc(lp["ca_bq"]), hc(lp["ca_bk"]), hc(lp["ca_bv"]),
            _pad2(lp["ca_bo"], 1, DP),
            _pad2(lp["b2"], 1, DP),
            _pad2(lp["g1"], 1, DP), _pad2(lp["be1"], 1, DP),
            _pad2(lp["g2"], 1, DP), _pad2(lp["be2"], 1, DP),
            _pad2(lp["g3"], 1, DP), _pad2(lp["be3"], 1, DP),
            jnp.zeros((1, DP), jnp.float32)], axis=0))               # (16, DP)
        vecf_l.append(_pad2(lp["b1"], 1, DFFP))                      # (1, DFFP)

    normgb = jnp.concatenate([_pad2(params["norm_g"], 1, DP),
                              _pad2(params["norm_b"], 1, DP)], axis=0)
    return dict(
        wqk=jnp.stack(wqk_l).astype(weight_dtype),
        wdd=jnp.stack(wdd_l).astype(weight_dtype),
        w1=jnp.stack(w1_l).astype(weight_dtype),
        w2=jnp.stack(w2_l).astype(weight_dtype),
        vecd=jnp.stack(vecd_l),
        vecf=jnp.stack(vecf_l),
        normgb=normgb)


# --------------------------------------------------------------------------
# module-equivalent wrapper
# --------------------------------------------------------------------------
def swin_une_transformer_forward(packed, tgt, query_embed, pos, memory,
                                 nhead, d_model, tgt_mask=None):
    """Mirrors SwinUneTransformer.forward when `memory` is provided.

    tgt, query_embed: (T, B, D); memory, pos: (S, B, D)  (PyTorch seq-first).
    Returns (hs.transpose(1,2), hs_without_norm.transpose(1,2), memory, pos),
    i.e. the first two outputs have shape (T, D, B) exactly like the module.
    """
    del tgt_mask  # TODO(synk): key-padding mask not implemented (None path)
    DP = packed["wqk"].shape[1]

    def prep(x):  # (Seq, B, D) -> (B, Seq, DP) f32, zero lane padding
        x = jnp.transpose(x, (1, 0, 2)).astype(jnp.float32)
        return jnp.pad(x, ((0, 0), (0, 0), (0, DP - x.shape[-1])))

    tgt_b, qpos_b = prep(tgt), prep(query_embed)
    mem_b, pos_b = prep(memory), prep(pos)

    hs_b, hswn_b = run_decoder_stack(tgt_b, mem_b, qpos_b, pos_b,
                                     packed, nhead, d_model)
    hs_b = hs_b[:, :, :d_model]
    hswn_b = hswn_b[:, :, :d_model]

    # module: hs is (T, B, D); hs.transpose(1, 2) -> (T, D, B)
    hs = jnp.transpose(hs_b, (1, 2, 0))
    hs_wn = jnp.transpose(hswn_b, (1, 2, 0))
    return hs, hs_wn, memory, pos


if __name__ == "__main__":
    D_MODEL, NHEAD, DFF, NUM_LAYERS = 64, 4, 128, 2
    T, S, B = 8, 16, 2  # num queries, memory tokens, batch

    key = jax.random.PRNGKey(0)
    k_tgt, k_q, k_mem, k_pos, k_par = jax.random.split(key, 5)
    tgt = jax.random.normal(k_tgt, (T, B, D_MODEL), jnp.float32)
    query_embed = jax.random.normal(k_q, (T, B, D_MODEL), jnp.float32)
    memory = jax.random.normal(k_mem, (S, B, D_MODEL), jnp.float32)
    pos = jax.random.normal(k_pos, (S, B, D_MODEL), jnp.float32)

    params = init_params(k_par, D_MODEL, NHEAD, DFF, NUM_LAYERS)
    packed = pack_params(params, D_MODEL, NHEAD, DFF)

    fwd = jax.jit(functools.partial(swin_une_transformer_forward,
                                    nhead=NHEAD, d_model=D_MODEL))
    hs, hs_wn, mem_out, pos_out = fwd(packed, tgt, query_embed, pos, memory)
    jax.block_until_ready((hs, hs_wn, mem_out, pos_out))

    assert hs.shape == (T, D_MODEL, B) and hs_wn.shape == (T, D_MODEL, B)
    assert mem_out.shape == (S, B, D_MODEL) and pos_out.shape == (S, B, D_MODEL)
    print("KERNEL_OK")
</pallas_src>

<mosaic_0001>
module attributes {stable_mosaic.version = 11 : i64} {
  func.func @_decoder_stack_kernel(%arg0: i32, %arg1: memref<2x8x128xf32, #tpu.memory_space<vmem>>, %arg2: memref<2x16x128xf32, #tpu.memory_space<vmem>>, %arg3: memref<2x8x128xf32, #tpu.memory_space<vmem>>, %arg4: memref<2x16x128xf32, #tpu.memory_space<vmem>>, %arg5: memref<1x128x256xbf16, #tpu.memory_space<vmem>>, %arg6: memref<1x768x128xbf16, #tpu.memory_space<vmem>>, %arg7: memref<1x128x128xbf16, #tpu.memory_space<vmem>>, %arg8: memref<1x128x128xbf16, #tpu.memory_space<vmem>>, %arg9: memref<1x16x128xf32, #tpu.memory_space<vmem>>, %arg10: memref<1x1x128xf32, #tpu.memory_space<vmem>>, %arg11: memref<2x128xf32, #tpu.memory_space<vmem>>, %arg12: memref<2x8x128xf32, #tpu.memory_space<vmem>>, %arg13: memref<2x8x128xf32, #tpu.memory_space<vmem>>) attributes {dimension_semantics = [#tpu.dimension_semantics<arbitrary>], iteration_bounds = array<i64: 2>, scalar_prefetch = 0 : i64, scratch_operands = 0 : i64, tpu.core_type = #tpu.core_type<tc>, window_params = [{pipeline_mode = #tpu.pipeline_mode<synchronous>, transform_indices = @transform_0, window_bounds = array<i64: 2, 8, 128>}, {pipeline_mode = #tpu.pipeline_mode<synchronous>, transform_indices = @transform_1, window_bounds = array<i64: 2, 16, 128>}, {pipeline_mode = #tpu.pipeline_mode<synchronous>, transform_indices = @transform_2, window_bounds = array<i64: 2, 8, 128>}, {pipeline_mode = #tpu.pipeline_mode<synchronous>, transform_indices = @transform_3, window_bounds = array<i64: 2, 16, 128>}, {transform_indices = @transform_4, window_bounds = array<i64: 1, 128, 256>}, {transform_indices = @transform_5, window_bounds = array<i64: 1, 768, 128>}, {transform_indices = @transform_6, window_bounds = array<i64: 1, 128, 128>}, {transform_indices = @transform_7, window_bounds = array<i64: 1, 128, 128>}, {transform_indices = @transform_8, window_bounds = array<i64: 1, 16, 128>}, {transform_indices = @transform_9, window_bounds = array<i64: 1, 1, 128>}, {pipeline_mode = #tpu.pipeline_mode<synchronous>, transform_indices = @transform_10, window_bounds = array<i64: 2, 128>}, {pipeline_mode = #tpu.pipeline_mode<synchronous>, transform_indices = @transform_11, window_bounds = array<i64: 2, 8, 128>}, {pipeline_mode = #tpu.pipeline_mode<synchronous>, transform_indices = @transform_12, window_bounds = array<i64: 2, 8, 128>}]} {
    %c0_i32 = arith.constant 0 : i32
    %0 = arith.cmpi eq, %arg0, %c0_i32 : i32
    %1 = arith.extui %0 : i1 to i32
    %c0_i32_0 = arith.constant 0 : i32
    %2 = arith.cmpi ne, %1, %c0_i32_0 : i32
    scf.if %2 {
      %c0_76 = arith.constant 0 : index
      %c0_77 = arith.constant 0 : index
      %c0_78 = arith.constant 0 : index
      %415 = vector.load %arg1[%c0_76, %c0_77, %c0_78] : memref<2x8x128xf32, #tpu.memory_space<vmem>>, vector<2x8x128xf32>
      %c0_79 = arith.constant 0 : index
      %c0_80 = arith.constant 0 : index
      %c0_81 = arith.constant 0 : index
      %416 = vector.load %arg13[%c0_79, %c0_80, %c0_81] : memref<2x8x128xf32, #tpu.memory_space<vmem>>, vector<2x8x128xf32>
      tpu.vector_store %arg13[%c0_79, %c0_80, %c0_81], %415 {strides = array<i32>} : memref<2x8x128xf32, #tpu.memory_space<vmem>>, vector<2x8x128xf32>,
    } else {
    }
    %c0 = arith.constant 0 : index
    %c0_1 = arith.constant 0 : index
    %c0_2 = arith.constant 0 : index
    %3 = vector.load %arg13[%c0, %c0_1, %c0_2] : memref<2x8x128xf32, #tpu.memory_space<vmem>>, vector<2x8x128xf32>
    %4 = vector.shape_cast %3 : vector<2x8x128xf32> to vector<16x128xf32>
    %c0_3 = arith.constant 0 : index
    %c0_4 = arith.constant 0 : index
    %c0_5 = arith.constant 0 : index
    %5 = vector.load %arg3[%c0_3, %c0_4, %c0_5] : memref<2x8x128xf32, #tpu.memory_space<vmem>>, vector<2x8x128xf32>
    %6 = vector.shape_cast %5 : vector<2x8x128xf32> to vector<16x128xf32>
    %c0_6 = arith.constant 0 : index
    %c0_7 = arith.constant 0 : index
    %c0_8 = arith.constant 0 : index
    %7 = vector.load %arg2[%c0_6, %c0_7, %c0_8] : memref<2x16x128xf32, #tpu.memory_space<vmem>>, vector<2x16x128xf32>
    %8 = vector.shape_cast %7 : vector<2x16x128xf32> to vector<32x128xf32>
    %c0_9 = arith.constant 0 : index
    %c0_10 = arith.constant 0 : index
    %c0_11 = arith.constant 0 : index
    %9 = vector.load %arg4[%c0_9, %c0_10, %c0_11] : memref<2x16x128xf32, #tpu.memory_space<vmem>>, vector<2x16x128xf32>
    %10 = vector.shape_cast %9 : vector<2x16x128xf32> to vector<32x128xf32>
    %c0_12 = arith.constant 0 : index
    %c0_13 = arith.constant 0 : index
    %c0_14 = arith.constant 0 : index
    %11 = vector.load %arg5[%c0_12, %c0_13, %c0_14] : memref<1x128x256xbf16, #tpu.memory_space<vmem>>, vector<1x128x256xbf16>
    %12 = vector.shape_cast %11 : vector<1x128x256xbf16> to vector<128x256xbf16>
    %c0_15 = arith.constant 0 : index
    %c0_16 = arith.constant 0 : index
    %c0_17 = arith.constant 0 : index
    %13 = vector.load %arg6[%c0_15, %c0_16, %c0_17] : memref<1x768x128xbf16, #tpu.memory_space<vmem>>, vector<1x768x128xbf16>
    %14 = vector.shape_cast %13 : vector<1x768x128xbf16> to vector<768x128xbf16>
    %15 = vector.extract_strided_slice %14 {offsets = [0, 0], sizes = [128, 128], strides = [1, 1]} : vector<768x128xbf16> to vector<128x128xbf16>
    %16 = vector.extract_strided_slice %14 {offsets = [128, 0], sizes = [128, 128], strides = [1, 1]} : vector<768x128xbf16> to vector<128x128xbf16>
    %17 = vector.extract_strided_slice %14 {offsets = [256, 0], sizes = [128, 128], strides = [1, 1]} : vector<768x128xbf16> to vector<128x128xbf16>
    %18 = vector.extract_strided_slice %14 {offsets = [384, 0], sizes = [128, 128], strides = [1, 1]} : vector<768x128xbf16> to vector<128x128xbf16>
    %19 = vector.extract_strided_slice %14 {offsets = [512, 0], sizes = [128, 128], strides = [1, 1]} : vector<768x128xbf16> to vector<128x128xbf16>
    %20 = vector.extract_strided_slice %14 {offsets = [640, 0], sizes = [128, 128], strides = [1, 1]} : vector<768x128xbf16> to vector<128x128xbf16>
    %c0_18 = arith.constant 0 : index
    %c0_19 = arith.constant 0 : index
    %c0_20 = arith.constant 0 : index
    %21 = vector.load %arg9[%c0_18, %c0_19, %c0_20] : memref<1x16x128xf32, #tpu.memory_space<vmem>>, vector<1x16x128xf32>
    %22 = vector.shape_cast %21 : vector<1x16x128xf32> to vector<16x128xf32>
    %23 = vector.extract_strided_slice %22 {offsets = [0, 0], sizes = [1, 128], strides = [1, 1]} : vector<16x128xf32> to vector<1x128xf32>
    %24 = vector.shape_cast %23 : vector<1x128xf32> to vector<128xf32>
    %25 = vector.extract_strided_slice %22 {offsets = [1, 0], sizes = [1, 128], strides = [1, 1]} : vector<16x128xf32> to vector<1x128xf32>
    %26 = vector.shape_cast %25 : vector<1x128xf32> to vector<128xf32>
    %27 = vector.extract_strided_slice %22 {offsets = [2, 0], sizes = [1, 128], strides = [1, 1]} : vector<16x128xf32> to vector<1x128xf32>
    %28 = vector.shape_cast %27 : vector<1x128xf32> to vector<128xf32>
    %29 = vector.extract_strided_slice %22 {offsets = [3, 0], sizes = [1, 128], strides = [1, 1]} : vector<16x128xf32> to vector<1x128xf32>
    %30 = vector.shape_cast %29 : vector<1x128xf32> to vector<128xf32>
    %31 = vector.extract_strided_slice %22 {offsets = [4, 0], sizes = [1, 128], strides = [1, 1]} : vector<16x128xf32> to vector<1x128xf32>
    %32 = vector.shape_cast %31 : vector<1x128xf32> to vector<128xf32>
    %33 = vector.extract_strided_slice %22 {offsets = [5, 0], sizes = [1, 128], strides = [1, 1]} : vector<16x128xf32> to vector<1x128xf32>
    %34 = vector.shape_cast %33 : vector<1x128xf32> to vector<128xf32>
    %35 = vector.extract_strided_slice %22 {offsets = [6, 0], sizes = [1, 128], strides = [1, 1]} : vector<16x128xf32> to vector<1x128xf32>
    %36 = vector.shape_cast %35 : vector<1x128xf32> to vector<128xf32>
    %37 = vector.extract_strided_slice %22 {offsets = [7, 0], sizes = [1, 128], strides = [1, 1]} : vector<16x128xf32> to vector<1x128xf32>
    %38 = vector.shape_cast %37 : vector<1x128xf32> to vector<128xf32>
    %39 = vector.extract_strided_slice %22 {offsets = [8, 0], sizes = [1, 128], strides = [1, 1]} : vector<16x128xf32> to vector<1x128xf32>
    %40 = vector.shape_cast %39 : vector<1x128xf32> to vector<128xf32>
    %41 = vector.extract_strided_slice %22 {offsets = [9, 0], sizes = [1, 128], strides = [1, 1]} : vector<16x128xf32> to vector<1x128xf32>
    %42 = vector.shape_cast %41 : vector<1x128xf32> to vector<128xf32>
    %43 = vector.extract_strided_slice %22 {offsets = [10, 0], sizes = [1, 128], strides = [1, 1]} : vector<16x128xf32> to vector<1x128xf32>
    %44 = vector.shape_cast %43 : vector<1x128xf32> to vector<128xf32>
    %45 = vector.extract_strided_slice %22 {offsets = [11, 0], sizes = [1, 128], strides = [1, 1]} : vector<16x128xf32> to vector<1x128xf32>
    %46 = vector.shape_cast %45 : vector<1x128xf32> to vector<128xf32>
    %47 = vector.extract_strided_slice %22 {offsets = [12, 0], sizes = [1, 128], strides = [1, 1]} : vector<16x128xf32> to vector<1x128xf32>
    %48 = vector.shape_cast %47 : vector<1x128xf32> to vector<128xf32>
    %49 = vector.extract_strided_slice %22 {offsets = [13, 0], sizes = [1, 128], strides = [1, 1]} : vector<16x128xf32> to vector<1x128xf32>
    %50 = vector.shape_cast %49 : vector<1x128xf32> to vector<128xf32>
    %51 = vector.extract_strided_slice %22 {offsets = [14, 0], sizes = [1, 128], strides = [1, 1]} : vector<16x128xf32> to vector<1x128xf32>
    %52 = vector.shape_cast %51 : vector<1x128xf32> to vector<128xf32>
    %c0_21 = arith.constant 0 : index
    %c0_22 = arith.constant 0 : index
    %c0_23 = arith.constant 0 : index
    %53 = vector.load %arg10[%c0_21, %c0_22, %c0_23] : memref<1x1x128xf32, #tpu.memory_space<vmem>>, vector<1x1x128xf32>
    %54 = vector.shape_cast %53 : vector<1x1x128xf32> to vector<1x128xf32>
    %55 = arith.addf %4, %6 : vector<16x128xf32>
    %56 = arith.truncf %55 : vector<16x128xf32> to vector<16x128xbf16>
    %cst = arith.constant dense<0.000000e+00> : vector<16x256xf32>
    %57 = tpu.matmul %56, %12, %cst {dimension_numbers = #tpu.dot_dimension_numbers<[1], [0], [0], [1], [0, 0, 1, 1], [], []>} : vector<16x128xbf16>, vector<128x256xbf16>, vector<16x256xf32> -> vector<16x256xf32>
    %58 = vector.extract_strided_slice %57 {offsets = [0, 0], sizes = [16, 128], strides = [1, 1]} : vector<16x256xf32> to vector<16x128xf32>
    %59 = vector.shape_cast %24 : vector<128xf32> to vector<1x128xf32>
    %60 = vector.broadcast %59 : vector<1x128xf32> to vector<16x128xf32>
    %61 = arith.addf %58, %60 : vector<16x128xf32>
    %62 = vector.extract_strided_slice %57 {offsets = [0, 128], sizes = [16, 128], strides = [1, 1]} : vector<16x256xf32> to vector<16x128xf32>
    %63 = vector.shape_cast %26 : vector<128xf32> to vector<1x128xf32>
    %64 = vector.broadcast %63 : vector<1x128xf32> to vector<16x128xf32>
    %65 = arith.addf %62, %64 : vector<16x128xf32>
    %66 = arith.truncf %4 : vector<16x128xf32> to vector<16x128xbf16>
    %cst_24 = arith.constant dense<0.000000e+00> : vector<16x128xf32>
    %67 = tpu.matmul %66, %15, %cst_24 {dimension_numbers = #tpu.dot_dimension_numbers<[1], [0], [0], [1], [0, 0, 1, 1], [], []>} : vector<16x128xbf16>, vector<128x128xbf16>, vector<16x128xf32> -> vector<16x128xf32>
    %68 = vector.shape_cast %28 : vector<128xf32> to vector<1x128xf32>
    %69 = vector.broadcast %68 : vector<1x128xf32> to vector<16x128xf32>
    %70 = arith.addf %67, %69 : vector<16x128xf32>
    %cst_25 = arith.constant 2.500000e-01 : f32
    %71 = vector.broadcast %cst_25 : f32 to vector<16x128xf32>
    %72 = arith.mulf %61, %71 : vector<16x128xf32>
    %73 = arith.truncf %72 : vector<16x128xf32> to vector<16x128xbf16>
    %74 = arith.truncf %65 : vector<16x128xf32> to vector<16x128xbf16>
    %75 = arith.truncf %70 : vector<16x128xf32> to vector<16x128xbf16>
    %76 = vector.extract_strided_slice %73 {offsets = [0, 0], sizes = [8, 128], strides = [1, 1]} : vector<16x128xbf16> to vector<8x128xbf16>
    %77 = vector.extract_strided_slice %74 {offsets = [0, 0], sizes = [8, 128], strides = [1, 1]} : vector<16x128xbf16> to vector<8x128xbf16>
    %78 = vector.extract_strided_slice %75 {offsets = [0, 0], sizes = [8, 128], strides = [1, 1]} : vector<16x128xbf16> to vector<8x128xbf16>
    %79 = vector.extract_strided_slice %76 {offsets = [0, 0], sizes = [8, 32], strides = [1, 1]} : vector<8x128xbf16> to vector<8x32xbf16>
    %80 = vector.extract_strided_slice %76 {offsets = [0, 32], sizes = [8, 32], strides = [1, 1]} : vector<8x128xbf16> to vector<8x32xbf16>
    %81 = vector.extract_strided_slice %76 {offsets = [0, 64], sizes = [8, 32], strides = [1, 1]} : vector<8x128xbf16> to vector<8x32xbf16>
    %82 = vector.extract_strided_slice %76 {offsets = [0, 96], sizes = [8, 32], strides = [1, 1]} : vector<8x128xbf16> to vector<8x32xbf16>
    %83 = vector.shape_cast %79 : vector<8x32xbf16> to vector<1x8x32xbf16>
    %84 = vector.shape_cast %80 : vector<8x32xbf16> to vector<1x8x32xbf16>
    %85 = vector.shape_cast %81 : vector<8x32xbf16> to vector<1x8x32xbf16>
    %86 = vector.shape_cast %82 : vector<8x32xbf16> to vector<1x8x32xbf16>
    %87 = tpu.concatenate %83, %84, %85, %86 in 0 : vector<1x8x32xbf16>, vector<1x8x32xbf16>, vector<1x8x32xbf16>, vector<1x8x32xbf16> -> vector<4x8x32xbf16>
    %88 = vector.extract_strided_slice %77 {offsets = [0, 0], sizes = [8, 32], strides = [1, 1]} : vector<8x128xbf16> to vector<8x32xbf16>
    %89 = vector.extract_strided_slice %77 {offsets = [0, 32], sizes = [8, 32], strides = [1, 1]} : vector<8x128xbf16> to vector<8x32xbf16>
    %90 = vector.extract_strided_slice %77 {offsets = [0, 64], sizes = [8, 32], strides = [1, 1]} : vector<8x128xbf16> to vector<8x32xbf16>
    %91 = vector.extract_strided_slice %77 {offsets = [0, 96], sizes = [8, 32], strides = [1, 1]} : vector<8x128xbf16> to vector<8x32xbf16>
    %92 = vector.shape_cast %88 : vector<8x32xbf16> to vector<1x8x32xbf16>
    %93 = vector.shape_cast %89 : vector<8x32xbf16> to vector<1x8x32xbf16>
    %94 = vector.shape_cast %90 : vector<8x32xbf16> to vector<1x8x32xbf16>
    %95 = vector.shape_cast %91 : vector<8x32xbf16> to vector<1x8x32xbf16>
    %96 = tpu.concatenate %92, %93, %94, %95 in 0 : vector<1x8x32xbf16>, vector<1x8x32xbf16>, vector<1x8x32xbf16>, vector<1x8x32xbf16> -> vector<4x8x32xbf16>
    %97 = vector.extract_strided_slice %78 {offsets = [0, 0], sizes = [8, 32], strides = [1, 1]} : vector<8x128xbf16> to vector<8x32xbf16>
    %98 = vector.extract_strided_slice %78 {offsets = [0, 32], sizes = [8, 32], strides = [1, 1]} : vector<8x128xbf16> to vector<8x32xbf16>
    %99 = vector.extract_strided_slice %78 {offsets = [0, 64], sizes = [8, 32], strides = [1, 1]} : vector<8x128xbf16> to vector<8x32xbf16>
    %100 = vector.extract_strided_slice %78 {offsets = [0, 96], sizes = [8, 32], strides = [1, 1]} : vector<8x128xbf16> to vector<8x32xbf16>
    %101 = vector.shape_cast %97 : vector<8x32xbf16> to vector<1x8x32xbf16>
    %102 = vector.shape_cast %98 : vector<8x32xbf16> to vector<1x8x32xbf16>
    %103 = vector.shape_cast %99 : vector<8x32xbf16> to vector<1x8x32xbf16>
    %104 = vector.shape_cast %100 : vector<8x32xbf16> to vector<1x8x32xbf16>
    %105 = tpu.concatenate %101, %102, %103, %104 in 0 : vector<1x8x32xbf16>, vector<1x8x32xbf16>, vector<1x8x32xbf16>, vector<1x8x32xbf16> -> vector<4x8x32xbf16>
    "tpu.trace_start"() <{level = 10 : i32, message = "hqd,hkd->hqk"}> : () -> ()
    %cst_26 = arith.constant dense<0.000000e+00> : vector<4x8x8xf32>
    %106 = tpu.matmul %87, %96, %cst_26 {dimension_numbers = #tpu.dot_dimension_numbers<[2], [2], [1], [1], [0, 0, 0, 1, 1, 1], [0], [0]>} : vector<4x8x32xbf16>, vector<4x8x32xbf16>, vector<4x8x8xf32> -> vector<4x8x8xf32>
    "tpu.trace_stop"() : () -> ()
    %cst_27 = arith.constant dense<0xFF800000> : vector<4x8xf32>
    %107 = vector.multi_reduction <maximumf>, %106, %cst_27 [2] : vector<4x8x8xf32> to vector<4x8xf32>
    %108 = vector.shape_cast %107 : vector<4x8xf32> to vector<4x8x1xf32>
    %109 = vector.broadcast %108 : vector<4x8x1xf32> to vector<4x8x8xf32>
    %110 = arith.subf %106, %109 : vector<4x8x8xf32>
    %111 = math.exp %110 : vector<4x8x8xf32>
    %cst_28 = arith.constant dense<0.000000e+00> : vector<4x8xf32>
    %112 = vector.multi_reduction <add>, %111, %cst_28 [2] : vector<4x8x8xf32> to vector<4x8xf32>
    %113 = vector.shape_cast %112 : vector<4x8xf32> to vector<4x8x1xf32>
    %114 = tpu.reciprocal %113 {approx = true} : vector<4x8x1xf32> -> vector<4x8x1xf32>
    %115 = vector.broadcast %114 : vector<4x8x1xf32> to vector<4x8x8xf32>
    %116 = arith.mulf %111, %115 : vector<4x8x8xf32>
    %117 = arith.truncf %116 : vector<4x8x8xf32> to vector<4x8x8xbf16>
    "tpu.trace_start"() <{level = 10 : i32, message = "hqk,hkd->hqd"}> : () -> ()
    %cst_29 = arith.constant dense<0.000000e+00> : vector<4x8x32xf32>
    %118 = tpu.matmul %117, %105, %cst_29 {dimension_numbers = #tpu.dot_dimension_numbers<[2], [1], [1], [2], [0, 0, 0, 1, 1, 2], [0], [0]>} : vector<4x8x8xbf16>, vector<4x8x32xbf16>, vector<4x8x32xf32> -> vector<4x8x32xf32>
    "tpu.trace_stop"() : () -> ()
    %119 = arith.truncf %118 : vector<4x8x32xf32> to vector<4x8x32xbf16>
    %120 = vector.extract_strided_slice %119 {offsets = [0, 0, 0], sizes = [1, 8, 32], strides = [1, 1, 1]} : vector<4x8x32xbf16> to vector<1x8x32xbf16>
    %121 = vector.shape_cast %120 : vector<1x8x32xbf16> to vector<8x32xbf16>
    %122 = vector.extract_strided_slice %119 {offsets = [1, 0, 0], sizes = [1, 8, 32], strides = [1, 1, 1]} : vector<4x8x32xbf16> to vector<1x8x32xbf16>
    %123 = vector.shape_cast %122 : vector<1x8x32xbf16> to vector<8x32xbf16>
    %124 = vector.extract_strided_slice %119 {offsets = [2, 0, 0], sizes = [1, 8, 32], strides = [1, 1, 1]} : vector<4x8x32xbf16> to vector<1x8x32xbf16>
    %125 = vector.shape_cast %124 : vector<1x8x32xbf16> to vector<8x32xbf16>
    %126 = vector.extract_strided_slice %119 {offsets = [3, 0, 0], sizes = [1, 8, 32], strides = [1, 1, 1]} : vector<4x8x32xbf16> to vector<1x8x32xbf16>
    %127 = vector.shape_cast %126 : vector<1x8x32xbf16> to vector<8x32xbf16>
    %128 = tpu.concatenate %121, %123, %125, %127 in 1 : vector<8x32xbf16>, vector<8x32xbf16>, vector<8x32xbf16>, vector<8x32xbf16> -> vector<8x128xbf16>
    %129 = vector.extract_strided_slice %73 {offsets = [8, 0], sizes = [8, 128], strides = [1, 1]} : vector<16x128xbf16> to vector<8x128xbf16>
    %130 = vector.extract_strided_slice %74 {offsets = [8, 0], sizes = [8, 128], strides = [1, 1]} : vector<16x128xbf16> to vector<8x128xbf16>
    %131 = vector.extract_strided_slice %75 {offsets = [8, 0], sizes = [8, 128], strides = [1, 1]} : vector<16x128xbf16> to vector<8x128xbf16>
    %132 = vector.extract_strided_slice %129 {offsets = [0, 0], sizes = [8, 32], strides = [1, 1]} : vector<8x128xbf16> to vector<8x32xbf16>
    %133 = vector.extract_strided_slice %129 {offsets = [0, 32], sizes = [8, 32], strides = [1, 1]} : vector<8x128xbf16> to vector<8x32xbf16>
    %134 = vector.extract_strided_slice %129 {offsets = [0, 64], sizes = [8, 32], strides = [1, 1]} : vector<8x128xbf16> to vector<8x32xbf16>
    %135 = vector.extract_strided_slice %129 {offsets = [0, 96], sizes = [8, 32], strides = [1, 1]} : vector<8x128xbf16> to vector<8x32xbf16>
    %136 = vector.shape_cast %132 : vector<8x32xbf16> to vector<1x8x32xbf16>
    %137 = vector.shape_cast %133 : vector<8x32xbf16> to vector<1x8x32xbf16>
    %138 = vector.shape_cast %134 : vector<8x32xbf16> to vector<1x8x32xbf16>
    %139 = vector.shape_cast %135 : vector<8x32xbf16> to vector<1x8x32xbf16>
    %140 = tpu.concatenate %136, %137, %138, %139 in 0 : vector<1x8x32xbf16>, vector<1x8x32xbf16>, vector<1x8x32xbf16>, vector<1x8x32xbf16> -> vector<4x8x32xbf16>
    %141 = vector.extract_strided_slice %130 {offsets = [0, 0], sizes = [8, 32], strides = [1, 1]} : vector<8x128xbf16> to vector<8x32xbf16>
    %142 = vector.extract_strided_slice %130 {offsets = [0, 32], sizes = [8, 32], strides = [1, 1]} : vector<8x128xbf16> to vector<8x32xbf16>
    %143 = vector.extract_strided_slice %130 {offsets = [0, 64], sizes = [8, 32], strides = [1, 1]} : vector<8x128xbf16> to vector<8x32xbf16>
    %144 = vector.extract_strided_slice %130 {offsets = [0, 96], sizes = [8, 32], strides = [1, 1]} : vector<8x128xbf16> to vector<8x32xbf16>
    %145 = vector.shape_cast %141 : vector<8x32xbf16> to vector<1x8x32xbf16>
    %146 = vector.shape_cast %142 : vector<8x32xbf16> to vector<1x8x32xbf16>
    %147 = vector.shape_cast %143 : vector<8x32xbf16> to vector<1x8x32xbf16>
    %148 = vector.shape_cast %144 : vector<8x32xbf16> to vector<1x8x32xbf16>
    %149 = tpu.concatenate %145, %146, %147, %148 in 0 : vector<1x8x32xbf16>, vector<1x8x32xbf16>, vector<1x8x32xbf16>, vector<1x8x32xbf16> -> vector<4x8x32xbf16>
    %150 = vector.extract_strided_slice %131 {offsets = [0, 0], sizes = [8, 32], strides = [1, 1]} : vector<8x128xbf16> to vector<8x32xbf16>
    %151 = vector.extract_strided_slice %131 {offsets = [0, 32], sizes = [8, 32], strides = [1, 1]} : vector<8x128xbf16> to vector<8x32xbf16>
    %152 = vector.extract_strided_slice %131 {offsets = [0, 64], sizes = [8, 32], strides = [1, 1]} : vector<8x128xbf16> to vector<8x32xbf16>
    %153 = vector.extract_strided_slice %131 {offsets = [0, 96], sizes = [8, 32], strides = [1, 1]} : vector<8x128xbf16> to vector<8x32xbf16>
    %154 = vector.shape_cast %150 : vector<8x32xbf16> to vector<1x8x32xbf16>
    %155 = vector.shape_cast %151 : vector<8x32xbf16> to vector<1x8x32xbf16>
    %156 = vector.shape_cast %152 : vector<8x32xbf16> to vector<1x8x32xbf16>
    %157 = vector.shape_cast %153 : vector<8x32xbf16> to vector<1x8x32xbf16>
    %158 = tpu.concatenate %154, %155, %156, %157 in 0 : vector<1x8x32xbf16>, vector<1x8x32xbf16>, vector<1x8x32xbf16>, vector<1x8x32xbf16> -> vector<4x8x32xbf16>
    "tpu.trace_start"() <{level = 10 : i32, message = "hqd,hkd->hqk"}> : () -> ()
    %cst_30 = arith.constant dense<0.000000e+00> : vector<4x8x8xf32>
    %159 = tpu.matmul %140, %149, %cst_30 {dimension_numbers = #tpu.dot_dimension_numbers<[2], [2], [1], [1], [0, 0, 0, 1, 1, 1], [0], [0]>} : vector<4x8x32xbf16>, vector<4x8x32xbf16>, vector<4x8x8xf32> -> vector<4x8x8xf32>
    "tpu.trace_stop"() : () -> ()
    %cst_31 = arith.constant dense<0xFF800000> : vector<4x8xf32>
    %160 = vector.multi_reduction <maximumf>, %159, %cst_31 [2] : vector<4x8x8xf32> to vector<4x8xf32>
    %161 = vector.shape_cast %160 : vector<4x8xf32> to vector<4x8x1xf32>
    %162 = vector.broadcast %161 : vector<4x8x1xf32> to vector<4x8x8xf32>
    %163 = arith.subf %159, %162 : vector<4x8x8xf32>
    %164 = math.exp %163 : vector<4x8x8xf32>
    %cst_32 = arith.constant dense<0.000000e+00> : vector<4x8xf32>
    %165 = vector.multi_reduction <add>, %164, %cst_32 [2] : vector<4x8x8xf32> to vector<4x8xf32>
    %166 = vector.shape_cast %165 : vector<4x8xf32> to vector<4x8x1xf32>
    %167 = tpu.reciprocal %166 {approx = true} : vector<4x8x1xf32> -> vector<4x8x1xf32>
    %168 = vector.broadcast %167 : vector<4x8x1xf32> to vector<4x8x8xf32>
    %169 = arith.mulf %164, %168 : vector<4x8x8xf32>
    %170 = arith.truncf %169 : vector<4x8x8xf32> to vector<4x8x8xbf16>
    "tpu.trace_start"() <{level = 10 : i32, message = "hqk,hkd->hqd"}> : () -> ()
    %cst_33 = arith.constant dense<0.000000e+00> : vector<4x8x32xf32>
    %171 = tpu.matmul %170, %158, %cst_33 {dimension_numbers = #tpu.dot_dimension_numbers<[2], [1], [1], [2], [0, 0, 0, 1, 1, 2], [0], [0]>} : vector<4x8x8xbf16>, vector<4x8x32xbf16>, vector<4x8x32xf32> -> vector<4x8x32xf32>
    "tpu.trace_stop"() : () -> ()
    %172 = arith.truncf %171 : vector<4x8x32xf32> to vector<4x8x32xbf16>
    %173 = vector.extract_strided_slice %172 {offsets = [0, 0, 0], sizes = [1, 8, 32], strides = [1, 1, 1]} : vector<4x8x32xbf16> to vector<1x8x32xbf16>
    %174 = vector.shape_cast %173 : vector<1x8x32xbf16> to vector<8x32xbf16>
    %175 = vector.extract_strided_slice %172 {offsets = [1, 0, 0], sizes = [1, 8, 32], strides = [1, 1, 1]} : vector<4x8x32xbf16> to vector<1x8x32xbf16>
    %176 = vector.shape_cast %175 : vector<1x8x32xbf16> to vector<8x32xbf16>
    %177 = vector.extract_strided_slice %172 {offsets = [2, 0, 0], sizes = [1, 8, 32], strides = [1, 1, 1]} : vector<4x8x32xbf16> to vector<1x8x32xbf16>
    %178 = vector.shape_cast %177 : vector<1x8x32xbf16> to vector<8x32xbf16>
    %179 = vector.extract_strided_slice %172 {offsets = [3, 0, 0], sizes = [1, 8, 32], strides = [1, 1, 1]} : vector<4x8x32xbf16> to vector<1x8x32xbf16>
    %180 = vector.shape_cast %179 : vector<1x8x32xbf16> to vector<8x32xbf16>
    %181 = tpu.concatenate %174, %176, %178, %180 in 1 : vector<8x32xbf16>, vector<8x32xbf16>, vector<8x32xbf16>, vector<8x32xbf16> -> vector<8x128xbf16>
    %182 = tpu.concatenate %128, %181 in 0 : vector<8x128xbf16>, vector<8x128xbf16> -> vector<16x128xbf16>
    %cst_34 = arith.constant dense<0.000000e+00> : vector<16x128xf32>
    %183 = tpu.matmul %182, %16, %cst_34 {dimension_numbers = #tpu.dot_dimension_numbers<[1], [0], [0], [1], [0, 0, 1, 1], [], []>} : vector<16x128xbf16>, vector<128x128xbf16>, vector<16x128xf32> -> vector<16x128xf32>
    %184 = vector.shape_cast %30 : vector<128xf32> to vector<1x128xf32>
    %185 = vector.broadcast %184 : vector<1x128xf32> to vector<16x128xf32>
    %186 = arith.addf %183, %185 : vector<16x128xf32>
    %187 = arith.addf %4, %186 : vector<16x128xf32>
    %cst_35 = arith.constant dense<0.000000e+00> : vector<16xf32>
    %188 = vector.multi_reduction <add>, %187, %cst_35 [1] : vector<16x128xf32> to vector<16xf32>
    %189 = vector.shape_cast %188 : vector<16xf32> to vector<16x1xf32>
    %cst_36 = arith.constant 1.562500e-02 : f32
    %190 = vector.broadcast %cst_36 : f32 to vector<16x1xf32>
    %191 = arith.mulf %189, %190 : vector<16x1xf32>
    %192 = arith.mulf %187, %187 : vector<16x128xf32>
    %cst_37 = arith.constant dense<0.000000e+00> : vector<16xf32>
    %193 = vector.multi_reduction <add>, %192, %cst_37 [1] : vector<16x128xf32> to vector<16xf32>
    %194 = vector.shape_cast %193 : vector<16xf32> to vector<16x1xf32>
    %cst_38 = arith.constant 1.562500e-02 : f32
    %195 = vector.broadcast %cst_38 : f32 to vector<16x1xf32>
    %196 = arith.mulf %194, %195 : vector<16x1xf32>
    %197 = arith.mulf %191, %191 : vector<16x1xf32>
    %198 = arith.subf %196, %197 : vector<16x1xf32>
    %199 = vector.broadcast %191 : vector<16x1xf32> to vector<16x128xf32>
    %200 = arith.subf %187, %199 : vector<16x128xf32>
    %cst_39 = arith.constant 9.99999974E-6 : f32
    %201 = vector.broadcast %cst_39 : f32 to vector<16x1xf32>
    %202 = arith.addf %198, %201 : vector<16x1xf32>
    %203 = math.rsqrt %202 : vector<16x1xf32>
    %204 = vector.broadcast %203 : vector<16x1xf32> to vector<16x128xf32>
    %205 = arith.mulf %200, %204 : vector<16x128xf32>
    %206 = vector.shape_cast %42 : vector<128xf32> to vector<1x128xf32>
    %207 = vector.broadcast %206 : vector<1x128xf32> to vector<16x128xf32>
    %208 = arith.mulf %205, %207 : vector<16x128xf32>
    %209 = vector.shape_cast %44 : vector<128xf32> to vector<1x128xf32>
    %210 = vector.broadcast %209 : vector<1x128xf32> to vector<16x128xf32>
    %211 = arith.addf %208, %210 : vector<16x128xf32>
    %212 = arith.addf %211, %6 : vector<16x128xf32>
    %213 = arith.truncf %212 : vector<16x128xf32> to vector<16x128xbf16>
    %cst_40 = arith.constant dense<0.000000e+00> : vector<16x128xf32>
    %214 = tpu.matmul %213, %17, %cst_40 {dimension_numbers = #tpu.dot_dimension_numbers<[1], [0], [0], [1], [0, 0, 1, 1], [], []>} : vector<16x128xbf16>, vector<128x128xbf16>, vector<16x128xf32> -> vector<16x128xf32>
    %215 = vector.shape_cast %32 : vector<128xf32> to vector<1x128xf32>
    %216 = vector.broadcast %215 : vector<1x128xf32> to vector<16x128xf32>
    %217 = arith.addf %214, %216 : vector<16x128xf32>
    %218 = arith.addf %8, %10 : vector<32x128xf32>
    %219 = arith.truncf %218 : vector<32x128xf32> to vector<32x128xbf16>
    %cst_41 = arith.constant dense<0.000000e+00> : vector<32x128xf32>
    %220 = tpu.matmul %219, %18, %cst_41 {dimension_numbers = #tpu.dot_dimension_numbers<[1], [0], [0], [1], [0, 0, 1, 1], [], []>} : vector<32x128xbf16>, vector<128x128xbf16>, vector<32x128xf32> -> vector<32x128xf32>
    %221 = vector.shape_cast %34 : vector<128xf32> to vector<1x128xf32>
    %222 = vector.broadcast %221 : vector<1x128xf32> to vector<32x128xf32>
    %223 = arith.addf %220, %222 : vector<32x128xf32>
    %224 = arith.truncf %8 : vector<32x128xf32> to vector<32x128xbf16>
    %cst_42 = arith.constant dense<0.000000e+00> : vector<32x128xf32>
    %225 = tpu.matmul %224, %19, %cst_42 {dimension_numbers = #tpu.dot_dimension_numbers<[1], [0], [0], [1], [0, 0, 1, 1], [], []>} : vector<32x128xbf16>, vector<128x128xbf16>, vector<32x128xf32> -> vector<32x128xf32>
    %226 = vector.shape_cast %36 : vector<128xf32> to vector<1x128xf32>
    %227 = vector.broadcast %226 : vector<1x128xf32> to vector<32x128xf32>
    %228 = arith.addf %225, %227 : vector<32x128xf32>
    %cst_43 = arith.constant 2.500000e-01 : f32
    %229 = vector.broadcast %cst_43 : f32 to vector<16x128xf32>
    %230 = arith.mulf %217, %229 : vector<16x128xf32>
    %231 = arith.truncf %230 : vector<16x128xf32> to vector<16x128xbf16>
    %232 = arith.truncf %223 : vector<32x128xf32> to vector<32x128xbf16>
    %233 = arith.truncf %228 : vector<32x128xf32> to vector<32x128xbf16>
    %234 = vector.extract_strided_slice %231 {offsets = [0, 0], sizes = [8, 128], strides = [1, 1]} : vector<16x128xbf16> to vector<8x128xbf16>
    %235 = vector.extract_strided_slice %232 {offsets = [0, 0], sizes = [16, 128], strides = [1, 1]} : vector<32x128xbf16> to vector<16x128xbf16>
    %236 = vector.extract_strided_slice %233 {offsets = [0, 0], sizes = [16, 128], strides = [1, 1]} : vector<32x128xbf16> to vector<16x128xbf16>
    %237 = vector.extract_strided_slice %234 {offsets = [0, 0], sizes = [8, 32], strides = [1, 1]} : vector<8x128xbf16> to vector<8x32xbf16>
    %238 = vector.extract_strided_slice %234 {offsets = [0, 32], sizes = [8, 32], strides = [1, 1]} : vector<8x128xbf16> to vector<8x32xbf16>
    %239 = vector.extract_strided_slice %234 {offsets = [0, 64], sizes = [8, 32], strides = [1, 1]} : vector<8x128xbf16> to vector<8x32xbf16>
    %240 = vector.extract_strided_slice %234 {offsets = [0, 96], sizes = [8, 32], strides = [1, 1]} : vector<8x128xbf16> to vector<8x32xbf16>
    %241 = vector.shape_cast %237 : vector<8x32xbf16> to vector<1x8x32xbf16>
    %242 = vector.shape_cast %238 : vector<8x32xbf16> to vector<1x8x32xbf16>
    %243 = vector.shape_cast %239 : vector<8x32xbf16> to vector<1x8x32xbf16>
    %244 = vector.shape_cast %240 : vector<8x32xbf16> to vector<1x8x32xbf16>
    %245 = tpu.concatenate %241, %242, %243, %244 in 0 : vector<1x8x32xbf16>, vector<1x8x32xbf16>, vector<1x8x32xbf16>, vector<1x8x32xbf16> -> vector<4x8x32xbf16>
    %246 = vector.extract_strided_slice %235 {offsets = [0, 0], sizes = [16, 32], strides = [1, 1]} : vector<16x128xbf16> to vector<16x32xbf16>
    %247 = vector.extract_strided_slice %235 {offsets = [0, 32], sizes = [16, 32], strides = [1, 1]} : vector<16x128xbf16> to vector<16x32xbf16>
    %248 = vector.extract_strided_slice %235 {offsets = [0, 64], sizes = [16, 32], strides = [1, 1]} : vector<16x128xbf16> to vector<16x32xbf16>
    %249 = vector.extract_strided_slice %235 {offsets = [0, 96], sizes = [16, 32], strides = [1, 1]} : vector<16x128xbf16> to vector<16x32xbf16>
    %250 = vector.shape_cast %246 : vector<16x32xbf16> to vector<1x16x32xbf16>
    %251 = vector.shape_cast %247 : vector<16x32xbf16> to vector<1x16x32xbf16>
    %252 = vector.shape_cast %248 : vector<16x32xbf16> to vector<1x16x32xbf16>
    %253 = vector.shape_cast %249 : vector<16x32xbf16> to vector<1x16x32xbf16>
    %254 = tpu.concatenate %250, %251, %252, %253 in 0 : vector<1x16x32xbf16>, vector<1x16x32xbf16>, vector<1x16x32xbf16>, vector<1x16x32xbf16> -> vector<4x16x32xbf16>
    %255 = vector.extract_strided_slice %236 {offsets = [0, 0], sizes = [16, 32], strides = [1, 1]} : vector<16x128xbf16> to vector<16x32xbf16>
    %256 = vector.extract_strided_slice %236 {offsets = [0, 32], sizes = [16, 32], strides = [1, 1]} : vector<16x128xbf16> to vector<16x32xbf16>
    %257 = vector.extract_strided_slice %236 {offsets = [0, 64], sizes = [16, 32], strides = [1, 1]} : vector<16x128xbf16> to vector<16x32xbf16>
    %258 = vector.extract_strided_slice %236 {offsets = [0, 96], sizes = [16, 32], strides = [1, 1]} : vector<16x128xbf16> to vector<16x32xbf16>
    %259 = vector.shape_cast %255 : vector<16x32xbf16> to vector<1x16x32xbf16>
    %260 = vector.shape_cast %256 : vector<16x32xbf16> to vector<1x16x32xbf16>
    %261 = vector.shape_cast %257 : vector<16x32xbf16> to vector<1x16x32xbf16>
    %262 = vector.shape_cast %258 : vector<16x32xbf16> to vector<1x16x32xbf16>
    %263 = tpu.concatenate %259, %260, %261, %262 in 0 : vector<1x16x32xbf16>, vector<1x16x32xbf16>, vector<1x16x32xbf16>, vector<1x16x32xbf16> -> vector<4x16x32xbf16>
    "tpu.trace_start"() <{level = 10 : i32, message = "hqd,hkd->hqk"}> : () -> ()
    %cst_44 = arith.constant dense<0.000000e+00> : vector<4x8x16xf32>
    %264 = tpu.matmul %245, %254, %cst_44 {dimension_numbers = #tpu.dot_dimension_numbers<[2], [2], [1], [1], [0, 0, 0, 1, 1, 1], [0], [0]>} : vector<4x8x32xbf16>, vector<4x16x32xbf16>, vector<4x8x16xf32> -> vector<4x8x16xf32>
    "tpu.trace_stop"() : () -> ()
    %cst_45 = arith.constant dense<0xFF800000> : vector<4x8xf32>
    %265 = vector.multi_reduction <maximumf>, %264, %cst_45 [2] : vector<4x8x16xf32> to vector<4x8xf32>
    %266 = vector.shape_cast %265 : vector<4x8xf32> to vector<4x8x1xf32>
    %267 = vector.broadcast %266 : vector<4x8x1xf32> to vector<4x8x16xf32>
    %268 = arith.subf %264, %267 : vector<4x8x16xf32>
    %269 = math.exp %268 : vector<4x8x16xf32>
    %cst_46 = arith.constant dense<0.000000e+00> : vector<4x8xf32>
    %270 = vector.multi_reduction <add>, %269, %cst_46 [2] : vector<4x8x16xf32> to vector<4x8xf32>
    %271 = vector.shape_cast %270 : vector<4x8xf32> to vector<4x8x1xf32>
    %272 = tpu.reciprocal %271 {approx = true} : vector<4x8x1xf32> -> vector<4x8x1xf32>
    %273 = vector.broadcast %272 : vector<4x8x1xf32> to vector<4x8x16xf32>
    %274 = arith.mulf %269, %273 : vector<4x8x16xf32>
    %275 = arith.truncf %274 : vector<4x8x16xf32> to vector<4x8x16xbf16>
    "tpu.trace_start"() <{level = 10 : i32, message = "hqk,hkd->hqd"}> : () -> ()
    %cst_47 = arith.constant dense<0.000000e+00> : vector<4x8x32xf32>
    %276 = tpu.matmul %275, %263, %cst_47 {dimension_numbers = #tpu.dot_dimension_numbers<[2], [1], [1], [2], [0, 0, 0, 1, 1, 2], [0], [0]>} : vector<4x8x16xbf16>, vector<4x16x32xbf16>, vector<4x8x32xf32> -> vector<4x8x32xf32>
    "tpu.trace_stop"() : () -> ()
    %277 = arith.truncf %276 : vector<4x8x32xf32> to vector<4x8x32xbf16>
    %278 = vector.extract_strided_slice %277 {offsets = [0, 0, 0], sizes = [1, 8, 32], strides = [1, 1, 1]} : vector<4x8x32xbf16> to vector<1x8x32xbf16>
    %279 = vector.shape_cast %278 : vector<1x8x32xbf16> to vector<8x32xbf16>
    %280 = vector.extract_strided_slice %277 {offsets = [1, 0, 0], sizes = [1, 8, 32], strides = [1, 1, 1]} : vector<4x8x32xbf16> to vector<1x8x32xbf16>
    %281 = vector.shape_cast %280 : vector<1x8x32xbf16> to vector<8x32xbf16>
    %282 = vector.extract_strided_slice %277 {offsets = [2, 0, 0], sizes = [1, 8, 32], strides = [1, 1, 1]} : vector<4x8x32xbf16> to vector<1x8x32xbf16>
    %283 = vector.shape_cast %282 : vector<1x8x32xbf16> to vector<8x32xbf16>
    %284 = vector.extract_strided_slice %277 {offsets = [3, 0, 0], sizes = [1, 8, 32], strides = [1, 1, 1]} : vector<4x8x32xbf16> to vector<1x8x32xbf16>
    %285 = vector.shape_cast %284 : vector<1x8x32xbf16> to vector<8x32xbf16>
    %286 = tpu.concatenate %279, %281, %283, %285 in 1 : vector<8x32xbf16>, vector<8x32xbf16>, vector<8x32xbf16>, vector<8x32xbf16> -> vector<8x128xbf16>
    %287 = vector.extract_strided_slice %231 {offsets = [8, 0], sizes = [8, 128], strides = [1, 1]} : vector<16x128xbf16> to vector<8x128xbf16>
    %288 = vector.extract_strided_slice %232 {offsets = [16, 0], sizes = [16, 128], strides = [1, 1]} : vector<32x128xbf16> to vector<16x128xbf16>
    %289 = vector.extract_strided_slice %233 {offsets = [16, 0], sizes = [16, 128], strides = [1, 1]} : vector<32x128xbf16> to vector<16x128xbf16>
    %290 = vector.extract_strided_slice %287 {offsets = [0, 0], sizes = [8, 32], strides = [1, 1]} : vector<8x128xbf16> to vector<8x32xbf16>
    %291 = vector.extract_strided_slice %287 {offsets = [0, 32], sizes = [8, 32], strides = [1, 1]} : vector<8x128xbf16> to vector<8x32xbf16>
    %292 = vector.extract_strided_slice %287 {offsets = [0, 64], sizes = [8, 32], strides = [1, 1]} : vector<8x128xbf16> to vector<8x32xbf16>
    %293 = vector.extract_strided_slice %287 {offsets = [0, 96], sizes = [8, 32], strides = [1, 1]} : vector<8x128xbf16> to vector<8x32xbf16>
    %294 = vector.shape_cast %290 : vector<8x32xbf16> to vector<1x8x32xbf16>
    %295 = vector.shape_cast %291 : vector<8x32xbf16> to vector<1x8x32xbf16>
    %296 = vector.shape_cast %292 : vector<8x32xbf16> to vector<1x8x32xbf16>
    %297 = vector.shape_cast %293 : vector<8x32xbf16> to vector<1x8x32xbf16>
    %298 = tpu.concatenate %294, %295, %296, %297 in 0 : vector<1x8x32xbf16>, vector<1x8x32xbf16>, vector<1x8x32xbf16>, vector<1x8x32xbf16> -> vector<4x8x32xbf16>
    %299 = vector.extract_strided_slice %288 {offsets = [0, 0], sizes = [16, 32], strides = [1, 1]} : vector<16x128xbf16> to vector<16x32xbf16>
    %300 = vector.extract_strided_slice %288 {offsets = [0, 32], sizes = [16, 32], strides = [1, 1]} : vector<16x128xbf16> to vector<16x32xbf16>
    %301 = vector.extract_strided_slice %288 {offsets = [0, 64], sizes = [16, 32], strides = [1, 1]} : vector<16x128xbf16> to vector<16x32xbf16>
    %302 = vector.extract_strided_slice %288 {offsets = [0, 96], sizes = [16, 32], strides = [1, 1]} : vector<16x128xbf16> to vector<16x32xbf16>
    %303 = vector.shape_cast %299 : vector<16x32xbf16> to vector<1x16x32xbf16>
    %304 = vector.shape_cast %300 : vector<16x32xbf16> to vector<1x16x32xbf16>
    %305 = vector.shape_cast %301 : vector<16x32xbf16> to vector<1x16x32xbf16>
    %306 = vector.shape_cast %302 : vector<16x32xbf16> to vector<1x16x32xbf16>
    %307 = tpu.concatenate %303, %304, %305, %306 in 0 : vector<1x16x32xbf16>, vector<1x16x32xbf16>, vector<1x16x32xbf16>, vector<1x16x32xbf16> -> vector<4x16x32xbf16>
    %308 = vector.extract_strided_slice %289 {offsets = [0, 0], sizes = [16, 32], strides = [1, 1]} : vector<16x128xbf16> to vector<16x32xbf16>
    %309 = vector.extract_strided_slice %289 {offsets = [0, 32], sizes = [16, 32], strides = [1, 1]} : vector<16x128xbf16> to vector<16x32xbf16>
    %310 = vector.extract_strided_slice %289 {offsets = [0, 64], sizes = [16, 32], strides = [1, 1]} : vector<16x128xbf16> to vector<16x32xbf16>
    %311 = vector.extract_strided_slice %289 {offsets = [0, 96], sizes = [16, 32], strides = [1, 1]} : vector<16x128xbf16> to vector<16x32xbf16>
    %312 = vector.shape_cast %308 : vector<16x32xbf16> to vector<1x16x32xbf16>
    %313 = vector.shape_cast %309 : vector<16x32xbf16> to vector<1x16x32xbf16>
    %314 = vector.shape_cast %310 : vector<16x32xbf16> to vector<1x16x32xbf16>
    %315 = vector.shape_cast %311 : vector<16x32xbf16> to vector<1x16x32xbf16>
    %316 = tpu.concatenate %312, %313, %314, %315 in 0 : vector<1x16x32xbf16>, vector<1x16x32xbf16>, vector<1x16x32xbf16>, vector<1x16x32xbf16> -> vector<4x16x32xbf16>
    "tpu.trace_start"() <{level = 10 : i32, message = "hqd,hkd->hqk"}> : () -> ()
    %cst_48 = arith.constant dense<0.000000e+00> : vector<4x8x16xf32>
    %317 = tpu.matmul %298, %307, %cst_48 {dimension_numbers = #tpu.dot_dimension_numbers<[2], [2], [1], [1], [0, 0, 0, 1, 1, 1], [0], [0]>} : vector<4x8x32xbf16>, vector<4x16x32xbf16>, vector<4x8x16xf32> -> vector<4x8x16xf32>
    "tpu.trace_stop"() : () -> ()
    %cst_49 = arith.constant dense<0xFF800000> : vector<4x8xf32>
    %318 = vector.multi_reduction <maximumf>, %317, %cst_49 [2] : vector<4x8x16xf32> to vector<4x8xf32>
    %319 = vector.shape_cast %318 : vector<4x8xf32> to vector<4x8x1xf32>
    %320 = vector.broadcast %319 : vector<4x8x1xf32> to vector<4x8x16xf32>
    %321 = arith.subf %317, %320 : vector<4x8x16xf32>
    %322 = math.exp %321 : vector<4x8x16xf32>
    %cst_50 = arith.constant dense<0.000000e+00> : vector<4x8xf32>
    %323 = vector.multi_reduction <add>, %322, %cst_50 [2] : vector<4x8x16xf32> to vector<4x8xf32>
    %324 = vector.shape_cast %323 : vector<4x8xf32> to vector<4x8x1xf32>
    %325 = tpu.reciprocal %324 {approx = true} : vector<4x8x1xf32> -> vector<4x8x1xf32>
    %326 = vector.broadcast %325 : vector<4x8x1xf32> to vector<4x8x16xf32>
    %327 = arith.mulf %322, %326 : vector<4x8x16xf32>
    %328 = arith.truncf %327 : vector<4x8x16xf32> to vector<4x8x16xbf16>
    "tpu.trace_start"() <{level = 10 : i32, message = "hqk,hkd->hqd"}> : () -> ()
    %cst_51 = arith.constant dense<0.000000e+00> : vector<4x8x32xf32>
    %329 = tpu.matmul %328, %316, %cst_51 {dimension_numbers = #tpu.dot_dimension_numbers<[2], [1], [1], [2], [0, 0, 0, 1, 1, 2], [0], [0]>} : vector<4x8x16xbf16>, vector<4x16x32xbf16>, vector<4x8x32xf32> -> vector<4x8x32xf32>
    "tpu.trace_stop"() : () -> ()
    %330 = arith.truncf %329 : vector<4x8x32xf32> to vector<4x8x32xbf16>
    %331 = vector.extract_strided_slice %330 {offsets = [0, 0, 0], sizes = [1, 8, 32], strides = [1, 1, 1]} : vector<4x8x32xbf16> to vector<1x8x32xbf16>
    %332 = vector.shape_cast %331 : vector<1x8x32xbf16> to vector<8x32xbf16>
    %333 = vector.extract_strided_slice %330 {offsets = [1, 0, 0], sizes = [1, 8, 32], strides = [1, 1, 1]} : vector<4x8x32xbf16> to vector<1x8x32xbf16>
    %334 = vector.shape_cast %333 : vector<1x8x32xbf16> to vector<8x32xbf16>
    %335 = vector.extract_strided_slice %330 {offsets = [2, 0, 0], sizes = [1, 8, 32], strides = [1, 1, 1]} : vector<4x8x32xbf16> to vector<1x8x32xbf16>
    %336 = vector.shape_cast %335 : vector<1x8x32xbf16> to vector<8x32xbf16>
    %337 = vector.extract_strided_slice %330 {offsets = [3, 0, 0], sizes = [1, 8, 32], strides = [1, 1, 1]} : vector<4x8x32xbf16> to vector<1x8x32xbf16>
    %338 = vector.shape_cast %337 : vector<1x8x32xbf16> to vector<8x32xbf16>
    %339 = tpu.concatenate %332, %334, %336, %338 in 1 : vector<8x32xbf16>, vector<8x32xbf16>, vector<8x32xbf16>, vector<8x32xbf16> -> vector<8x128xbf16>
    %340 = tpu.concatenate %286, %339 in 0 : vector<8x128xbf16>, vector<8x128xbf16> -> vector<16x128xbf16>
    %cst_52 = arith.constant dense<0.000000e+00> : vector<16x128xf32>
    %341 = tpu.matmul %340, %20, %cst_52 {dimension_numbers = #tpu.dot_dimension_numbers<[1], [0], [0], [1], [0, 0, 1, 1], [], []>} : vector<16x128xbf16>, vector<128x128xbf16>, vector<16x128xf32> -> vector<16x128xf32>
    %342 = vector.shape_cast %38 : vector<128xf32> to vector<1x128xf32>
    %343 = vector.broadcast %342 : vector<1x128xf32> to vector<16x128xf32>
    %344 = arith.addf %341, %343 : vector<16x128xf32>
    %345 = arith.addf %211, %344 : vector<16x128xf32>
    %cst_53 = arith.constant dense<0.000000e+00> : vector<16xf32>
    %346 = vector.multi_reduction <add>, %345, %cst_53 [1] : vector<16x128xf32> to vector<16xf32>
    %347 = vector.shape_cast %346 : vector<16xf32> to vector<16x1xf32>
    %cst_54 = arith.constant 1.562500e-02 : f32
    %348 = vector.broadcast %cst_54 : f32 to vector<16x1xf32>
    %349 = arith.mulf %347, %348 : vector<16x1xf32>
    %350 = arith.mulf %345, %345 : vector<16x128xf32>
    %cst_55 = arith.constant dense<0.000000e+00> : vector<16xf32>
    %351 = vector.multi_reduction <add>, %350, %cst_55 [1] : vector<16x128xf32> to vector<16xf32>
    %352 = vector.shape_cast %351 : vector<16xf32> to vector<16x1xf32>
    %cst_56 = arith.constant 1.562500e-02 : f32
    %353 = vector.broadcast %cst_56 : f32 to vector<16x1xf32>
    %354 = arith.mulf %352, %353 : vector<16x1xf32>
    %355 = arith.mulf %349, %349 : vector<16x1xf32>
    %356 = arith.subf %354, %355 : vector<16x1xf32>
    %357 = vector.broadcast %349 : vector<16x1xf32> to vector<16x128xf32>
    %358 = arith.subf %345, %357 : vector<16x128xf32>
    %cst_57 = arith.constant 9.99999974E-6 : f32
    %359 = vector.broadcast %cst_57 : f32 to vector<16x1xf32>
    %360 = arith.addf %356, %359 : vector<16x1xf32>
    %361 = math.rsqrt %360 : vector<16x1xf32>
    %362 = vector.broadcast %361 : vector<16x1xf32> to vector<16x128xf32>
    %363 = arith.mulf %358, %362 : vector<16x128xf32>
    %364 = vector.shape_cast %46 : vector<128xf32> to vector<1x128xf32>
    %365 = vector.broadcast %364 : vector<1x128xf32> to vector<16x128xf32>
    %366 = arith.mulf %363, %365 : vector<16x128xf32>
    %367 = vector.shape_cast %48 : vector<128xf32> to vector<1x128xf32>
    %368 = vector.broadcast %367 : vector<1x128xf32> to vector<16x128xf32>
    %369 = arith.addf %366, %368 : vector<16x128xf32>
    %370 = arith.truncf %369 : vector<16x128xf32> to vector<16x128xbf16>
    %c0_58 = arith.constant 0 : index
    %c0_59 = arith.constant 0 : index
    %c0_60 = arith.constant 0 : index
    %371 = vector.load %arg7[%c0_58, %c0_59, %c0_60] : memref<1x128x128xbf16, #tpu.memory_space<vmem>>, vector<1x128x128xbf16>
    %372 = vector.shape_cast %371 : vector<1x128x128xbf16> to vector<128x128xbf16>
    %cst_61 = arith.constant dense<0.000000e+00> : vector<16x128xf32>
    %373 = tpu.matmul %370, %372, %cst_61 {dimension_numbers = #tpu.dot_dimension_numbers<[1], [0], [0], [1], [0, 0, 1, 1], [], []>} : vector<16x128xbf16>, vector<128x128xbf16>, vector<16x128xf32> -> vector<16x128xf32>
    %374 = vector.broadcast %54 : vector<1x128xf32> to vector<16x128xf32>
    %375 = arith.addf %373, %374 : vector<16x128xf32>
    %cst_62 = arith.constant 0.000000e+00 : f32
    %376 = vector.broadcast %cst_62 : f32 to vector<16x128xf32>
    %377 = arith.maximumf %375, %376 : vector<16x128xf32>
    %378 = arith.truncf %377 : vector<16x128xf32> to vector<16x128xbf16>
    %c0_63 = arith.constant 0 : index
    %c0_64 = arith.constant 0 : index
    %c0_65 = arith.constant 0 : index
    %379 = vector.load %arg8[%c0_63, %c0_64, %c0_65] : memref<1x128x128xbf16, #tpu.memory_space<vmem>>, vector<1x128x128xbf16>
    %380 = vector.shape_cast %379 : vector<1x128x128xbf16> to vector<128x128xbf16>
    %cst_66 = arith.constant dense<0.000000e+00> : vector<16x128xf32>
    %381 = tpu.matmul %378, %380, %cst_66 {dimension_numbers = #tpu.dot_dimension_numbers<[1], [0], [0], [1], [0, 0, 1, 1], [], []>} : vector<16x128xbf16>, vector<128x128xbf16>, vector<16x128xf32> -> vector<16x128xf32>
    %382 = vector.shape_cast %40 : vector<128xf32> to vector<1x128xf32>
    %383 = vector.broadcast %382 : vector<1x128xf32> to vector<16x128xf32>
    %384 = arith.addf %381, %383 : vector<16x128xf32>
    %385 = arith.addf %369, %384 : vector<16x128xf32>
    %cst_67 = arith.constant dense<0.000000e+00> : vector<16xf32>
    %386 = vector.multi_reduction <add>, %385, %cst_67 [1] : vector<16x128xf32> to vector<16xf32>
    %387 = vector.shape_cast %386 : vector<16xf32> to vector<16x1xf32>
    %cst_68 = arith.constant 1.562500e-02 : f32
    %388 = vector.broadcast %cst_68 : f32 to vector<16x1xf32>
    %389 = arith.mulf %387, %388 : vector<16x1xf32>
    %390 = arith.mulf %385, %385 : vector<16x128xf32>
    %cst_69 = arith.constant dense<0.000000e+00> : vector<16xf32>
    %391 = vector.multi_reduction <add>, %390, %cst_69 [1] : vector<16x128xf32> to vector<16xf32>
    %392 = vector.shape_cast %391 : vector<16xf32> to vector<16x1xf32>
    %cst_70 = arith.constant 1.562500e-02 : f32
    %393 = vector.broadcast %cst_70 : f32 to vector<16x1xf32>
    %394 = arith.mulf %392, %393 : vector<16x1xf32>
    %395 = arith.mulf %389, %389 : vector<16x1xf32>
    %396 = arith.subf %394, %395 : vector<16x1xf32>
    %397 = vector.broadcast %389 : vector<16x1xf32> to vector<16x128xf32>
    %398 = arith.subf %385, %397 : vector<16x128xf32>
    %cst_71 = arith.constant 9.99999974E-6 : f32
    %399 = vector.broadcast %cst_71 : f32 to vector<16x1xf32>
    %400 = arith.addf %396, %399 : vector<16x1xf32>
    %401 = math.rsqrt %400 : vector<16x1xf32>
    %402 = vector.broadcast %401 : vector<16x1xf32> to vector<16x128xf32>
    %403 = arith.mulf %398, %402 : vector<16x128xf32>
    %404 = vector.shape_cast %50 : vector<128xf32> to vector<1x128xf32>
    %405 = vector.broadcast %404 : vector<1x128xf32> to vector<16x128xf32>
    %406 = arith.mulf %403, %405 : vector<16x128xf32>
    %407 = vector.shape_cast %52 : vector<128xf32> to vector<1x128xf32>
    %408 = vector.broadcast %407 : vector<1x128xf32> to vector<16x128xf32>
    %409 = arith.addf %406, %408 : vector<16x128xf32>
    %410 = vector.shape_cast %409 : vector<16x128xf32> to vector<2x8x128xf32>
    %c0_72 = arith.constant 0 : index
    %c0_73 = arith.constant 0 : index
    %c0_74 = arith.constant 0 : index
    %411 = vector.load %arg13[%c0_72, %c0_73, %c0_74] : memref<2x8x128xf32, #tpu.memory_space<vmem>>, vector<2x8x128xf32>
    tpu.vector_store %arg13[%c0_72, %c0_73, %c0_74], %410 {strides = array<i32>} : memref<2x8x128xf32, #tpu.memory_space<vmem>>, vector<2x8x128xf32>,
    %c1_i32 = arith.constant 1 : i32
    %412 = arith.cmpi eq, %arg0, %c1_i32 : i32
    %413 = arith.extui %412 : i1 to i32
    %c0_i32_75 = arith.constant 0 : i32
    %414 = arith.cmpi ne, %413, %c0_i32_75 : i32
    scf.if %414 {
      %c0_76 = arith.constant 0 : index
      %c0_77 = arith.constant 0 : index
      %415 = vector.load %arg11[%c0_76, %c0_77] : memref<2x128xf32, #tpu.memory_space<vmem>>, vector<2x128xf32>
      %416 = vector.extract_strided_slice %415 {offsets = [0, 0], sizes = [1, 128], strides = [1, 1]} : vector<2x128xf32> to vector<1x128xf32>
      %417 = vector.shape_cast %416 : vector<1x128xf32> to vector<128xf32>
      %418 = vector.extract_strided_slice %415 {offsets = [1, 0], sizes = [1, 128], strides = [1, 1]} : vector<2x128xf32> to vector<1x128xf32>
      %419 = vector.shape_cast %418 : vector<1x128xf32> to vector<128xf32>
      %cst_78 = arith.constant dense<0.000000e+00> : vector<16xf32>
      %420 = vector.multi_reduction <add>, %409, %cst_78 [1] : vector<16x128xf32> to vector<16xf32>
      %421 = vector.shape_cast %420 : vector<16xf32> to vector<16x1xf32>
      %cst_79 = arith.constant 1.562500e-02 : f32
      %422 = vector.broadcast %cst_79 : f32 to vector<16x1xf32>
      %423 = arith.mulf %421, %422 : vector<16x1xf32>
      %424 = arith.mulf %409, %409 : vector<16x128xf32>
      %cst_80 = arith.constant dense<0.000000e+00> : vector<16xf32>
      %425 = vector.multi_reduction <add>, %424, %cst_80 [1] : vector<16x128xf32> to vector<16xf32>
      %426 = vector.shape_cast %425 : vector<16xf32> to vector<16x1xf32>
      %cst_81 = arith.constant 1.562500e-02 : f32
      %427 = vector.broadcast %cst_81 : f32 to vector<16x1xf32>
      %428 = arith.mulf %426, %427 : vector<16x1xf32>
      %429 = arith.mulf %423, %423 : vector<16x1xf32>
      %430 = arith.subf %428, %429 : vector<16x1xf32>
      %431 = vector.broadcast %423 : vector<16x1xf32> to vector<16x128xf32>
      %432 = arith.subf %409, %431 : vector<16x128xf32>
      %cst_82 = arith.constant 9.99999974E-6 : f32
      %433 = vector.broadcast %cst_82 : f32 to vector<16x1xf32>
      %434 = arith.addf %430, %433 : vector<16x1xf32>
      %435 = math.rsqrt %434 : vector<16x1xf32>
      %436 = vector.broadcast %435 : vector<16x1xf32> to vector<16x128xf32>
      %437 = arith.mulf %432, %436 : vector<16x128xf32>
      %438 = vector.shape_cast %417 : vector<128xf32> to vector<1x128xf32>
      %439 = vector.broadcast %438 : vector<1x128xf32> to vector<16x128xf32>
      %440 = arith.mulf %437, %439 : vector<16x128xf32>
      %441 = vector.shape_cast %419 : vector<128xf32> to vector<1x128xf32>
      %442 = vector.broadcast %441 : vector<1x128xf32> to vector<16x128xf32>
      %443 = arith.addf %440, %442 : vector<16x128xf32>
      %444 = vector.shape_cast %443 : vector<16x128xf32> to vector<2x8x128xf32>
      %c0_83 = arith.constant 0 : index
      %c0_84 = arith.constant 0 : index
      %c0_85 = arith.constant 0 : index
      %445 = vector.load %arg12[%c0_83, %c0_84, %c0_85] : memref<2x8x128xf32, #tpu.memory_space<vmem>>, vector<2x8x128xf32>
      tpu.vector_store %arg12[%c0_83, %c0_84, %c0_85], %444 {strides = array<i32>} : memref<2x8x128xf32, #tpu.memory_space<vmem>>, vector<2x8x128xf32>,
    } else {
    }
    return
  }
  func.func @transform_0(%arg0: i32) -> (i32, i32, i32) {
    %c0_i32 = arith.constant 0 : i32
    %c0_i32_0 = arith.constant 0 : i32
    %c0_i32_1 = arith.constant 0 : i32
    %c0_i32_2 = arith.constant 0 : i32
    return %c0_i32, %c0_i32_0, %c0_i32_1 : i32, i32, i32
  }
  func.func @transform_1(%arg0: i32) -> (i32, i32, i32) {
    %c0_i32 = arith.constant 0 : i32
    %c0_i32_0 = arith.constant 0 : i32
    %c0_i32_1 = arith.constant 0 : i32
    %c0_i32_2 = arith.constant 0 : i32
    return %c0_i32, %c0_i32_0, %c0_i32_1 : i32, i32, i32
  }
  func.func @transform_2(%arg0: i32) -> (i32, i32, i32) {
    %c0_i32 = arith.constant 0 : i32
    %c0_i32_0 = arith.constant 0 : i32
    %c0_i32_1 = arith.constant 0 : i32
    %c0_i32_2 = arith.constant 0 : i32
    return %c0_i32, %c0_i32_0, %c0_i32_1 : i32, i32, i32
  }
  func.func @transform_3(%arg0: i32) -> (i32, i32, i32) {
    %c0_i32 = arith.constant 0 : i32
    %c0_i32_0 = arith.constant 0 : i32
    %c0_i32_1 = arith.constant 0 : i32
    %c0_i32_2 = arith.constant 0 : i32
    return %c0_i32, %c0_i32_0, %c0_i32_1 : i32, i32, i32
  }
  func.func @transform_4(%arg0: i32) -> (i32, i32, i32) {
    %c0_i32 = arith.constant 0 : i32
    %c0_i32_0 = arith.constant 0 : i32
    %c0_i32_1 = arith.constant 0 : i32
    return %arg0, %c0_i32, %c0_i32_0 : i32, i32, i32
  }
  func.func @transform_5(%arg0: i32) -> (i32, i32, i32) {
    %c0_i32 = arith.constant 0 : i32
    %c0_i32_0 = arith.constant 0 : i32
    %c0_i32_1 = arith.constant 0 : i32
    return %arg0, %c0_i32, %c0_i32_0 : i32, i32, i32
  }
  func.func @transform_6(%arg0: i32) -> (i32, i32, i32) {
    %c0_i32 = arith.constant 0 : i32
    %c0_i32_0 = arith.constant 0 : i32
    %c0_i32_1 = arith.constant 0 : i32
    return %arg0, %c0_i32, %c0_i32_0 : i32, i32, i32
  }
  func.func @transform_7(%arg0: i32) -> (i32, i32, i32) {
    %c0_i32 = arith.constant 0 : i32
    %c0_i32_0 = arith.constant 0 : i32
    %c0_i32_1 = arith.constant 0 : i32
    return %arg0, %c0_i32, %c0_i32_0 : i32, i32, i32
  }
  func.func @transform_8(%arg0: i32) -> (i32, i32, i32) {
    %c0_i32 = arith.constant 0 : i32
    %c0_i32_0 = arith.constant 0 : i32
    %c0_i32_1 = arith.constant 0 : i32
    return %arg0, %c0_i32, %c0_i32_0 : i32, i32, i32
  }
  func.func @transform_9(%arg0: i32) -> (i32, i32, i32) {
    %c0_i32 = arith.constant 0 : i32
    %c0_i32_0 = arith.constant 0 : i32
    %c0_i32_1 = arith.constant 0 : i32
    return %arg0, %c0_i32, %c0_i32_0 : i32, i32, i32
  }
  func.func @transform_10(%arg0: i32) -> (i32, i32) {
    %c0_i32 = arith.constant 0 : i32
    %c0_i32_0 = arith.constant 0 : i32
    %c0_i32_1 = arith.constant 0 : i32
    return %c0_i32, %c0_i32_0 : i32, i32
  }
  func.func @transform_11(%arg0: i32) -> (i32, i32, i32) {
    %c0_i32 = arith.constant 0 : i32
    %c0_i32_0 = arith.constant 0 : i32
    %c0_i32_1 = arith.constant 0 : i32
    %c0_i32_2 = arith.constant 0 : i32
    return %c0_i32, %c0_i32_0, %c0_i32_1 : i32, i32, i32
  }
  func.func @transform_12(%arg0: i32) -> (i32, i32, i32) {
    %c0_i32 = arith.constant 0 : i32
    %c0_i32_0 = arith.constant 0 : i32
    %c0_i32_1 = arith.constant 0 : i32
    %c0_i32_2 = arith.constant 0 : i32
    return %c0_i32, %c0_i32_0, %c0_i32_1 : i32, i32, i32
  }
}

</mosaic_0001>

<bundles_post_ra>
// kernel: swin_une_transformer_forward.1
= control target key start
LH: loop header
LB: loop body
LE: loop exit
PB: predicated region body
PF: predicated region fallthrough
CT: control target
= control target key end

     0   :  { %s5719_s0 = inlined_call_operand.vmem [shape: f32[2,8,128], index: 0, kind: input, shape index: {}]   ;;  %s5720_s1 = inlined_call_operand.vmem [shape: f32[2,16,128], index: 1, kind: input, shape index: {}]   ;;  %s5721_s2 = inlined_call_operand.vmem [shape: f32[2,8,128], index: 2, kind: input, shape index: {}]   ;;  %s5722_s3 = inlined_call_operand.vmem [shape: f32[2,16,128], index: 3, kind: input, shape index: {}]   ;;  %s5723_s4 = inlined_call_operand.vmem [shape: bf16[2,128,256], index: 4, kind: input, shape index: {}]   ;;  %s5724_s5 = inlined_call_operand.hbm [shape: bf16[2,768,128], index: 5, kind: input, shape index: {}]   ;;  %s5725_s6 = inlined_call_operand.hbm [shape: bf16[2,128,128], index: 6, kind: input, shape index: {}]   ;;  %s5726_s7 = inlined_call_operand.hbm [shape: bf16[2,128,128], index: 7, kind: input, shape index: {}]   ;;  %s5727_s8 = inlined_call_operand.vmem [shape: f32[2,16,128], index: 8, kind: input, shape index: {}]   ;;  %s5728_s9 = inlined_call_operand.vmem [shape: f32[2,1,128], index: 9, kind: input, shape index: {}]   ;;  %s5729_s10 = inlined_call_operand.vmem [shape: f32[2,128], index: 10, kind: input, shape index: {}]   ;;  %s5730_s11 = inlined_call_operand.vmem [shape: f32[2,8,128], index: 11, kind: output, shape index: {0}]   ;;  %s5731_s12 = inlined_call_operand.vmem [shape: f32[2,8,128], index: 12, kind: output, shape index: {1}]  }
   0x1   :  { %5743 = sst [smem:[#allocation12_spill]] %s5725_s6 }
   0x2   :  { %5744 = sst [smem:[#allocation13_spill]] %s5729_s10 }
   0x3   :  { %5745 = sst [smem:[#allocation14_spill]] %s5730_s11 }
   0x4   :  { %18 = vsyncpa [#allocation3], 0 }
   0x5   :  { %20 = vsyncpa [#allocation3 + $0x1], 0 }
   0x6   :  { %21 = vsyncpa [#allocation5], 0 }
   0x7   :  { %23 = vsyncpa [#allocation5 + $0x1], 0  ;;  %s4814_s21 = smov 0   ;;  %s4816_s22 = smov 0  }
   0x8   :  { %s4818_s23 = smov 0   ;;  %s4820_s24 = smov 0  }
   0x9 LB: > { %5746 = sst [smem:[#allocation9_spill]] %s4732_s23  ;;  %s4833_s25 = sadd.s32 4294967295, %s4736_s24   ;;  %s4736_s24 = sphi %s4820_s24, %s5762_s24   ;;  %s4732_s23 = sphi %s4818_s23, %s5764_s23   ;;  %s4728_s22 = sphi %s4816_s22, %s5766_s22   ;;  %s4724_s21 = sphi %s4814_s21, %s5765_s21  }
   0xa   : > { %s4836_s26 = sadd.s32 1, %s4736_s24   ;;  %s146_s28 = sadd.s32 1, %s4732_s23 }
   0xb   : > { %5747 = sst [smem:[#allocation10_spill]] %s4836_s26  ;;  %s143_s27 = ssub.s32 %s4736_s24, %s4836_s26 }
   0xc   : > { %p144_p0 = scmp.eq.s32.totalorder %s143_s27, 0  ;;  %p153_p1 = scmp.ne.s32.totalorder %s4732_s23, %s4728_s22 }
   0xd   : > { %p154_p2 = scmp.eq.s32.totalorder %s4736_s24, 0  ;;  %p159_p3 = scmp.ne.s32.totalorder %s4728_s22, %s4724_s21 }
   0xe   : > { %s4846_s29 = scalar_select %p144_p0, %s4732_s23, %s146_s28  }
   0xf   : > { %p155_p4 = por %p154_p2, %p153_p1  ;;  %p160_p5 = scmp.eq.s32.totalorder %s4833_s25, 0 }
  0x10   : > { %5748 = sst [smem:[#allocation11_spill]] %s4846_s29  ;;  %p4393_p6 = scmp.lt.s32.totalorder %s4736_s24, 2 }
  0x11   : > { %p4850_p7 = por %p160_p5, %p159_p3  ;;  %s4855_s13 = sand.u32 1, %s4732_s23  }
  0x12   : > { %p4857_p8 = pnand %p4393_p6, %p155_p4  ;;  %s394_s15 = sand.u32 1, %s4736_s24  }
  0x13   : > { %s5749_s30 = scalar_select %p4850_p7, 1, 0 }
  0x14   : > { %s5734_s16 = sshll.u32 %s4855_s13, 6  ;;  %s5733_s17 = sshll.u32 %s4736_s24, 10 }
  0x15   : > { %s5751_s6 = sld [smem:[#allocation12_spill]]  ;;  %s398_s21 = scalar_lea.vmem [#allocation4], %s5734_s16 }
  0x16   : > { %s405_s27 = sshll.u32 %s398_s21, 4  ;;  %s4875_s28 = scalar_lea.sflag [#allocation5], %s394_s15  ;;  %s4873_s27 = int_to_ptr.vmem [resolvable:$true] %s405_s27 }
  0x17   : > { %p4881_p10 = pneg %p4857_p8 }
  0x1b   : > { %s4869_s20 = scalar_lea.hbm %s5751_s6, %s5733_s17  ;;  %s4613_s17 = scalar_lea.hbm %s5751_s6, 2048 }
  0x1c   : > { %s4608_s29 = scalar_lea.hbm %s4869_s20, 1024  ;;  %p4614_p13 = scmp.lt.u32.totalorder %s4869_s20, %s5751_s6 }
  0x1d   : > { %p4609_p9 = scmp.ne.s32.totalorder %s4869_s20, %s4608_s29  ;;  %p4615_p0 = scmp.lt.u32.totalorder %s4613_s17, %s4608_s29 }
  0x1e   : > { %p4617_p2 = scmp.lt.u32.totalorder %s4608_s29, %s4869_s20 }
  0x1f   : > { %p4611_p11 = pnand %p4881_p10, %p4609_p9  ;;  %p4616_p1 = por %p4615_p0, %p4614_p13 }
  0x21   : > { %p4612_p12 = pneg %p4611_p11  ;;  %p4618_p3 = por %p4617_p2, %p4616_p1 }
  0x23   : > { %p4619_p4 = pnand %p4618_p3, %p4612_p12 }
  0x25   : > { %4622 = shalt.err (!%p4619_p4)
}
  0x26   : > { %s4623_s15 = scalar_lea.vmem %s4873_s27, 1024  ;;  %s4738_s18 = smov [#allocation4]  }
  0x27   : > { %p4624_p5 = scmp.ne.s32.totalorder %s4873_s27, %s4623_s15  ;;  %s4628_s19 = sshll.u32 %s4738_s18, 4  ;;  %s4629_s19 = int_to_ptr.vmem [resolvable:$false] %s4628_s19 }
  0x28   : > { %s4630_s16 = scalar_lea.vmem %s4629_s19, 2048  ;;  %p4631_p11 = scmp.lt.s32.totalorder %s4873_s27, %s4629_s19 }
  0x29   : > { %p4626_p6 = pnand %p4624_p5, %p4881_p10  ;;  %p4632_p7 = scmp.lt.s32.totalorder %s4630_s16, %s4623_s15 }
  0x2b   : > { %p4627_p9 = pneg %p4626_p6  ;;  %p4633_p13 = por %p4632_p7, %p4631_p11 }
  0x2d   : > { %p4634_p0 = pnand %p4633_p13, %p4627_p9 }
  0x2f   : > { %4637 = shalt.err (!%p4634_p0)
}
  0x30   : > { %s5739_s29 = smov 64   ;;  %s5741_s17 = smov 4  }
  0x31   : > { %4389 = dma.hbm_to_vmem [thread:$0]  (!%p4857_p8), %s4869_s20, 1024, %s4873_s27, %s4875_s28, %s5739_s29, %s5739_s29, %s5741_s17  }
  0x32   : > { %s5753_s21 = sshll.u32 %s4855_s13, 6  ;;  %p3756_p7 = scmp.ge.s32.totalorder %s4736_s24, 1 }
  0x33   : > { %s419_s15 = scalar_lea.vmem [#allocation6], %s5753_s21  ;;  %s5754_s19 = sshll.u32 %s4736_s24, 10 }
  0x34   : > { %s426_s18 = sshll.u32 %s419_s15, 4  ;;  %s4916_s26 = scalar_lea.hbm %s5726_s7, %s5754_s19  ;;  %s4919_s18 = int_to_ptr.vmem [resolvable:$true] %s426_s18 }
  0x35   : > { %p448_p12 = scmp.lt.s32.totalorder %s4736_s24, 3  ;;  %s4374_s11 = smul.u32 384, %s4855_s13 }
  0x36   : > { %s4375_s20 = smul.u32 6144, %s4736_s24  ;;  %s374_s16 = scalar_lea.sflag [#allocation3], %s4855_s13 }
  0x37   : > { %p4922_p1 = pnand %p3756_p7, %p448_p12  ;;  %s377_s6 = scalar_lea.vmem [#allocation2], %s4374_s11 }
  0x38   : > { %s4930_s15 = scalar_lea.hbm %s5724_s5, %s4375_s20  ;;  %s384_s19 = sshll.u32 %s377_s6, 4  ;;  %s4932_s19 = int_to_ptr.vmem [resolvable:$true] %s384_s19 }
  0x39   : > { %s5755_s10 = scalar_select %p4922_p1, 1, 0 }
  0x3a   : > { %s4638_s29 = scalar_lea.hbm %s4930_s15, 6144  ;;  %s4643_s27 = scalar_lea.hbm %s5724_s5, 12288 }
  0x3b   : > { %p4639_p2 = scmp.ne.s32.totalorder %s4930_s15, %s4638_s29  ;;  %p4644_p5 = scmp.lt.u32.totalorder %s4930_s15, %s5724_s5 }
  0x3c   : > { %p4645_p6 = scmp.lt.u32.totalorder %s4643_s27, %s4638_s29  ;;  %p4647_p11 = scmp.lt.u32.totalorder %s4638_s29, %s4930_s15 }
  0x3d   : > { %p4641_p3 = pnand %p4639_p2, %p4881_p10 }
  0x3e   : > { %p4646_p9 = por %p4645_p6, %p4644_p5 }
  0x3f   : > { %p4642_p4 = pneg %p4641_p3 }
  0x40   : > { %p4648_p13 = por %p4647_p11, %p4646_p9 }
  0x42   : > { %p4649_p0 = pnand %p4648_p13, %p4642_p4 }
  0x44   : > { %4652 = shalt.err (!%p4649_p0)
}
  0x45   : > { %s4653_s11 = scalar_lea.vmem %s4932_s19, 6144  ;;  %s4741_s17 = smov [#allocation2]  }
  0x46   : > { %p4654_p7 = scmp.ne.s32.totalorder %s4932_s19, %s4653_s11  ;;  %s4658_s6 = sshll.u32 %s4741_s17, 4  ;;  %s4659_s6 = int_to_ptr.vmem [resolvable:$false] %s4658_s6 }
  0x47   : > { %s4660_s24 = scalar_lea.vmem %s4659_s6, 12288  ;;  %p4661_p3 = scmp.lt.s32.totalorder %s4932_s19, %s4659_s6 }
  0x48   : > { %p4656_p12 = pnand %p4654_p7, %p4881_p10  ;;  %p4662_p1 = scmp.lt.s32.totalorder %s4660_s24, %s4653_s11 }
  0x4a   : > { %p4657_p2 = pneg %p4656_p12  ;;  %p4663_p5 = por %p4662_p1, %p4661_p3 }
  0x4c   : > { %p4664_p6 = pnand %p4663_p5, %p4657_p2 }
  0x4e   : > { %4667 = shalt.err (!%p4664_p6)
}
  0x4f   : > { %s5756_s29 = smov 4   ;;  %s5757_s27 = smov 64  }
  0x50   : > { %4386 = dma.hbm_to_vmem [thread:$0]  (!%p4857_p8), %s4930_s15, 6144, %s4932_s19, %s374_s16, %s5757_s27, %s5757_s27, %s5756_s29  }
  0x51   : > { %s4668_s20 = scalar_lea.hbm %s4916_s26, 1024  ;;  %s4673_s17 = scalar_lea.hbm %s5726_s7, 2048 }
  0x52   : > { %p4669_p4 = scmp.ne.s32.totalorder %s4916_s26, %s4668_s20  ;;  %p4674_p11 = scmp.lt.u32.totalorder %s4916_s26, %s5726_s7 }
  0x53   : > { %p4675_p13 = scmp.lt.u32.totalorder %s4673_s17, %s4668_s20  ;;  %p4677_p7 = scmp.lt.u32.totalorder %s4668_s20, %s4916_s26 }
  0x54   : > { %p4671_p1 = pnand %p4669_p4, %p4881_p10 }
  0x55   : > { %p4676_p0 = por %p4675_p13, %p4674_p11 }
  0x56   : > { %p4672_p9 = pneg %p4671_p1 }
  0x57   : > { %p4678_p12 = por %p4677_p7, %p4676_p0 }
  0x59   : > { %p4679_p2 = pnand %p4678_p12, %p4672_p9 }
  0x5b   : > { %4682 = shalt.err (!%p4679_p2)
}
  0x5c   : > { %s4683_s13 = scalar_lea.vmem %s4919_s18, 1024  ;;  %s4742_s15 = smov [#allocation6]  }
  0x5d   : > { %p4684_p3 = scmp.ne.s32.totalorder %s4919_s18, %s4683_s13  ;;  %s4688_s19 = sshll.u32 %s4742_s15, 4  ;;  %s4689_s19 = int_to_ptr.vmem [resolvable:$false] %s4688_s19 }
  0x5e   : > { %s4690_s16 = scalar_lea.vmem %s4689_s19, 2048  ;;  %p4691_p4 = scmp.lt.s32.totalorder %s4919_s18, %s4689_s19 }
  0x5f   : > { %p4686_p5 = pnand %p4684_p3, %p4881_p10  ;;  %p4692_p1 = scmp.lt.s32.totalorder %s4690_s16, %s4683_s13 }
  0x61   : > { %p4687_p6 = pneg %p4686_p5  ;;  %p4693_p11 = por %p4692_p1, %p4691_p4 }
  0x63   : > { %p4694_p13 = pnand %p4693_p11, %p4687_p6 }
  0x65   : > { %4697 = shalt.err (!%p4694_p13)
}
  0x66   : > { %4392 = dma.hbm_to_vmem [thread:$0]  (!%p4857_p8), %s4916_s26, 1024, %s4919_s18, %s4875_s28, %s5757_s27, %s5757_s27, %s5756_s29  }
  0x67   : > { %p5758_p10 = scmp.ne.s32.totalorder %s5755_s10, 0 }
  0x68   : > { %s454_s23 = sand.u32 (!%p5758_p10), 1, %s4728_s22   ;;  %p5759_p9 = scmp.ne.s32.totalorder (!%p5758_p10), %s5749_s30, 0 }
  0x69   : > { %452 = sbr.rel (%p5758_p10) target bundleno = 5324 (0x14cc), region = 64  ;;  %s455_s21 = scalar_lea.sflag (!%p5758_p10), [#allocation3], %s454_s23 }
  0x6a   : > { %s4376_s20 = smul.u32 (!%p5758_p10), 384, %s454_s23 }
  0x6c   : > { %s4989_s11 = scalar_lea.vmem (!%p5758_p10), [#allocation2], %s4376_s20 }
  0x70   : > { %4715 = dma.done.wait (%p5759_p9), %s455_s21, 6144  }
  0x71   : > { %4717 = vsyncadd (%p5759_p9), %s455_s21, 4294961152  ;;  %s463_s14 = sand.u32 1, %s4833_s25   ;;  %s3757_s17 = sshll.u32 %s454_s23, 6 }
  0x72   : > { %s464_s26 = scalar_lea.sflag [#allocation5], %s463_s14  ;;  %s4996_s28 = scalar_lea.vmem [#allocation4], %s3757_s17 }
  0x73   : > { %4719 = dma.done.wait (%p5759_p9), %s464_s26, 2048  }
  0x74   : > { %4721 = vsyncadd (%p5759_p9), %s464_s26, 4294965248  ;;  %p535_p8 = scmp.lt.s32.totalorder %s4833_s25, 1  ;;  %s5022_s20 = scalar_lea.vmem [#allocation6], %s3757_s17 }
  0x75   : > { %p3763_p0 = scmp.ne.s32.totalorder %s4833_s25, 0 }
  0x76   : > { %s5004_s10 = scalar_select %p535_p8, %s4833_s25, 1 }
  0x77   : > { %552 = sbr.rel (%p3763_p0) target bundleno = 126 (0x7e), region = 80  ;;  %v553_v0 = vld [vmem:[%s5719_s0] sm:$0xff] (!%p3763_p0)  ;;  %v554_v1 = vld [vmem:[%s5719_s0 + $0x8] sm:$0xff] (!%p3763_p0) }
  0x78   : > { %s3882_s18 = sshll.u32 %s5004_s10, 7  ;;  %s3883_s29 = sshll.u32 %s5004_s10, 4  ;;  %555 = vst [vmem:[%s5731_s12] sm:$0xff] (!%p3763_p0), %v553_v0  ;;  %556 = vst [vmem:[%s5731_s12 + $0x8] sm:$0xff] (!%p3763_p0), %v554_v1 }
  0x79   : > { %s5011_s24 = scalar_lea.vmem %s5723_s4, %s3882_s18  ;;  %s5016_s30 = scalar_lea.vmem %s5727_s8, %s3883_s29 }
  0x7a   : > { %s547_s23 = scalar_lea.vmem %s5728_s9, %s5004_s10 }
  0x7e PF: > { %v4434_v2 = vld [vmem:[%s5011_s24 + $0x4] ss:$8 sps:$4 sm:$0xff]   ;;  %v4436_v3 = vld [vmem:[%s5011_s24] ss:$8 sps:$4 sm:$0xff]   ;;  %v4743_v4 = vmov 0   ;;  %v4744_v5 = vmov 0.0   ;;  %v810_v36 = vlaneseq }
  0x7f   : > { %799 = vmatprep.mubr.bf16.mxu0 %v4743_v4  ;;  %4022 = vmatprep.subr.bf16.mxu1 %v4744_v5  ;;  %v4437_v6 = vld [vmem:[%s5011_s24 + $0x14] ss:$8 sps:$4 sm:$0xff]   ;;  %v4439_v7 = vld [vmem:[%s5011_s24 + $0x10] ss:$8 sps:$4 sm:$0xff]   ;;  %v4440_v8 = vld [vmem:[%s5011_s24 + $0x24] ss:$8 sps:$4 sm:$0xff]  }
  0x80   : > { %767 = vmatprep.subr.bf16.mxu0 %v4434_v2  ;;  %v4442_v9 = vld [vmem:[%s5011_s24 + $0x20] ss:$8 sps:$4 sm:$0xff]   ;;  %v4443_v10 = vld [vmem:[%s5011_s24 + $0x34] ss:$8 sps:$4 sm:$0xff]   ;;  %v4445_v11 = vld [vmem:[%s5011_s24 + $0x30] ss:$8 sps:$4 sm:$0xff]  }
  0x81   : > { %768 = vmatpush1.bf16.msra.mxu0 %v4436_v3  ;;  %v4446_v12 = vld [vmem:[%s5011_s24 + $0x44] ss:$8 sps:$4 sm:$0xff]   ;;  %v4448_v15 = vld [vmem:[%s5011_s24 + $0x40] ss:$8 sps:$4 sm:$0xff]   ;;  %v4449_v16 = vld [vmem:[%s5011_s24 + $0x54] ss:$8 sps:$4 sm:$0xff]  }
  0x82   : > { %769 = vmatprep.subr.bf16.mxu0 %v4437_v6  ;;  %v4458_v13 = vld [vmem:[%s4989_s11] sm:$0xff]   ;;  %v4459_v14 = vld [vmem:[%s4989_s11 + $0x8] sm:$0xff]   ;;  %v4451_v17 = vld [vmem:[%s5011_s24 + $0x50] ss:$8 sps:$4 sm:$0xff]   ;;  %vm4745_vm0 = vmmov 0   ;;  %v5089_v37 = vshrl.u32 %v810_v36, 7 }
  0x83   : > { %4023 = vmatpush3.bf16.msra.mxu1 %v4458_v13  ;;  %v4460_v18 = vld [vmem:[%s4989_s11 + $0x10] sm:$0xff]   ;;  %v4452_v19 = vld [vmem:[%s5011_s24 + $0x64] ss:$8 sps:$4 sm:$0xff]   ;;  %v4461_v20 = vld [vmem:[%s4989_s11 + $0x18] sm:$0xff]   ;;  %4038 = vmatprep.mubr.msk.bf16.mxu1 %vm4745_vm0, %v4744_v5  ;;  %vm942_vm1 = vcmask 261120   ;;  %s4747_s27 = smov 96  }
  0x84   : > { %4024 = vmatprep.subr.bf16.mxu1 %v4744_v5  ;;  %v4454_v21 = vld [vmem:[%s5011_s24 + $0x60] ss:$8 sps:$4 sm:$0xff]   ;;  %v4455_v26 = vld [vmem:[%s5011_s24 + $0x74] ss:$8 sps:$4 sm:$0xff]   ;;  %v4457_v28 = vld [vmem:[%s5011_s24 + $0x70] ss:$8 sps:$4 sm:$0xff]  }
  0x85   : > { %770 = vmatpush1.bf16.msra.mxu0 %v4439_v7  ;;  %v557_v22 = vld [vmem:[%s5731_s12] sm:$0xff]  ;;  %v558_v23 = vld [vmem:[%s5731_s12 + $0x8] sm:$0xff]  ;;  %v4464_v33 = vld [vmem:[%s4989_s11 + $0x30] sm:$0xff]   ;;  %v5092_v38 = vsub.s32 0, %v5089_v37  ;;  %v5098_v40 = vsub.s32 1, %v5089_v37  ;;  %s4746_s24 = smov 64  }
  0x86   : > { %771 = vmatprep.subr.bf16.mxu0 %v4440_v8  ;;  %v559_v24 = vld [vmem:[%s5721_s2] sm:$0xff]  ;;  %v560_v25 = vld [vmem:[%s5721_s2 + $0x8] sm:$0xff]  ;;  %v4465_v34 = vld [vmem:[%s4989_s11 + $0x38] sm:$0xff]   ;;  %v822_v35 = vpack.c.bf16 %v558_v23, %v557_v22  ;;  %s4748_s29 = smov 32   ;;  %v825_v56 = vsub.s32 2, %v5089_v37  ;;  %vm1179_vm2 = vcmask 1043456  }
  0x87   : > { %4025 = vmatpush3.bf16.msra.mxu1 %v4459_v14  ;;  %v4462_v27 = vld [vmem:[%s4989_s11 + $0x20] sm:$0xff]   ;;  %v684_v29 = vadd.f32 %v559_v24, %v557_v22  ;;  %v685_v30 = vadd.f32 %v560_v25, %v558_v23  ;;  %v4463_v31 = vld [vmem:[%s4989_s11 + $0x28] sm:$0xff]   ;;  %vm1127_vm3 = vcmask 64512   ;;  %vm1377_vm4 = vcmask 523264   ;;  %p3877_p7 = scmp.ne.s32.totalorder %s4833_s25, 1 }
  0x88   : > { %4026 = vmatprep.subr.bf16.mxu1 %v4744_v5  ;;  %v5095_v39 = vld [vmem:[%s5016_s30] sm:$0xff]  ;;  %vm1380_vm5 = vcmask 785408   ;;  %vm2490_vm6 = vcmask 130048   ;;  %s5761_s16 = sld [smem:[#allocation14_spill]] (!%p3877_p7) }
  0x89   : > { %772 = vmatpush1.bf16.msra.mxu0 %v4442_v9  ;;  %v686_v32 = vpack.c.bf16 %v685_v30, %v684_v29  ;;  %v813_v41 = vrot.slane %v5095_v39, %v5092_v38  ;;  %v819_v43 = vrot.slane %v5095_v39, %v5098_v40  ;;  %v826_v57 = vrot.slane %v5095_v39, %v825_v56 }
  0x8a   : > { %773 = vmatprep.subr.bf16.mxu0 %v4443_v10 }
  0x8b   : > { %4027 = vmatpush3.bf16.msra.mxu1 %v4460_v18 }
  0x8c   : > { %4028 = vmatprep.subr.bf16.mxu1 %v4744_v5 }
  0x8d   : > { %774 = vmatpush1.bf16.msra.mxu0 %v4445_v11 }
  0x8e   : > { %775 = vmatprep.subr.bf16.mxu0 %v4446_v12 }
  0x8f   : > { %4029 = vmatpush3.bf16.msra.mxu1 %v4461_v20 }
  0x90   : > { %4030 = vmatprep.subr.bf16.mxu1 %v4744_v5 }
  0x91   : > { %776 = vmatpush1.bf16.msra.mxu0 %v4448_v15 }
  0x92   : > { %777 = vmatprep.subr.bf16.mxu0 %v4449_v16 }
  0x93   : > { %4031 = vmatpush3.bf16.msra.mxu1 %v4462_v27 }
  0x94   : > { %4032 = vmatprep.subr.bf16.mxu1 %v4744_v5 }
  0x95   : > { %778 = vmatpush1.bf16.msra.mxu0 %v4451_v17 }
  0x96   : > { %779 = vmatprep.subr.bf16.mxu0 %v4452_v19 }
  0x97   : > { %4033 = vmatpush3.bf16.msra.mxu1 %v4463_v31 }
  0x98   : > { %4034 = vmatprep.subr.bf16.mxu1 %v4744_v5 }
  0x99   : > { %780 = vmatpush1.bf16.msra.mxu0 %v4454_v21 }
  0x9a   : > { %781 = vmatprep.subr.bf16.mxu0 %v4455_v26 }
  0x9b   : > { %4035 = vmatpush3.bf16.msra.mxu1 %v4464_v33 }
  0x9c   : > { %4036 = vmatprep.subr.bf16.mxu1 %v4744_v5 }
  0x9d   : > { %782 = vmatpush1.bf16.msra.mxu0 %v4457_v28 }
  0x9e   : > { %4066 = vmatprep.subr.bf16.mxu0 %v4744_v5 }
  0x9f   : > { %4037 = vmatpush3.bf16.msra.mxu1 %v4465_v34 }
  0xa0   : > { %800 = vmatmul.mubr.bf16.vlgmr.msra.gmra.mrb[0].mxu0 %v686_v32  ;;  %4042 = vmatprep.subr.bf16.mxu1 %v4744_v5 }
  0xa1   : > { %4068 = vmatprep.mubr.msk.bf16.mxu0 %vm4745_vm0, %v4744_v5 }
  0xa2   : > { %4039 = vmatmul.mubr.bf16.vlgmr.msra.gmra.mrb[0].mxu1 %v822_v35 }
  0xa3   : > { %4044 = vmatprep.mubr.msk.bf16.mxu1 %vm4745_vm0, %v4744_v5 }
 0x173   : > { %v801_v42 = vpop.f32.mrb[0].mxu0 }
 0x174   : > { %v814_v44 = vadd.f32 %v813_v41, %v801_v42  ;;  %v803_v45 = vpop.f32.mrb[1].mxu0 }
 0x175   : > { %v805_v46 = vpop.f32.mrb[2].mxu0  ;;  %v820_v49 = vadd.f32 %v819_v43, %v803_v45  ;;  %v909_v58 = vpop.f32.mrb[0].mxu1 }
 0x176   : > { %v815_v47 = vadd.f32 %v813_v41, %v805_v46  ;;  %v807_v48 = vpop.f32.mrb[3].mxu0  ;;  %v916_v51 = vmul.f32 0.25, %v814_v44  ;;  %v910_v59 = vadd.f32 %v909_v58, %v826_v57  ;;  %v4040_v60 = vpop.f32.mrb[1].mxu1 }
 0x177   : > { %v821_v50 = vadd.f32 %v819_v43, %v807_v48  ;;  %v912_v61 = vpop.f32.mrb[2].mxu1 }
 0x178   : > { %v917_v52 = vmul.f32 0.25, %v815_v47  ;;  %v913_v62 = vadd.f32 %v912_v61, %v826_v57  ;;  %v4041_v63 = vpop.f32.mrb[3].mxu1 }
 0x179   : > { %v5104_v53 = vpack.c.bf16 %v821_v50, %v820_v49 }
 0x17a   : > { %v5106_v54 = vpack.c.bf16 %v917_v52, %v916_v51  ;;  %v5131_v0 = vpack.c.bf16 %v913_v62, %v910_v59 }
 0x17b   : > { %931 = vrot.lane.b32.xlu1 %v5104_v53, %s4746_s24  ;;  %929 = vrot.lane.b32.xlu0 %v5104_v53, %s4747_s27  ;;  %v947_v55 = vsel %vm942_vm1, %v5104_v53, 0 }
 0x17c   : > { %4043 = vmatpush3.bf16.xpose.msra.mxu1 %v947_v55  ;;  %v1181_v1 = vsel %vm1179_vm2, %v5131_v0, 0 }
 0x17d   : > { %4048 = vmatprep.subr.bf16.mxu1 %v4744_v5  ;;  %4067 = vmatpush3.bf16.msra.mxu0 %v1181_v1 }
 0x17e   : > { %4078 = vmatprep.subr.bf16.mxu0 %v4744_v5 }
 0x17f   : > { %924 = vrot.lane.b32.xlu1 %v5106_v54, %s4746_s24  ;;  %922 = vrot.lane.b32.xlu0 %v5106_v54, %s4747_s27 }
 0x183   : > { %926 = vrot.lane.b32.xlu1 %v5106_v54, %s4748_s29  ;;  %933 = vrot.lane.b32.xlu0 %v5104_v53, %s4748_s29 }
 0x184   : > { %4045 = vmatmul.mubr.msk.bf16.vlgmr.msra.gmra.mrb[4].mxu1 %vm942_vm1, %v5106_v54 }
 0x185   : > { %4050 = vmatprep.mubr.msk.bf16.mxu1 %vm4745_vm0, %v4744_v5 }
 0x1ed   : > { %v5136_v2 = vpop.permute.xlu0 %929  ;;  %v5141_v4 = vpop.permute.xlu1 %931 }
 0x1ee   : > { %v993_v3 = vsel %vm942_vm1, %v5136_v2, 0  ;;  %v1039_v7 = vsel %vm942_vm1, %v5141_v4, 0 }
 0x1ef   : > { %4049 = vmatpush3.bf16.xpose.msra.mxu1 %v993_v3 }
 0x1f0   : > { %4054 = vmatprep.subr.bf16.mxu1 %v4744_v5 }
 0x1f1   : > { %v5143_v6 = vpop.permute.xlu0 %922  ;;  %v5154_v9 = vpop.permute.xlu1 %924 }
 0x1f5   : > { %v5152_v8 = vpop.permute.xlu0 %933  ;;  %v5163_v11 = vpop.permute.xlu1 %926 }
 0x1f6   : > { %4051 = vmatmul.mubr.msk.bf16.vlgmr.msra.gmra.mrb[8].mxu1 %vm942_vm1, %v5143_v6  ;;  %v1085_v10 = vsel %vm942_vm1, %v5152_v8, 0 }
 0x1f7   : > { %4055 = vmatpush3.bf16.xpose.msra.mxu1 %v1039_v7  ;;  %4056 = vmatprep.mubr.msk.bf16.mxu1 %vm4745_vm0, %v4744_v5 }
 0x1f8   : > { %4060 = vmatprep.subr.bf16.mxu1 %v4744_v5 }
 0x1fe   : > { %4057 = vmatmul.mubr.msk.bf16.vlgmr.msra.gmra.mrb[12].mxu1 %vm942_vm1, %v5154_v9 }
 0x1ff   : > { %4061 = vmatpush3.bf16.xpose.msra.mxu1 %v1085_v10  ;;  %4062 = vmatprep.mubr.msk.bf16.mxu1 %vm4745_vm0, %v4744_v5 }
 0x200   : > { %4072 = vmatprep.subr.bf16.mxu1 %v4744_v5 }
 0x206   : > { %4063 = vmatmul.mubr.msk.bf16.vlgmr.msra.gmra.mrb[16].mxu1 %vm942_vm1, %v5163_v11 }
 0x207   : > { %4074 = vmatprep.mubr.msk.bf16.mxu1 %vm4745_vm0, %v4744_v5 }
 0x257   : > { %v983_v12 = vpop.f32.mrb[4].mxu1 }
 0x258   : > { %v4046_v13 = vpop.f32.mrb[5].mxu1  ;;  %v1128_v14 = vsel %vm1127_vm3, %v983_v12, -inf }
 0x259   : > { %1129 = vmax.xlane.f32.xlu0 %v1128_v14  ;;  %v986_v15 = vpop.f32.mrb[6].mxu1 }
 0x25a   : > { %v4047_v16 = vpop.f32.mrb[7].mxu1 }
 0x2c9   : > { %v1029_v17 = vpop.f32.mrb[8].mxu1 }
 0x2ca   : > { %v4052_v18 = vpop.f32.mrb[9].mxu1  ;;  %v1131_v19 = vsel %vm1127_vm3, %v1029_v17, -inf }
 0x2cb   : > { %1132 = vmax.xlane.f32.xlu1 %v1131_v19  ;;  %v1032_v20 = vpop.f32.mrb[10].mxu1 }
 0x2cc   : > { %v4053_v21 = vpop.f32.mrb[11].mxu1 }
 0x2d1   : > { %v1075_v22 = vpop.f32.mrb[12].mxu1 }
 0x2d2   : > { %v4058_v23 = vpop.f32.mrb[13].mxu1  ;;  %v1134_v24 = vsel %vm1127_vm3, %v1075_v22, -inf }
 0x2d3   : > { %1135 = vmax.xlane.f32.xlu0 %v1134_v24  ;;  %v1078_v25 = vpop.f32.mrb[14].mxu1  ;;  %v1432_v24 = vrot.slane %v5136_v2, 4  ;;  %v1528_v2 = vrot.slane %v5152_v8, 4 }
 0x2d4   : > { %v4059_v26 = vpop.f32.mrb[15].mxu1 }
 0x2d9   : > { %v1121_v27 = vpop.f32.mrb[16].mxu1 }
 0x2da   : > { %v4064_v28 = vpop.f32.mrb[17].mxu1  ;;  %v1137_v29 = vsel %vm1127_vm3, %v1121_v27, -inf }
 0x2db   : > { %1138 = vmax.xlane.f32.xlu0 %v1137_v29  ;;  %v1124_v30 = vpop.f32.mrb[18].mxu1  ;;  %v1437_v28 = vsel %vm942_vm1, %v1432_v24, 0  ;;  %v1383_v29 = vrot.slane %v5106_v54, 4  ;;  %v1623_v54 = vrot.slane %v5131_v0, 4 }
 0x2dc   : > { %936 = vrot.lane.b32.xlu1 %v5131_v0, %s4747_s27  ;;  %v4065_v31 = vpop.f32.mrb[19].mxu1  ;;  %v1431_v30 = vrot.slane %v5143_v6, 4  ;;  %v1479_v6 = vrot.slane %v5154_v9, 4 }
 0x2e6   : > { %v1130_v32 = vpop.xlane.xlu0 %1129 }
 0x2e7   : > { %v1140_v33 = vsub.f32 %v983_v12, %v1130_v32  ;;  %v1527_v32 = vrot.slane %v5163_v11, 4 }
 0x2e9   : > { %v1144_v34 = vmul.f32 1.442695, %v1140_v33  ;;  %v1628_v33 = vsel %vm1179_vm2, %v1623_v54, 0 }
 0x2eb   : > { %4522 = vpow2.f32 %v1144_v34 }
 0x2f5   : > { %v4523_v35 = vpop.eup %4522 }
 0x2f6   : > { %v1152_v36 = vsel %vm1127_vm3, %v4523_v35, 0.0 }
 0x300   : > { %1153 = vadd.xlane.f32.xlu1 %v1152_v36 }
 0x358   : > { %v1133_v41 = vpop.xlane.xlu1 %1132 }
 0x359   : > { %v1141_v42 = vsub.f32 %v1029_v17, %v1133_v41 }
 0x35b   : > { %v1146_v43 = vmul.f32 1.442695, %v1141_v42 }
 0x35c   : > { %v5176_v44 = vpop.permute.xlu1 %936 }
 0x35d   : > { %4524 = vpow2.f32 %v1146_v43  ;;  %v1227_v45 = vsel %vm1179_vm2, %v5176_v44, 0  ;;  %v1670_v8 = vrot.slane %v5176_v44, 4 }
 0x35e   : > { %4073 = vmatpush3.bf16.msra.mxu1 %v1227_v45 }
 0x35f   : > { %4084 = vmatprep.subr.bf16.mxu1 %v4744_v5 }
 0x360   : > { %v1136_v46 = vpop.xlane.xlu0 %1135 }
 0x361   : > { %v1142_v47 = vsub.f32 %v1075_v22, %v1136_v46  ;;  %v1384_v22 = vrot.slane %v5104_v53, 4  ;;  %v1480_v53 = vrot.slane %v5141_v4, 4  ;;  %v1533_v4 = vsel %vm942_vm1, %v1528_v2, 0 }
 0x363   : > { %v1148_v48 = vmul.f32 1.442695, %v1142_v47  ;;  %v1389_v26 = vsel %vm942_vm1, %v1384_v22, 0  ;;  %v1485_v31 = vsel %vm942_vm1, %v1480_v53, 0 }
 0x365   : > { %4526 = vpow2.f32 %v1148_v48 }
 0x367   : > { %v4525_v49 = vpop.eup %4524 }
 0x368   : > { %v1139_v50 = vpop.xlane.xlu0 %1138  ;;  %v1155_v51 = vsel %vm1127_vm3, %v4525_v49, 0.0 }
 0x369   : > { %v1143_v52 = vsub.f32 %v1121_v27, %v1139_v50  ;;  %1156 = vadd.xlane.f32.xlu0 %v1155_v51 }
 0x36b   : > { %v1150_v55 = vmul.f32 1.442695, %v1143_v52 }
 0x36d   : > { %4528 = vpow2.f32 %v1150_v55 }
 0x36f   : > { %v4527_v57 = vpop.eup %4526 }
 0x370   : > { %v1158_v58 = vsel %vm1127_vm3, %v4527_v57, 0.0 }
 0x371   : > { %1159 = vadd.xlane.f32.xlu1 %v1158_v58 }
 0x377   : > { %v4529_v59 = vpop.eup %4528 }
 0x378   : > { %v1161_v60 = vsel %vm1127_vm3, %v4529_v59, 0.0 }
 0x379   : > { %1162 = vadd.xlane.f32.xlu0 %v1161_v60 }
 0x382   : > { %940 = vrot.lane.b32.xlu1 %v5131_v0, %s4748_s29 }
 0x38d   : > { %v1154_v61 = vpop.xlane.xlu1 %1153 }
 0x38e   : > { %4530 = vrcp.f32 %v1154_v61 }
 0x38f   : > { %938 = vrot.lane.b32.xlu0 %v5131_v0, %s4746_s24  ;;  %v1675_v0 = vsel %vm1179_vm2, %v1670_v8, 0 }
 0x398   : > { %v4531_v62 = vpop.eup %4530 }
 0x399   : > { %v1168_v63 = vmul.f32 %v4531_v62, %v4523_v35 }
 0x39b   : > { %v1172_v1 = vpack.c.bf16 %v1168_v63, %v1168_v63 }
 0x39d   : > { %4069 = vmatmul.mubr.msk.bf16.vlgmr.msra.gmra.mrb[4].mxu0 %vm1127_vm3, %v1172_v1 }
 0x39e   : > { %4080 = vmatprep.mubr.msk.bf16.mxu0 %vm4745_vm0, %v4744_v5 }
 0x3f6   : > { %v1157_v3 = vpop.xlane.xlu0 %1156 }
 0x3f7   : > { %4532 = vrcp.f32 %v1157_v3 }
 0x3fe   : > { %v1160_v7 = vpop.xlane.xlu1 %1159 }
 0x3ff   : > { %4534 = vrcp.f32 %v1160_v7 }
 0x401   : > { %v4533_v10 = vpop.eup %4532 }
 0x402   : > { %v1169_v12 = vmul.f32 %v4533_v10, %v4525_v49  ;;  %v5191_v13 = vpop.permute.xlu1 %940 }
 0x403   : > { %v1319_v15 = vsel %vm1179_vm2, %v5191_v13, 0 }
 0x404   : > { %v1173_v14 = vpack.c.bf16 %v1169_v12, %v1169_v12 }
 0x406   : > { %4075 = vmatmul.mubr.msk.bf16.vlgmr.msra.gmra.mrb[20].mxu1 %vm1127_vm3, %v1173_v14  ;;  %v1163_v16 = vpop.xlane.xlu0 %1162 }
 0x407   : > { %4085 = vmatpush3.bf16.msra.mxu1 %v1319_v15  ;;  %4536 = vrcp.f32 %v1163_v16  ;;  %4086 = vmatprep.mubr.msk.bf16.mxu1 %vm4745_vm0, %v4744_v5 }
 0x408   : > { %4096 = vmatprep.subr.bf16.mxu1 %v4744_v5 }
 0x409   : > { %v4535_v17 = vpop.eup %4534 }
 0x40a   : > { %v1170_v18 = vmul.f32 %v4535_v17, %v4527_v57  ;;  %v5199_v19 = vpop.permute.xlu0 %938 }
 0x40b   : > { %v1273_v20 = vsel %vm1179_vm2, %v5199_v19, 0 }
 0x40c   : > { %4079 = vmatpush3.bf16.msra.mxu0 %v1273_v20  ;;  %v1174_v21 = vpack.c.bf16 %v1170_v18, %v1170_v18 }
 0x40d   : > { %4090 = vmatprep.subr.bf16.mxu0 %v4744_v5 }
 0x40f   : > { %4081 = vmatmul.mubr.msk.bf16.vlgmr.msra.gmra.mrb[8].mxu0 %vm1127_vm3, %v1174_v21 }
 0x410   : > { %4092 = vmatprep.mubr.msk.bf16.mxu0 %vm4745_vm0, %v4744_v5 }
 0x411   : > { %v4537_v23 = vpop.eup %4536 }
 0x412   : > { %v1171_v25 = vmul.f32 %v4537_v23, %v4529_v59 }
 0x414   : > { %v1175_v27 = vpack.c.bf16 %v1171_v25, %v1171_v25 }
 0x415   : > { %4091 = vmatpush3.bf16.xpose.msra.mxu0 %v1389_v26 }
 0x416   : > { %4087 = vmatmul.mubr.msk.bf16.vlgmr.msra.gmra.mrb[24].mxu1 %vm1127_vm3, %v1175_v27  ;;  %4102 = vmatprep.subr.bf16.mxu0 %v4744_v5 }
 0x417   : > { %4097 = vmatpush3.bf16.xpose.msra.mxu1 %v1437_v28  ;;  %4098 = vmatprep.mubr.msk.bf16.mxu1 %vm4745_vm0, %v4744_v5 }
 0x418   : > { %4108 = vmatprep.subr.bf16.mxu1 %v4744_v5 }
 0x41c   : > { %4093 = vmatmul.mubr.msk.bf16.vlgmr.msra.gmra.mrb[12].mxu0 %vm942_vm1, %v1383_v29 }
 0x41d   : > { %4103 = vmatpush3.bf16.xpose.msra.mxu0 %v1485_v31  ;;  %4104 = vmatprep.mubr.msk.bf16.mxu0 %vm4745_vm0, %v4744_v5 }
 0x41e   : > { %4099 = vmatmul.mubr.msk.bf16.vlgmr.msra.gmra.mrb[28].mxu1 %vm942_vm1, %v1431_v30  ;;  %4114 = vmatprep.subr.bf16.mxu0 %v4744_v5 }
 0x41f   : > { %4109 = vmatpush3.bf16.xpose.msra.mxu1 %v1533_v4  ;;  %4110 = vmatprep.mubr.msk.bf16.mxu1 %vm4745_vm0, %v4744_v5 }
 0x420   : > { %4120 = vmatprep.subr.bf16.mxu1 %v4744_v5 }
 0x424   : > { %4105 = vmatmul.mubr.msk.bf16.vlgmr.msra.gmra.mrb[16].mxu0 %vm942_vm1, %v1479_v6 }
 0x425   : > { %4115 = vmatpush3.bf16.msra.mxu0 %v1628_v33  ;;  %4116 = vmatprep.mubr.msk.bf16.mxu0 %vm4745_vm0, %v4744_v5 }
 0x426   : > { %4111 = vmatmul.mubr.msk.bf16.vlgmr.msra.gmra.mrb[32].mxu1 %vm942_vm1, %v1527_v32  ;;  %4126 = vmatprep.subr.bf16.mxu0 %v4744_v5 }
 0x427   : > { %4121 = vmatpush3.bf16.msra.mxu1 %v1675_v0  ;;  %4122 = vmatprep.mubr.msk.bf16.mxu1 %vm4745_vm0, %v4744_v5 }
 0x428   : > { %4132 = vmatprep.subr.bf16.mxu1 %v4744_v5 }
 0x470   : > { %v5244_v9 = vpop.f32.mrb[4].mxu0 }
 0x471   : > { %v4070_v11 = vpop.f32.mrb[5].mxu0 }
 0x472   : > { %v1220_v34 = vpop.f32.mrb[6].mxu0 }
 0x473   : > { %v4071_v35 = vpop.f32.mrb[7].mxu0 }
 0x4d9   : > { %v5246_v36 = vpop.f32.mrb[20].mxu1 }
 0x4da   : > { %v4076_v41 = vpop.f32.mrb[21].mxu1  ;;  %v1362_v11 = vpack.c.bf16 %v5246_v36, %v5246_v36 }
 0x4db   : > { %v1266_v42 = vpop.f32.mrb[22].mxu1 }
 0x4dc   : > { %v4077_v43 = vpop.f32.mrb[23].mxu1 }
 0x4e2   : > { %v5248_v44 = vpop.f32.mrb[8].mxu0 }
 0x4e3   : > { %v4082_v45 = vpop.f32.mrb[9].mxu0 }
 0x4e4   : > { %v1312_v46 = vpop.f32.mrb[10].mxu0  ;;  %v1717_v45 = vrot.slane %v5199_v19, 4 }
 0x4e5   : > { %v4083_v47 = vpop.f32.mrb[11].mxu0 }
 0x4e6   : > { %v1722_v36 = vsel %vm1179_vm2, %v1717_v45, 0 }
 0x4e9   : > { %v5250_v48 = vpop.f32.mrb[24].mxu1 }
 0x4ea   : > { %v4088_v49 = vpop.f32.mrb[25].mxu1 }
 0x4eb   : > { %v1358_v50 = vpop.f32.mrb[26].mxu1  ;;  %v1764_v49 = vrot.slane %v5191_v13, 4 }
 0x4ec   : > { %v4089_v51 = vpop.f32.mrb[27].mxu1 }
 0x4ed   : > { %v1769_v19 = vsel %vm1179_vm2, %v1764_v49, 0  ;;  %v4474_v49 = vld [vmem:[%s4989_s11 + $0xc0] sm:$0xff]  }
 0x4ef   : > { %v1425_v52 = vpop.f32.mrb[12].mxu0 }
 0x4f0   : > { %v4094_v55 = vpop.f32.mrb[13].mxu0  ;;  %v1575_v57 = vsel %vm1127_vm3, %v1425_v52, -inf }
 0x4f1   : > { %1576 = vmax.xlane.f32.xlu1 %v1575_v57  ;;  %v1428_v58 = vpop.f32.mrb[14].mxu0  ;;  %v1473_v59 = vpop.f32.mrb[28].mxu1 }
 0x4f2   : > { %v4095_v60 = vpop.f32.mrb[15].mxu0  ;;  %v4100_v61 = vpop.f32.mrb[29].mxu1  ;;  %v1578_v62 = vsel %vm1127_vm3, %v1473_v59, -inf }
 0x4f3   : > { %1579 = vmax.xlane.f32.xlu0 %v1578_v62  ;;  %v1476_v63 = vpop.f32.mrb[30].mxu1  ;;  %v4466_v61 = vld [vmem:[%s4989_s11 + $0x40] sm:$0xff]   ;;  %v4467_v62 = vld [vmem:[%s4989_s11 + $0x48] sm:$0xff]  }
 0x4f4   : > { %v4101_v1 = vpop.f32.mrb[31].mxu1  ;;  %v4468_v63 = vld [vmem:[%s4989_s11 + $0x50] sm:$0xff]  }
 0x4f5   : > { %v4469_v1 = vld [vmem:[%s4989_s11 + $0x58] sm:$0xff]  }
 0x4f7   : > { %v1521_v3 = vpop.f32.mrb[16].mxu0 }
 0x4f8   : > { %v4106_v7 = vpop.f32.mrb[17].mxu0  ;;  %v1581_v10 = vsel %vm1127_vm3, %v1521_v3, -inf }
 0x4f9   : > { %v1524_v12 = vpop.f32.mrb[18].mxu0  ;;  %1582 = vmax.xlane.f32.xlu0 %v1581_v10  ;;  %v1569_v14 = vpop.f32.mrb[32].mxu1  ;;  %v4471_v7 = vld [vmem:[%s4989_s11 + $0x68] sm:$0xff]   ;;  %v4472_v10 = vld [vmem:[%s4989_s11 + $0x70] sm:$0xff]  }
 0x4fa   : > { %v4107_v15 = vpop.f32.mrb[19].mxu0  ;;  %v4112_v16 = vpop.f32.mrb[33].mxu1  ;;  %v1584_v17 = vsel %vm1127_vm3, %v1569_v14, -inf }
 0x4fb   : > { %1585 = vmax.xlane.f32.xlu1 %v1584_v17  ;;  %v1572_v18 = vpop.f32.mrb[34].mxu1  ;;  %v4473_v17 = vld [vmem:[%s4989_s11 + $0x78] sm:$0xff]  }
 0x4fc   : > { %v4113_v20 = vpop.f32.mrb[35].mxu1 }
 0x57e   : > { %v1577_v21 = vpop.xlane.xlu1 %1576 }
 0x57f   : > { %v1587_v22 = vsub.f32 %v1425_v52, %v1577_v21 }
 0x580   : > { %v1580_v23 = vpop.xlane.xlu0 %1579 }
 0x581   : > { %v1591_v24 = vmul.f32 1.442695, %v1587_v22  ;;  %v1588_v25 = vsub.f32 %v1473_v59, %v1580_v23 }
 0x583   : > { %4538 = vpow2.f32 %v1591_v24  ;;  %v1593_v26 = vmul.f32 1.442695, %v1588_v25 }
 0x585   : > { %4540 = vpow2.f32 %v1593_v26 }
 0x586   : > { %v1583_v27 = vpop.xlane.xlu0 %1582 }
 0x587   : > { %v1589_v28 = vsub.f32 %v1521_v3, %v1583_v27  ;;  %v4470_v3 = vld [vmem:[%s4989_s11 + $0x60] sm:$0xff]  }
 0x588   : > { %v1586_v53 = vpop.xlane.xlu1 %1585 }
 0x589   : > { %v1595_v2 = vmul.f32 1.442695, %v1589_v28  ;;  %v1590_v29 = vsub.f32 %v1569_v14, %v1586_v53 }
 0x58b   : > { %4542 = vpow2.f32 %v1595_v2  ;;  %v1597_v30 = vmul.f32 1.442695, %v1590_v29 }
 0x58d   : > { %v4539_v31 = vpop.eup %4538  ;;  %4544 = vpow2.f32 %v1597_v30 }
 0x58e   : > { %v1599_v4 = vsel %vm1127_vm3, %v4539_v31, 0.0 }
 0x58f   : > { %v4541_v54 = vpop.eup %4540  ;;  %1600 = vadd.xlane.f32.xlu0 %v1599_v4 }
 0x590   : > { %v1602_v6 = vsel %vm1127_vm3, %v4541_v54, 0.0 }
 0x591   : > { %1603 = vadd.xlane.f32.xlu1 %v1602_v6 }
 0x595   : > { %v4543_v8 = vpop.eup %4542 }
 0x596   : > { %v1605_v32 = vsel %vm1127_vm3, %v4543_v8, 0.0 }
 0x597   : > { %v4545_v33 = vpop.eup %4544  ;;  %1606 = vadd.xlane.f32.xlu0 %v1605_v32 }
 0x598   : > { %v1608_v0 = vsel %vm1127_vm3, %v4545_v33, 0.0 }
 0x599   : > { %1609 = vadd.xlane.f32.xlu1 %v1608_v0 }
 0x5aa   : > { %1366 = vrot.lane.b32.xlu1 %v1362_v11, %s4748_s29  ;;  %v1361_v11 = vpack.c.bf16 %v5244_v9, %v5244_v9  ;;  %v4476_v9 = vld [vmem:[%s4989_s11 + $0xd0] sm:$0xff]  }
 0x61c   : > { %v1601_v34 = vpop.xlane.xlu0 %1600 }
 0x61d   : > { %4546 = vrcp.f32 %v1601_v34 }
 0x61e   : > { %v1604_v35 = vpop.xlane.xlu1 %1603 }
 0x61f   : > { %4548 = vrcp.f32 %v1604_v35 }
 0x624   : > { %v1607_v41 = vpop.xlane.xlu0 %1606 }
 0x625   : > { %4550 = vrcp.f32 %v1607_v41 }
 0x626   : > { %v1610_v42 = vpop.xlane.xlu1 %1609 }
 0x627   : > { %v4547_v43 = vpop.eup %4546  ;;  %4552 = vrcp.f32 %v1610_v42 }
 0x628   : > { %v1615_v46 = vmul.f32 %v4547_v43, %v4539_v31  ;;  %v1363_v31 = vpack.c.bf16 %v5248_v44, %v5248_v44 }
 0x629   : > { %v4549_v47 = vpop.eup %4548 }
 0x62a   : > { %v1616_v50 = vmul.f32 %v4549_v47, %v4541_v54  ;;  %v1619_v51 = vpack.c.bf16 %v1615_v46, %v1615_v46  ;;  %v1364_v54 = vpack.c.bf16 %v5250_v48, %v5250_v48  ;;  %v1367_v6 = vpop.permute.xlu1 %1366 }
 0x62b   : > { %v1376_v35 = vsel %vm942_vm1, %v1361_v11, %v1367_v6  ;;  %v4488_v6 = vld [vmem:[%s4989_s11 + $0xb0] sm:$0xff]  }
 0x62c   : > { %4117 = vmatmul.mubr.msk.bf16.vlgmr.msra.gmra.mrb[20].mxu0 %vm1127_vm3, %v1619_v51  ;;  %v1620_v52 = vpack.c.bf16 %v1616_v50, %v1616_v50  ;;  %v4475_v50 = vld [vmem:[%s4989_s11 + $0xc8] sm:$0xff]   ;;  %v4477_v51 = vld [vmem:[%s4989_s11 + $0xd8] sm:$0xff]  }
 0x62d   : > { %4127 = vmatpush3.bf16.msra.mxu0 %v1722_v36  ;;  %4128 = vmatprep.mubr.msk.bf16.mxu0 %vm4745_vm0, %v4744_v5  ;;  %v1838_v36 = vsub.s32 3, %v5089_v37 }
 0x62e   : > { %4123 = vmatmul.mubr.msk.bf16.vlgmr.msra.gmra.mrb[36].mxu1 %vm1127_vm3, %v1620_v52  ;;  %4138 = vmatprep.subr.bf16.mxu0 %v4744_v5 }
 0x62f   : > { %v4551_v13 = vpop.eup %4550  ;;  %4133 = vmatpush3.bf16.msra.mxu1 %v1769_v19  ;;  %4134 = vmatprep.mubr.msk.bf16.mxu1 %vm4745_vm0, %v4744_v5  ;;  %v1839_v52 = vrot.slane %v5095_v39, %v1838_v36 }
 0x630   : > { %v1617_v55 = vmul.f32 %v4551_v13, %v4543_v8  ;;  %4158 = vmatprep.subr.bf16.mxu1 %v4744_v5 }
 0x631   : > { %v4553_v57 = vpop.eup %4552 }
 0x632   : > { %v1618_v58 = vmul.f32 %v4553_v57, %v4545_v33  ;;  %v1621_v59 = vpack.c.bf16 %v1617_v55, %v1617_v55 }
 0x634   : > { %4129 = vmatmul.mubr.msk.bf16.vlgmr.msra.gmra.mrb[24].mxu0 %vm1127_vm3, %v1621_v59  ;;  %v1622_v60 = vpack.c.bf16 %v1618_v58, %v1618_v58  ;;  %v4598_v58 = vld [vmem:[%s5731_s12] sm:$0xff] }
 0x635   : > { %4154 = vmatprep.mubr.msk.bf16.mxu0 %vm4745_vm0, %v4744_v5  ;;  %4139 = vmatpush3.bf16.msra.mxu0 %v4466_v61 }
 0x636   : > { %4135 = vmatmul.mubr.msk.bf16.vlgmr.msra.gmra.mrb[40].mxu1 %vm1127_vm3, %v1622_v60  ;;  %4140 = vmatprep.subr.bf16.mxu0 %v4744_v5 }
 0x637   : > { %4174 = vmatprep.mubr.msk.bf16.mxu1 %vm4745_vm0, %v4744_v5 }
 0x639   : > { %4141 = vmatpush3.bf16.msra.mxu0 %v4467_v62  ;;  %v4599_v62 = vld [vmem:[%s5731_s12 + $0x8] sm:$0xff] }
 0x63a   : > { %4142 = vmatprep.subr.bf16.mxu0 %v4744_v5 }
 0x63d   : > { %4143 = vmatpush3.bf16.msra.mxu0 %v4468_v63 }
 0x63e   : > { %4144 = vmatprep.subr.bf16.mxu0 %v4744_v5 }
 0x641   : > { %4145 = vmatpush3.bf16.msra.mxu0 %v4469_v1 }
 0x642   : > { %4146 = vmatprep.subr.bf16.mxu0 %v4744_v5 }
 0x645   : > { %4147 = vmatpush3.bf16.msra.mxu0 %v4470_v3 }
 0x646   : > { %4148 = vmatprep.subr.bf16.mxu0 %v4744_v5 }
 0x649   : > { %4149 = vmatpush3.bf16.msra.mxu0 %v4471_v7  ;;  %v4478_v7 = vld [vmem:[%s4989_s11 + $0x80] sm:$0xff]  }
 0x64a   : > { %4150 = vmatprep.subr.bf16.mxu0 %v4744_v5  ;;  %4159 = vmatpush3.bf16.msra.mxu1 %v4478_v7  ;;  %v2073_v7 = vsub.s32 5, %v5089_v37 }
 0x64b   : > { %4160 = vmatprep.subr.bf16.mxu1 %v4744_v5 }
 0x64d   : > { %4151 = vmatpush3.bf16.msra.mxu0 %v4472_v10  ;;  %v4479_v10 = vld [vmem:[%s4989_s11 + $0xe0] sm:$0xff]  }
 0x64e   : > { %4152 = vmatprep.subr.bf16.mxu0 %v4744_v5 }
 0x651   : > { %4153 = vmatpush3.bf16.msra.mxu0 %v4473_v17  ;;  %v4484_v17 = vld [vmem:[%s4989_s11 + $0x98] sm:$0xff]  }
 0x652   : > { %4178 = vmatprep.subr.bf16.mxu0 %v4474_v49 }
 0x6ff   : > { %v1664_v12 = vpop.f32.mrb[20].mxu0 }
 0x700   : > { %v4118_v14 = vpop.f32.mrb[21].mxu0  ;;  %v1811_v32 = vpack.c.bf16 %v1664_v12, %v1664_v12  ;;  %v4480_v12 = vld [vmem:[%s4989_s11 + $0x88] sm:$0xff]  }
 0x701   : > { %v1667_v15 = vpop.f32.mrb[22].mxu0  ;;  %v1711_v16 = vpop.f32.mrb[36].mxu1  ;;  %v4481_v14 = vld [vmem:[%s4989_s11 + $0xe8] sm:$0xff]   ;;  %4161 = vmatpush3.bf16.msra.mxu1 %v4480_v12 }
 0x702   : > { %v1812_v18 = vpack.c.bf16 %v1711_v16, %v1711_v16  ;;  %v4119_v20 = vpop.f32.mrb[23].mxu0  ;;  %v4124_v21 = vpop.f32.mrb[37].mxu1  ;;  %4162 = vmatprep.subr.bf16.mxu1 %v4744_v5  ;;  %v4482_v15 = vld [vmem:[%s4989_s11 + $0x90] sm:$0xff]  }
 0x703   : > { %v1714_v22 = vpop.f32.mrb[38].mxu1  ;;  %v4483_v16 = vld [vmem:[%s4989_s11 + $0xf0] sm:$0xff]   ;;  %v5352_v20 = vld [vmem:[%s5720_s1] sm:$0xff]  ;;  %v5357_v21 = vld [vmem:[%s5720_s1 + $0x8] sm:$0xff] }
 0x704   : > { %1816 = vrot.lane.b32.xlu0 %v1812_v18, %s4748_s29  ;;  %v4125_v23 = vpop.f32.mrb[39].mxu1  ;;  %v4485_v18 = vld [vmem:[%s4989_s11 + $0xf8] sm:$0xff]   ;;  %v565_v22 = vld [vmem:[%s5722_s3] sm:$0xff] }
 0x705   : > { %4163 = vmatpush3.bf16.msra.mxu1 %v4482_v15  ;;  %v566_v23 = vld [vmem:[%s5722_s3 + $0x8] sm:$0xff] }
 0x706   : > { %4164 = vmatprep.subr.bf16.mxu1 %v4744_v5 }
 0x707   : > { %v1758_v24 = vpop.f32.mrb[24].mxu0 }
 0x708   : > { %v1813_v25 = vpack.c.bf16 %v1758_v24, %v1758_v24  ;;  %v4130_v26 = vpop.f32.mrb[25].mxu0  ;;  %v5368_v24 = vld [vmem:[%s5720_s1 + $0x10] sm:$0xff] }
 0x709   : > { %v1761_v27 = vpop.f32.mrb[26].mxu0  ;;  %v1805_v28 = vpop.f32.mrb[40].mxu1  ;;  %4165 = vmatpush3.bf16.msra.mxu1 %v4484_v17  ;;  %v2066_v26 = vadd.f32 %v566_v23, %v5357_v21 }
 0x70a   : > { %v1814_v53 = vpack.c.bf16 %v1805_v28, %v1805_v28  ;;  %v4131_v2 = vpop.f32.mrb[27].mxu0  ;;  %1819 = vrot.lane.b32.xlu1 %v1813_v25, %s4746_s24  ;;  %v4136_v29 = vpop.f32.mrb[41].mxu1  ;;  %4166 = vmatprep.subr.bf16.mxu1 %v4744_v5  ;;  %v2065_v25 = vadd.f32 %v565_v22, %v5352_v20  ;;  %v5376_v27 = vld [vmem:[%s5720_s1 + $0x18] sm:$0xff]  ;;  %v567_v28 = vld [vmem:[%s5722_s3 + $0x10] sm:$0xff] }
 0x70b   : > { %v1808_v30 = vpop.f32.mrb[42].mxu1  ;;  %v4486_v2 = vld [vmem:[%s4989_s11 + $0xa0] sm:$0xff]   ;;  %v2067_v29 = vadd.f32 %v567_v28, %v5368_v24 }
 0x70c   : > { %1822 = vrot.lane.b32.xlu0 %v1814_v53, %s4747_s27  ;;  %v4137_v4 = vpop.f32.mrb[43].mxu1  ;;  %v568_v53 = vld [vmem:[%s5722_s3 + $0x18] sm:$0xff]  ;;  %v4490_v28 = vld [vmem:[%s4989_s11 + $0x100] sm:$0xff]  }
 0x70d   : > { %v2068_v30 = vadd.f32 %v568_v53, %v5376_v27  ;;  %4167 = vmatpush3.bf16.msra.mxu1 %v4486_v2  ;;  %v4491_v53 = vld [vmem:[%s4989_s11 + $0x108] sm:$0xff]   ;;  %v2172_v2 = vpack.c.bf16 %v5357_v21, %v5352_v20  ;;  %v4497_v20 = vld [vmem:[%s4989_s11 + $0x138] sm:$0xff]   ;;  %v2173_v21 = vpack.c.bf16 %v5376_v27, %v5368_v24 }
 0x70e   : > { %1369 = vrot.lane.b32.xlu1 %v1363_v31, %s4746_s24  ;;  %v2069_v31 = vpack.c.bf16 %v2066_v26, %v2065_v25  ;;  %4168 = vmatprep.subr.bf16.mxu1 %v4744_v5 }
 0x70f   : > { %v2070_v4 = vpack.c.bf16 %v2068_v30, %v2067_v29  ;;  %v4492_v29 = vld [vmem:[%s4989_s11 + $0x110] sm:$0xff]   ;;  %v4493_v30 = vld [vmem:[%s4989_s11 + $0x118] sm:$0xff]  }
 0x710   : > { %1372 = vrot.lane.b32.xlu0 %v1364_v54, %s4747_s27  ;;  %v4487_v54 = vld [vmem:[%s4989_s11 + $0xa8] sm:$0xff]  }
 0x711   : > { %4169 = vmatpush3.bf16.msra.mxu1 %v4487_v54  ;;  %v4496_v54 = vld [vmem:[%s4989_s11 + $0x130] sm:$0xff]  }
 0x712   : > { %4170 = vmatprep.subr.bf16.mxu1 %v4744_v5 }
 0x715   : > { %4171 = vmatpush3.bf16.msra.mxu1 %v4488_v6 }
 0x716   : > { %4172 = vmatprep.subr.bf16.mxu1 %v4744_v5 }
 0x776   : > { %v1817_v8 = vpop.permute.xlu0 %1816 }
 0x777   : > { %v1826_v33 = vsel %vm942_vm1, %v1811_v32, %v1817_v8  ;;  %v4489_v8 = vld [vmem:[%s4989_s11 + $0xb8] sm:$0xff]  }
 0x778   : > { %4173 = vmatpush3.bf16.msra.mxu1 %v4489_v8 }
 0x779   : > { %4198 = vmatprep.subr.bf16.mxu1 %v4490_v28 }
 0x77c   : > { %v1820_v0 = vpop.permute.xlu1 %1819 }
 0x77d   : > { %v1828_v44 = vsel %vm1377_vm4, %v1826_v33, %v1820_v0 }
 0x77e   : > { %v1823_v48 = vpop.permute.xlu0 %1822 }
 0x77f   : > { %v1830_v34 = vsel %vm1380_vm5, %v1828_v44, %v1823_v48 }
 0x780   : > { %v1370_v41 = vpop.permute.xlu1 %1369  ;;  %v1832_v43 = vrot.slane %v1830_v34, 4 }
 0x781   : > { %v1379_v42 = vsel %vm1377_vm4, %v1376_v35, %v1370_v41 }
 0x782   : > { %v1373_v45 = vpop.permute.xlu0 %1372 }
 0x783   : > { %v1382_v46 = vsel %vm1380_vm5, %v1379_v42, %v1373_v45 }
 0x784   : > { %v1834_v47 = vsel %vm1179_vm2, %v1382_v46, %v1832_v43 }
 0x785   : > { %4155 = vmatmul.mubr.bf16.vlgmr.msra.gmra.mrb[28].mxu0 %v1834_v47 }
 0x786   : > { %4179 = vmatpush3.bf16.msra.mxu0 %v4474_v49  ;;  %4194 = vmatprep.mubr.bf16.mxu0 %v2069_v31  ;;  %v5397_v49 = vld [vmem:[%s5016_s30 + $0x8] sm:$0xff]  ;;  %v4494_v31 = vld [vmem:[%s4989_s11 + $0x120] sm:$0xff]  }
 0x787   : > { %4180 = vmatprep.subr.bf16.mxu0 %v4475_v50 }
 0x78a   : > { %4181 = vmatpush3.bf16.msra.mxu0 %v4475_v50  ;;  %v1960_v50 = vrot.slane %v5397_v49, %v5098_v40 }
 0x78b   : > { %4182 = vmatprep.subr.bf16.mxu0 %v4476_v9 }
 0x78e   : > { %4183 = vmatpush3.bf16.msra.mxu0 %v4476_v9 }
 0x78f   : > { %4184 = vmatprep.subr.bf16.mxu0 %v4477_v51 }
 0x792   : > { %4185 = vmatpush3.bf16.msra.mxu0 %v4477_v51 }
 0x793   : > { %4186 = vmatprep.subr.bf16.mxu0 %v4479_v10 }
 0x796   : > { %4187 = vmatpush3.bf16.msra.mxu0 %v4479_v10  ;;  %v2074_v10 = vrot.slane %v5095_v39, %v2073_v7 }
 0x797   : > { %4188 = vmatprep.subr.bf16.mxu0 %v4481_v14 }
 0x79a   : > { %4189 = vmatpush3.bf16.msra.mxu0 %v4481_v14 }
 0x79b   : > { %4190 = vmatprep.subr.bf16.mxu0 %v4483_v16 }
 0x79e   : > { %4191 = vmatpush3.bf16.msra.mxu0 %v4483_v16 }
 0x79f   : > { %4192 = vmatprep.subr.bf16.mxu0 %v4485_v18 }
 0x7a2   : > { %4193 = vmatpush3.bf16.msra.mxu0 %v4485_v18 }
 0x7a3   : > { %4218 = vmatprep.subr.bf16.mxu0 %v4744_v5 }
 0x7a5   : > { %4195 = vmatmul.mubr.bf16.vlgmr.msra.gmra.mrb[32].mxu0 %v2070_v4  ;;  %v4495_v4 = vld [vmem:[%s4989_s11 + $0x128] sm:$0xff]  }
 0x7a6   : > { %4220 = vmatprep.mubr.msk.bf16.mxu0 %vm4745_vm0, %v4744_v5 }
 0x858   : > { %v1922_v19 = vpop.f32.mrb[28].mxu0 }
 0x859   : > { %v1923_v13 = vadd.f32 %v1922_v19, %v1839_v52  ;;  %v4156_v55 = vpop.f32.mrb[29].mxu0 }
 0x85a   : > { %v1925_v57 = vpop.f32.mrb[30].mxu0 }
 0x85b   : > { %v5325_v59 = vadd.f32 %v4598_v58, %v1923_v13  ;;  %v1926_v60 = vadd.f32 %v1925_v57, %v1839_v52  ;;  %v4157_v61 = vpop.f32.mrb[31].mxu0  ;;  %v1966_v52 = vrot.slane %v5397_v49, %v825_v56  ;;  %v4601_v56 = vld [vmem:[%s5721_s2 + $0x8] sm:$0xff] }
 0x85d   : > { %v5330_v63 = vadd.f32 %v4599_v62, %v1926_v60  ;;  %1931 = vadd.xlane.f32.xlu1 %v5325_v59  ;;  %v1937_v3 = vmul.f32 %v5325_v59, %v5325_v59 }
 0x85f   : > { %1933 = vadd.xlane.f32.xlu0 %v5330_v63  ;;  %v1938_v1 = vmul.f32 %v5330_v63, %v5330_v63 }
 0x861   : > { %1941 = vadd.xlane.f32.xlu1 %v1938_v1 }
 0x863   : > { %1939 = vadd.xlane.f32.xlu0 %v1937_v3 }
 0x878   : > { %v4196_v12 = vpop.f32.mrb[32].mxu0 }
 0x879   : > { %v2166_v14 = vadd.f32 %v4196_v12, %v2074_v10  ;;  %v2157_v15 = vpop.f32.mrb[33].mxu0 }
 0x87a   : > { %v2158_v16 = vadd.f32 %v2157_v15, %v2074_v10  ;;  %v4197_v17 = vpop.f32.mrb[34].mxu0 }
 0x87b   : > { %v2169_v18 = vadd.f32 %v4197_v17, %v2074_v10  ;;  %v2160_v22 = vpop.f32.mrb[35].mxu0 }
 0x87c   : > { %v2161_v23 = vadd.f32 %v2160_v22, %v2074_v10 }
 0x87d   : > { %v5422_v25 = vpack.c.bf16 %v2169_v18, %v2166_v14 }
 0x87e   : > { %v2278_v26 = vpack.c.bf16 %v2161_v23, %v2158_v16 }
 0x880   : > { %2290 = vrot.lane.b32.xlu0 %v2278_v26, %s4747_s27  ;;  %2292 = vrot.lane.b32.xlu1 %v2278_v26, %s4746_s24  ;;  %v2310_v39 = vsel %vm942_vm1, %v2278_v26, 0 }
 0x881   : > { %4219 = vmatpush3.bf16.xpose.msra.mxu0 %v2310_v39 }
 0x882   : > { %4230 = vmatprep.subr.bf16.mxu0 %v4744_v5 }
 0x884   : > { %2294 = vrot.lane.b32.xlu0 %v2278_v26, %s4748_s29 }
 0x8ea   : > { %v1932_v32 = vpop.xlane.xlu1 %1931 }
 0x8eb   : > { %v1935_v0 = vmul.f32 0.015625, %v1932_v32  ;;  %v1974_v32 = vsub.s32 4, %v5089_v37 }
 0x8ec   : > { %v1934_v33 = vpop.xlane.xlu0 %1933 }
 0x8ed   : > { %v1936_v44 = vmul.f32 0.015625, %v1934_v33  ;;  %v1945_v41 = vmul.f32 %v1935_v0, %v1935_v0  ;;  %v1949_v19 = vsub.f32 %v5325_v59, %v1935_v0  ;;  %v5448_v33 = vld [vmem:[%s5016_s30] sm:$0xff] }
 0x8ee   : > { %v1942_v11 = vpop.xlane.xlu1 %1941  ;;  %v1975_v24 = vrot.slane %v5448_v33, %v1974_v32 }
 0x8ef   : > { %v1946_v48 = vmul.f32 %v1936_v44, %v1936_v44  ;;  %v1944_v34 = vmul.f32 0.015625, %v1942_v11  ;;  %v1950_v9 = vsub.f32 %v5330_v63, %v1936_v44  ;;  %v4600_v63 = vld [vmem:[%s5721_s2] sm:$0xff] }
 0x8f0   : > { %v1940_v35 = vpop.xlane.xlu0 %1939 }
 0x8f1   : > { %v1948_v42 = vsub.f32 %v1944_v34, %v1946_v48  ;;  %v1943_v43 = vmul.f32 0.015625, %v1940_v35 }
 0x8f3   : > { %v1952_v45 = vadd.f32 1e-05, %v1948_v42  ;;  %v1947_v46 = vsub.f32 %v1943_v43, %v1945_v41  ;;  %v2293_v42 = vpop.permute.xlu1 %2292 }
 0x8f4   : > { %v2291_v6 = vpop.permute.xlu0 %2290 }
 0x8f5   : > { %4554 = vrsqrt.f32 %v1952_v45  ;;  %v1951_v47 = vadd.f32 1e-05, %v1947_v46  ;;  %v2356_v8 = vsel %vm942_vm1, %v2291_v6, 0  ;;  %v2402_v45 = vsel %vm942_vm1, %v2293_v42, 0 }
 0x8f7   : > { %4556 = vrsqrt.f32 %v1951_v47 }
 0x8f8   : > { %v2295_v46 = vpop.permute.xlu0 %2294 }
 0x8ff   : > { %v4555_v51 = vpop.eup %4554 }
 0x900   : > { %v1956_v13 = vmul.f32 %v4555_v51, %v1950_v9  ;;  %v2448_v9 = vsel %vm942_vm1, %v2295_v46, 0 }
 0x901   : > { %v4557_v55 = vpop.eup %4556 }
 0x902   : > { %v1955_v57 = vmul.f32 %v4557_v55, %v1949_v19  ;;  %v1962_v58 = vmul.f32 %v1960_v50, %v1956_v13 }
 0x904   : > { %v1961_v60 = vmul.f32 %v1960_v50, %v1955_v57  ;;  %v5406_v61 = vadd.f32 %v1966_v52, %v1962_v58  ;;  %v2176_v50 = vsub.s32 6, %v5089_v37 }
 0x906   : > { %v5408_v62 = vadd.f32 %v1966_v52, %v1961_v60  ;;  %v1970_v59 = vadd.f32 %v4601_v56, %v5406_v61  ;;  %v2177_v52 = vrot.slane %v5448_v33, %v2176_v50 }
 0x908   : > { %v1969_v1 = vadd.f32 %v4600_v63, %v5408_v62 }
 0x90a   : > { %v1971_v3 = vpack.c.bf16 %v1970_v59, %v1969_v1 }
 0x90c   : > { %4175 = vmatmul.mubr.bf16.vlgmr.msra.gmra.mrb[44].mxu1 %v1971_v3 }
 0x90d   : > { %4214 = vmatprep.mubr.bf16.mxu1 %v2172_v2  ;;  %4199 = vmatpush3.bf16.msra.mxu1 %v4490_v28 }
 0x90e   : > { %4200 = vmatprep.subr.bf16.mxu1 %v4491_v53 }
 0x911   : > { %4201 = vmatpush3.bf16.msra.mxu1 %v4491_v53 }
 0x912   : > { %4202 = vmatprep.subr.bf16.mxu1 %v4492_v29 }
 0x915   : > { %4203 = vmatpush3.bf16.msra.mxu1 %v4492_v29 }
 0x916   : > { %4204 = vmatprep.subr.bf16.mxu1 %v4493_v30 }
 0x919   : > { %4205 = vmatpush3.bf16.msra.mxu1 %v4493_v30 }
 0x91a   : > { %4206 = vmatprep.subr.bf16.mxu1 %v4494_v31 }
 0x91d   : > { %4207 = vmatpush3.bf16.msra.mxu1 %v4494_v31 }
 0x91e   : > { %4208 = vmatprep.subr.bf16.mxu1 %v4495_v4 }
 0x921   : > { %4209 = vmatpush3.bf16.msra.mxu1 %v4495_v4 }
 0x922   : > { %4210 = vmatprep.subr.bf16.mxu1 %v4496_v54 }
 0x925   : > { %4211 = vmatpush3.bf16.msra.mxu1 %v4496_v54 }
 0x926   : > { %4212 = vmatprep.subr.bf16.mxu1 %v4497_v20 }
 0x929   : > { %4213 = vmatpush3.bf16.msra.mxu1 %v4497_v20 }
 0x92a   : > { %4224 = vmatprep.subr.bf16.mxu1 %v4744_v5 }
 0x92c   : > { %4215 = vmatmul.mubr.bf16.vlgmr.msra.gmra.mrb[48].mxu1 %v2173_v21 }
 0x92d   : > { %4226 = vmatprep.mubr.msk.bf16.mxu1 %vm4745_vm0, %v4744_v5 }
 0x932   : > { %4225 = vmatpush3.bf16.xpose.msra.mxu1 %v2356_v8 }
 0x933   : > { %4236 = vmatprep.subr.bf16.mxu1 %v4744_v5 }
 0x9df   : > { %v2058_v27 = vpop.f32.mrb[44].mxu1 }
 0x9e0   : > { %v2059_v0 = vadd.f32 %v2058_v27, %v1975_v24  ;;  %v4176_v44 = vpop.f32.mrb[45].mxu1 }
 0x9e1   : > { %v2061_v11 = vpop.f32.mrb[46].mxu1 }
 0x9e2   : > { %v2062_v48 = vadd.f32 %v2061_v11, %v1975_v24  ;;  %v4177_v34 = vpop.f32.mrb[47].mxu1  ;;  %v2275_v35 = vmul.f32 0.25, %v2059_v0 }
 0x9e4   : > { %v2276_v41 = vmul.f32 0.25, %v2062_v48 }
 0x9e6   : > { %v5453_v43 = vpack.c.bf16 %v2276_v41, %v2275_v35 }
 0x9e8   : > { %2287 = vrot.lane.b32.xlu0 %v5453_v43, %s4748_s29  ;;  %2283 = vrot.lane.b32.xlu1 %v5453_v43, %s4747_s27 }
 0x9e9   : > { %4221 = vmatmul.mubr.msk.bf16.vlgmr.msra.gmra.mrb[36].mxu0 %vm942_vm1, %v5453_v43 }
 0x9ea   : > { %4231 = vmatpush3.bf16.xpose.msra.mxu0 %v2402_v45  ;;  %4232 = vmatprep.mubr.msk.bf16.mxu0 %vm4745_vm0, %v4744_v5 }
 0x9eb   : > { %4242 = vmatprep.subr.bf16.mxu0 %v4744_v5 }
 0x9ec   : > { %2285 = vrot.lane.b32.xlu1 %v5453_v43, %s4746_s24 }
 0x9ff   : > { %v4216_v19 = vpop.f32.mrb[48].mxu1 }
 0xa00   : > { %v2269_v55 = vadd.f32 %v4216_v19, %v2177_v52  ;;  %v2260_v57 = vpop.f32.mrb[49].mxu1 }
 0xa01   : > { %v2261_v58 = vadd.f32 %v2260_v57, %v2177_v52  ;;  %v4217_v60 = vpop.f32.mrb[50].mxu1 }
 0xa02   : > { %v2272_v63 = vadd.f32 %v4217_v60, %v2177_v52  ;;  %v2263_v1 = vpop.f32.mrb[51].mxu1 }
 0xa03   : > { %v2264_v56 = vadd.f32 %v2263_v1, %v2177_v52 }
 0xa04   : > { %v5491_v59 = vpack.c.bf16 %v2272_v63, %v2269_v55 }
 0xa05   : > { %v2280_v3 = vpack.c.bf16 %v2264_v56, %v2261_v58 }
 0xa5a   : > { %v5467_v47 = vpop.permute.xlu1 %2283  ;;  %v5485_v13 = vpop.permute.xlu0 %2287 }
 0xa5b   : > { %4227 = vmatmul.mubr.msk.bf16.vlgmr.msra.gmra.mrb[52].mxu1 %vm942_vm1, %v5467_v47 }
 0xa5c   : > { %4237 = vmatpush3.bf16.xpose.msra.mxu1 %v2448_v9  ;;  %4238 = vmatprep.mubr.msk.bf16.mxu1 %vm4745_vm0, %v4744_v5 }
 0xa5d   : > { %4248 = vmatprep.subr.bf16.mxu1 %v4744_v5 }
 0xa5e   : > { %v5476_v51 = vpop.permute.xlu1 %2285 }
 0xa5f   : > { %4233 = vmatmul.mubr.msk.bf16.vlgmr.msra.gmra.mrb[40].mxu0 %vm942_vm1, %v5476_v51 }
 0xa60   : > { %4244 = vmatprep.mubr.msk.bf16.mxu0 %vm4745_vm0, %v4744_v5  ;;  %4243 = vmatpush3.bf16.msra.mxu0 %v2280_v3 }
 0xa61   : > { %4254 = vmatprep.subr.bf16.mxu0 %v4744_v5 }
 0xa63   : > { %4239 = vmatmul.mubr.msk.bf16.vlgmr.msra.gmra.mrb[56].mxu1 %vm942_vm1, %v5485_v13 }
 0xa64   : > { %4250 = vmatprep.mubr.msk.bf16.mxu1 %vm4745_vm0, %v4744_v5 }
 0xabc   : > { %v2346_v10 = vpop.f32.mrb[36].mxu0 }
 0xabd   : > { %v4222_v12 = vpop.f32.mrb[37].mxu0  ;;  %v2491_v14 = vsel %vm2490_vm6, %v2346_v10, -inf }
 0xabe   : > { %2492 = vmax.xlane.f32.xlu1 %v2491_v14  ;;  %v2349_v15 = vpop.f32.mrb[38].mxu0 }
 0xabf   : > { %v4223_v16 = vpop.f32.mrb[39].mxu0 }
 0xb2e   : > { %v2392_v17 = vpop.f32.mrb[52].mxu1 }
 0xb2f   : > { %v4228_v18 = vpop.f32.mrb[53].mxu1  ;;  %v2494_v22 = vsel %vm2490_vm6, %v2392_v17, -inf }
 0xb30   : > { %2495 = vmax.xlane.f32.xlu0 %v2494_v22  ;;  %v2395_v23 = vpop.f32.mrb[54].mxu1 }
 0xb31   : > { %v4229_v26 = vpop.f32.mrb[55].mxu1 }
 0xb32   : > { %v2438_v39 = vpop.f32.mrb[40].mxu0  ;;  %v2753_v26 = vsel %vm942_vm1, %v5422_v25, 0 }
 0xb33   : > { %v4234_v28 = vpop.f32.mrb[41].mxu0  ;;  %v2497_v53 = vsel %vm2490_vm6, %v2438_v39, -inf }
 0xb34   : > { %v2441_v2 = vpop.f32.mrb[42].mxu0  ;;  %2498 = vmax.xlane.f32.xlu0 %v2497_v53 }
 0xb35   : > { %v4235_v29 = vpop.f32.mrb[43].mxu0 }
 0xb36   : > { %v2484_v30 = vpop.f32.mrb[56].mxu1  ;;  %v2842_v29 = vrot.slane %v5476_v51, 4 }
 0xb37   : > { %v4240_v31 = vpop.f32.mrb[57].mxu1  ;;  %v2500_v4 = vsel %vm2490_vm6, %v2484_v30, -inf }
 0xb38   : > { %2501 = vmax.xlane.f32.xlu1 %v2500_v4  ;;  %v2487_v54 = vpop.f32.mrb[58].mxu1 }
 0xb39   : > { %v4241_v20 = vpop.f32.mrb[59].mxu1  ;;  %v2795_v54 = vrot.slane %v5467_v47, 4 }
 0xb49   : > { %2300 = vrot.lane.b32.xlu1 %v2280_v3, %s4746_s24 }
 0xb4b   : > { %v2493_v21 = vpop.xlane.xlu1 %2492 }
 0xb4c   : > { %v2503_v6 = vsub.f32 %v2346_v10, %v2493_v21  ;;  %v2889_v21 = vrot.slane %v5485_v13, 4 }
 0xb4e   : > { %v2507_v8 = vmul.f32 1.442695, %v2503_v6 }
 0xb50   : > { %4558 = vpow2.f32 %v2507_v8 }
 0xb5a   : > { %v4559_v24 = vpop.eup %4558 }
 0xb5b   : > { %v2515_v27 = vsel %vm2490_vm6, %v4559_v24, 0.0 }
 0xb5c   : > { %2516 = vadd.xlane.f32.xlu0 %v2515_v27 }
 0xb72   : > { %2297 = vrot.lane.b32.xlu0 %v2280_v3, %s4747_s27 }
 0xbbd   : > { %v2496_v0 = vpop.xlane.xlu0 %2495 }
 0xbbe   : > { %v2504_v44 = vsub.f32 %v2392_v17, %v2496_v0 }
 0xbc0   : > { %v2509_v11 = vmul.f32 1.442695, %v2504_v44 }
 0xbc1   : > { %v2499_v48 = vpop.xlane.xlu0 %2498 }
 0xbc2   : > { %4560 = vpow2.f32 %v2509_v11  ;;  %v2505_v34 = vsub.f32 %v2438_v39, %v2499_v48  ;;  %v2748_v39 = vrot.slane %v5453_v43, 4 }
 0xbc4   : > { %v2511_v35 = vmul.f32 1.442695, %v2505_v34 }
 0xbc5   : > { %v2502_v52 = vpop.xlane.xlu1 %2501 }
 0xbc6   : > { %4562 = vpow2.f32 %v2511_v35  ;;  %v2506_v19 = vsub.f32 %v2484_v30, %v2502_v52 }
 0xbc8   : > { %v2513_v57 = vmul.f32 1.442695, %v2506_v19 }
 0xbc9   : > { %v2301_v1 = vpop.permute.xlu1 %2300 }
 0xbcc   : > { %v4561_v41 = vpop.eup %4560 }
 0xbcd   : > { %v2518_v42 = vsel %vm2490_vm6, %v4561_v41, 0.0 }
 0xbce   : > { %2519 = vadd.xlane.f32.xlu1 %v2518_v42 }
 0xbd0   : > { %v4563_v45 = vpop.eup %4562 }
 0xbd1   : > { %v2521_v46 = vsel %vm2490_vm6, %v4563_v45, 0.0 }
 0xbd2   : > { %2522 = vadd.xlane.f32.xlu0 %v2521_v46 }
 0xbdf   : > { %2303 = vrot.lane.b32.xlu1 %v2280_v3, %s4748_s29 }
 0xbe8   : > { %2732 = vrot.lane.b32.xlu0 %v5422_v25, %s4747_s27 }
 0xbe9   : > { %v2517_v9 = vpop.xlane.xlu0 %2516 }
 0xbea   : > { %4564 = vrcp.f32 %v2517_v9 }
 0xbeb   : > { %4566 = vpow2.f32 %v2513_v57 }
 0xbec   : > { %2736 = vrot.lane.b32.xlu0 %v5422_v25, %s4748_s29 }
 0xbed   : > { %v2298_v55 = vpop.permute.xlu0 %2297 }
 0xbee   : > { %4249 = vmatpush3.bf16.msra.mxu1 %v2298_v55 }
 0xbef   : > { %4260 = vmatprep.subr.bf16.mxu1 %v4744_v5 }
 0xbf4   : > { %v4565_v58 = vpop.eup %4564 }
 0xbf5   : > { %v2531_v60 = vmul.f32 %v4565_v58, %v4559_v24  ;;  %v4567_v56 = vpop.eup %4566 }
 0xbf6   : > { %v2524_v3 = vsel %vm2490_vm6, %v4567_v56, 0.0 }
 0xbf7   : > { %v2535_v63 = vpack.c.bf16 %v2531_v60, %v2531_v60 }
 0xbf9   : > { %4245 = vmatmul.mubr.msk.bf16.vlgmr.msra.gmra.mrb[44].mxu0 %vm2490_vm6, %v2535_v63 }
 0xbfa   : > { %4255 = vmatpush3.bf16.msra.mxu0 %v2301_v1  ;;  %4256 = vmatprep.mubr.msk.bf16.mxu0 %vm4745_vm0, %v4744_v5 }
 0xbfb   : > { %4266 = vmatprep.subr.bf16.mxu0 %v4744_v5 }
 0xc03   : > { %2525 = vadd.xlane.f32.xlu1 %v2524_v3 }
 0xc14   : > { %2734 = vrot.lane.b32.xlu1 %v5422_v25, %s4746_s24 }
 0xc5b   : > { %v2520_v10 = vpop.xlane.xlu1 %2519 }
 0xc5c   : > { %4568 = vrcp.f32 %v2520_v10 }
 0xc5f   : > { %v2523_v12 = vpop.xlane.xlu0 %2522  ;;  %v2304_v18 = vpop.permute.xlu1 %2303 }
 0xc60   : > { %4570 = vrcp.f32 %v2523_v12 }
 0xc63   : > { %v2733_v31 = vpop.permute.xlu0 %2732 }
 0xc64   : > { %v2800_v4 = vsel %vm942_vm1, %v2733_v31, 0 }
 0xc66   : > { %v4569_v14 = vpop.eup %4568 }
 0xc67   : > { %v2532_v15 = vmul.f32 %v4569_v14, %v4561_v41  ;;  %v2737_v51 = vpop.permute.xlu0 %2736 }
 0xc68   : > { %v2894_v20 = vsel %vm942_vm1, %v2737_v51, 0 }
 0xc69   : > { %v2536_v16 = vpack.c.bf16 %v2532_v15, %v2532_v15 }
 0xc6a   : > { %v4571_v17 = vpop.eup %4570 }
 0xc6b   : > { %v2533_v22 = vmul.f32 %v4571_v17, %v4563_v45  ;;  %4251 = vmatmul.mubr.msk.bf16.vlgmr.msra.gmra.mrb[60].mxu1 %vm2490_vm6, %v2536_v16 }
 0xc6c   : > { %4261 = vmatpush3.bf16.msra.mxu1 %v2304_v18  ;;  %4262 = vmatprep.mubr.msk.bf16.mxu1 %vm4745_vm0, %v4744_v5 }
 0xc6d   : > { %v2537_v23 = vpack.c.bf16 %v2533_v22, %v2533_v22  ;;  %4272 = vmatprep.subr.bf16.mxu1 %v4744_v5 }
 0xc6f   : > { %4257 = vmatmul.mubr.msk.bf16.vlgmr.msra.gmra.mrb[48].mxu0 %vm2490_vm6, %v2537_v23 }
 0xc70   : > { %4267 = vmatpush3.bf16.xpose.msra.mxu0 %v2753_v26  ;;  %4268 = vmatprep.mubr.msk.bf16.mxu0 %vm4745_vm0, %v4744_v5 }
 0xc71   : > { %4278 = vmatprep.subr.bf16.mxu0 %v4744_v5 }
 0xc77   : > { %4269 = vmatmul.mubr.msk.bf16.vlgmr.msra.gmra.mrb[52].mxu0 %vm942_vm1, %v2748_v39 }
 0xc78   : > { %4280 = vmatprep.mubr.msk.bf16.mxu0 %vm4745_vm0, %v4744_v5 }
 0xc90   : > { %v2526_v28 = vpop.xlane.xlu1 %2525 }
 0xc91   : > { %4572 = vrcp.f32 %v2526_v28 }
 0xc94   : > { %v2735_v53 = vpop.permute.xlu1 %2734 }
 0xc95   : > { %v2847_v2 = vsel %vm942_vm1, %v2735_v53, 0 }
 0xc96   : > { %4279 = vmatpush3.bf16.xpose.msra.mxu0 %v2847_v2 }
 0xc97   : > { %4290 = vmatprep.subr.bf16.mxu0 %v4744_v5 }
 0xc9b   : > { %v4573_v25 = vpop.eup %4572 }
 0xc9c   : > { %v2534_v30 = vmul.f32 %v4573_v25, %v4567_v56 }
 0xc9d   : > { %4281 = vmatmul.mubr.msk.bf16.vlgmr.msra.gmra.mrb[56].mxu0 %vm942_vm1, %v2842_v29 }
 0xc9e   : > { %4291 = vmatpush3.bf16.msra.mxu0 %v5491_v59  ;;  %v2538_v43 = vpack.c.bf16 %v2534_v30, %v2534_v30  ;;  %4292 = vmatprep.mubr.msk.bf16.mxu0 %vm4745_vm0, %v4744_v5 }
 0xc9f   : > { %4302 = vmatprep.subr.bf16.mxu0 %v4744_v5 }
 0xca0   : > { %4263 = vmatmul.mubr.msk.bf16.vlgmr.msra.gmra.mrb[64].mxu1 %vm2490_vm6, %v2538_v43 }
 0xca1   : > { %4273 = vmatpush3.bf16.xpose.msra.mxu1 %v2800_v4  ;;  %4274 = vmatprep.mubr.msk.bf16.mxu1 %vm4745_vm0, %v4744_v5 }
 0xca2   : > { %4284 = vmatprep.subr.bf16.mxu1 %v4744_v5 }
 0xca8   : > { %4275 = vmatmul.mubr.msk.bf16.vlgmr.msra.gmra.mrb[68].mxu1 %vm942_vm1, %v2795_v54 }
 0xca9   : > { %4285 = vmatpush3.bf16.xpose.msra.mxu1 %v2894_v20  ;;  %4286 = vmatprep.mubr.msk.bf16.mxu1 %vm4745_vm0, %v4744_v5 }
 0xcaa   : > { %4296 = vmatprep.subr.bf16.mxu1 %v4744_v5 }
 0xcb0   : > { %4287 = vmatmul.mubr.msk.bf16.vlgmr.msra.gmra.mrb[72].mxu1 %vm942_vm1, %v2889_v21 }
 0xcb1   : > { %4298 = vmatprep.mubr.msk.bf16.mxu1 %vm4745_vm0, %v4744_v5 }
 0xccc   : > { %v5553_v6 = vpop.f32.mrb[44].mxu0 }
 0xccd   : > { %v4246_v47 = vpop.f32.mrb[45].mxu0 }
 0xcce   : > { %v2579_v8 = vpop.f32.mrb[46].mxu0 }
 0xccf   : > { %v4247_v24 = vpop.f32.mrb[47].mxu0 }
 0xd3e   : > { %v2619_v27 = vpop.f32.mrb[60].mxu1 }
 0xd3f   : > { %v4252_v0 = vpop.f32.mrb[61].mxu1  ;;  %v2712_v47 = vpack.c.bf16 %v2619_v27, %v2619_v27 }
 0xd40   : > { %v2622_v44 = vpop.f32.mrb[62].mxu1 }
 0xd41   : > { %v4253_v11 = vpop.f32.mrb[63].mxu1 }
 0xd42   : > { %v5555_v48 = vpop.f32.mrb[48].mxu0 }
 0xd43   : > { %v4258_v34 = vpop.f32.mrb[49].mxu0 }
 0xd44   : > { %v2665_v35 = vpop.f32.mrb[50].mxu0 }
 0xd45   : > { %v4259_v41 = vpop.f32.mrb[51].mxu0 }
 0xd4a   : > { %v2789_v13 = vpop.f32.mrb[52].mxu0 }
 0xd4b   : > { %v4270_v42 = vpop.f32.mrb[53].mxu0  ;;  %v2936_v45 = vsel %vm2490_vm6, %v2789_v13, -inf }
 0xd4c   : > { %2937 = vmax.xlane.f32.xlu1 %v2936_v45  ;;  %v2792_v46 = vpop.f32.mrb[54].mxu0 }
 0xd4d   : > { %v4271_v9 = vpop.f32.mrb[55].mxu0 }
 0xd70   : > { %v2883_v52 = vpop.f32.mrb[56].mxu0 }
 0xd71   : > { %v4282_v19 = vpop.f32.mrb[57].mxu0  ;;  %v2942_v15 = vsel %vm2490_vm6, %v2883_v52, -inf }
 0xd72   : > { %v2886_v55 = vpop.f32.mrb[58].mxu0 }
 0xd73   : > { %v5558_v57 = vpop.f32.mrb[64].mxu1  ;;  %v4283_v58 = vpop.f32.mrb[59].mxu0 }
 0xd74   : > { %v4264_v60 = vpop.f32.mrb[65].mxu1 }
 0xd75   : > { %v2708_v63 = vpop.f32.mrb[66].mxu1 }
 0xd76   : > { %v4265_v1 = vpop.f32.mrb[67].mxu1 }
 0xd7b   : > { %v2836_v56 = vpop.f32.mrb[68].mxu1 }
 0xd7c   : > { %v4276_v3 = vpop.f32.mrb[69].mxu1  ;;  %v2939_v10 = vsel %vm2490_vm6, %v2836_v56, -inf }
 0xd7d   : > { %2940 = vmax.xlane.f32.xlu0 %v2939_v10  ;;  %v2839_v12 = vpop.f32.mrb[70].mxu1 }
 0xd7e   : > { %v4277_v14 = vpop.f32.mrb[71].mxu1 }
 0xd81   : > { %2943 = vmax.xlane.f32.xlu0 %v2942_v15 }
 0xd83   : > { %v2930_v16 = vpop.f32.mrb[72].mxu1 }
 0xd84   : > { %v4288_v17 = vpop.f32.mrb[73].mxu1  ;;  %v2945_v18 = vsel %vm2490_vm6, %v2930_v16, -inf }
 0xd85   : > { %v2933_v22 = vpop.f32.mrb[74].mxu1  ;;  %2946 = vmax.xlane.f32.xlu1 %v2945_v18  ;;  %v4499_v17 = vld [vmem:[%s4989_s11 + $0x148] sm:$0xff]  }
 0xd86   : > { %v4289_v23 = vpop.f32.mrb[75].mxu1  ;;  %v4500_v22 = vld [vmem:[%s4989_s11 + $0x150] sm:$0xff]  }
 0xdd9   : > { %v2938_v26 = vpop.xlane.xlu1 %2937 }
 0xdda   : > { %v2948_v39 = vsub.f32 %v2789_v13, %v2938_v26 }
 0xddc   : > { %v2952_v28 = vmul.f32 1.442695, %v2948_v39 }
 0xdde   : > { %4574 = vpow2.f32 %v2952_v28 }
 0xde8   : > { %v4575_v53 = vpop.eup %4574 }
 0xde9   : > { %v2960_v2 = vsel %vm2490_vm6, %v4575_v53, 0.0 }
 0xdea   : > { %2961 = vadd.xlane.f32.xlu0 %v2960_v2  ;;  %v4501_v2 = vld [vmem:[%s4989_s11 + $0x158] sm:$0xff]  }
 0xe0a   : > { %v2941_v25 = vpop.xlane.xlu0 %2940 }
 0xe0b   : > { %v2949_v29 = vsub.f32 %v2836_v56, %v2941_v25  ;;  %v2713_v25 = vpack.c.bf16 %v5555_v48, %v5555_v48  ;;  %v4504_v48 = vld [vmem:[%s4989_s11 + $0x170] sm:$0xff]  }
 0xe0d   : > { %v2954_v30 = vmul.f32 1.442695, %v2949_v29 }
 0xe0e   : > { %v2944_v31 = vpop.xlane.xlu0 %2943 }
 0xe0f   : > { %4576 = vpow2.f32 %v2954_v30  ;;  %v2950_v43 = vsub.f32 %v2883_v52, %v2944_v31 }
 0xe11   : > { %v2956_v4 = vmul.f32 1.442695, %v2950_v43 }
 0xe12   : > { %v2947_v8 = vpop.xlane.xlu1 %2946 }
 0xe13   : > { %4578 = vpow2.f32 %v2956_v4  ;;  %v2951_v24 = vsub.f32 %v2930_v16, %v2947_v8  ;;  %v4498_v16 = vld [vmem:[%s4989_s11 + $0x140] sm:$0xff]  }
 0xe14   : > { %v4502_v4 = vld [vmem:[%s4989_s11 + $0x160] sm:$0xff]  }
 0xe15   : > { %v2958_v0 = vmul.f32 1.442695, %v2951_v24 }
 0xe17   : > { %4580 = vpow2.f32 %v2958_v0  ;;  %v2714_v0 = vpack.c.bf16 %v5558_v57, %v5558_v57 }
 0xe19   : > { %v4577_v51 = vpop.eup %4576 }
 0xe1a   : > { %v2963_v54 = vsel %vm2490_vm6, %v4577_v51, 0.0 }
 0xe1b   : > { %2964 = vadd.xlane.f32.xlu1 %v2963_v54  ;;  %v4505_v54 = vld [vmem:[%s4989_s11 + $0x178] sm:$0xff]  }
 0xe1d   : > { %v4579_v20 = vpop.eup %4578 }
 0xe1e   : > { %v2966_v21 = vsel %vm2490_vm6, %v4579_v20, 0.0 }
 0xe1f   : > { %2967 = vadd.xlane.f32.xlu0 %v2966_v21 }
 0xe21   : > { %v4581_v44 = vpop.eup %4580 }
 0xe22   : > { %v2969_v11 = vsel %vm2490_vm6, %v4581_v44, 0.0 }
 0xe2c   : > { %2742 = vrot.lane.b32.xlu1 %v5491_v59, %s4746_s24 }
 0xe35   : > { %2739 = vrot.lane.b32.xlu0 %v5491_v59, %s4747_s27 }
 0xe39   : > { %2716 = vrot.lane.b32.xlu0 %v2712_v47, %s4748_s29 }
 0xe50   : > { %2970 = vadd.xlane.f32.xlu1 %v2969_v11 }
 0xe61   : > { %2745 = vrot.lane.b32.xlu1 %v5491_v59, %s4748_s29 }
 0xe77   : > { %v2962_v34 = vpop.xlane.xlu0 %2961 }
 0xe78   : > { %4582 = vrcp.f32 %v2962_v34 }
 0xe82   : > { %v4583_v35 = vpop.eup %4582 }
 0xe83   : > { %v2976_v41 = vmul.f32 %v4583_v35, %v4575_v53 }
 0xe85   : > { %v2980_v13 = vpack.c.bf16 %v2976_v41, %v2976_v41 }
 0xe87   : > { %4293 = vmatmul.mubr.msk.bf16.vlgmr.msra.gmra.mrb[60].mxu0 %vm2490_vm6, %v2980_v13 }
 0xe88   : > { %4304 = vmatprep.mubr.msk.bf16.mxu0 %vm4745_vm0, %v4744_v5 }
 0xea8   : > { %v2965_v27 = vpop.xlane.xlu1 %2964 }
 0xea9   : > { %4584 = vrcp.f32 %v2965_v27 }
 0xeac   : > { %v2743_v42 = vpop.permute.xlu1 %2742  ;;  %v2968_v45 = vpop.xlane.xlu0 %2967 }
 0xead   : > { %4586 = vrcp.f32 %v2968_v45  ;;  %4303 = vmatpush3.bf16.msra.mxu0 %v2743_v42  ;;  %v2711_v42 = vpack.c.bf16 %v5553_v6, %v5553_v6 }
 0xeae   : > { %4314 = vmatprep.subr.bf16.mxu0 %v4744_v5 }
 0xeb0   : > { %v2740_v46 = vpop.permute.xlu0 %2739 }
 0xeb1   : > { %4297 = vmatpush3.bf16.msra.mxu1 %v2740_v46 }
 0xeb2   : > { %4308 = vmatprep.subr.bf16.mxu1 %v4744_v5 }
 0xeb3   : > { %v4585_v59 = vpop.eup %4584 }
 0xeb4   : > { %v2977_v9 = vmul.f32 %v4585_v59, %v4577_v51  ;;  %v4503_v51 = vld [vmem:[%s4989_s11 + $0x168] sm:$0xff]  }
 0xeb6   : > { %v2981_v52 = vpack.c.bf16 %v2977_v9, %v2977_v9 }
 0xeb7   : > { %v4587_v19 = vpop.eup %4586 }
 0xeb8   : > { %v2978_v55 = vmul.f32 %v4587_v19, %v4579_v20  ;;  %4299 = vmatmul.mubr.msk.bf16.vlgmr.msra.gmra.mrb[76].mxu1 %vm2490_vm6, %v2981_v52 }
 0xeb9   : > { %4310 = vmatprep.mubr.msk.bf16.mxu1 %vm4745_vm0, %v4744_v5 }
 0xeba   : > { %v2982_v58 = vpack.c.bf16 %v2978_v55, %v2978_v55 }
 0xebc   : > { %4305 = vmatmul.mubr.msk.bf16.vlgmr.msra.gmra.mrb[64].mxu0 %vm2490_vm6, %v2982_v58  ;;  %v3183_v58 = vsub.s32 7, %v5089_v37 }
 0xebd   : > { %4330 = vmatprep.mubr.msk.bf16.mxu0 %vm4745_vm0, %v4744_v5  ;;  %4315 = vmatpush3.bf16.msra.mxu0 %v4498_v16  ;;  %v4508_v16 = vld [vmem:[%s4996_s28 + $0x10] sm:$0xff]  }
 0xebe   : > { %4316 = vmatprep.subr.bf16.mxu0 %v4744_v5  ;;  %v3184_v6 = vrot.slane %v5448_v33, %v3183_v58 }
 0xec1   : > { %4317 = vmatpush3.bf16.msra.mxu0 %v4499_v17  ;;  %v4509_v17 = vld [vmem:[%s4996_s28 + $0x18] sm:$0xff]  }
 0xec2   : > { %4318 = vmatprep.subr.bf16.mxu0 %v4744_v5 }
 0xec5   : > { %4319 = vmatpush3.bf16.msra.mxu0 %v4500_v22  ;;  %v4511_v22 = vld [vmem:[%s4996_s28 + $0x28] sm:$0xff]  }
 0xec6   : > { %4320 = vmatprep.subr.bf16.mxu0 %v4744_v5 }
 0xec9   : > { %4321 = vmatpush3.bf16.msra.mxu0 %v4501_v2  ;;  %v4517_v2 = vld [vmem:[%s5022_s20 + $0x18] sm:$0xff]  }
 0xeca   : > { %4322 = vmatprep.subr.bf16.mxu0 %v4744_v5 }
 0xecd   : > { %4323 = vmatpush3.bf16.msra.mxu0 %v4502_v4 }
 0xece   : > { %4324 = vmatprep.subr.bf16.mxu0 %v4744_v5 }
 0xed1   : > { %4325 = vmatpush3.bf16.msra.mxu0 %v4503_v51 }
 0xed2   : > { %4326 = vmatprep.subr.bf16.mxu0 %v4744_v5 }
 0xed5   : > { %4327 = vmatpush3.bf16.msra.mxu0 %v4504_v48 }
 0xed6   : > { %4328 = vmatprep.subr.bf16.mxu0 %v4744_v5 }
 0xed9   : > { %4329 = vmatpush3.bf16.msra.mxu0 %v4505_v54 }
 0xeda   : > { %4354 = vmatprep.subr.bf16.mxu0 %v4744_v5 }
 0xedd   : > { %v2971_v60 = vpop.xlane.xlu1 %2970 }
 0xede   : > { %4588 = vrcp.f32 %v2971_v60 }
 0xee1   : > { %v2746_v63 = vpop.permute.xlu1 %2745 }
 0xee2   : > { %4309 = vmatpush3.bf16.msra.mxu1 %v2746_v63 }
 0xee3   : > { %4334 = vmatprep.subr.bf16.mxu1 %v4744_v5 }
 0xee8   : > { %v4589_v1 = vpop.eup %4588 }
 0xee9   : > { %v2979_v56 = vmul.f32 %v4589_v1, %v4581_v44  ;;  %v2717_v44 = vpop.permute.xlu0 %2716 }
 0xeea   : > { %v2726_v59 = vsel %vm942_vm1, %v2711_v42, %v2717_v44  ;;  %v3311_v42 = vrot.slane %v5397_v49, %v1974_v32 }
 0xeeb   : > { %v2983_v3 = vpack.c.bf16 %v2979_v56, %v2979_v56 }
 0xeed   : > { %4311 = vmatmul.mubr.msk.bf16.vlgmr.msra.gmra.mrb[80].mxu1 %vm2490_vm6, %v2983_v3 }
 0xeee   : > { %4350 = vmatprep.mubr.msk.bf16.mxu1 %vm4745_vm0, %v4744_v5 }
 0xf5a   : > { %v3021_v10 = vpop.f32.mrb[60].mxu0 }
 0xf5b   : > { %v4294_v12 = vpop.f32.mrb[61].mxu0  ;;  %v3156_v35 = vpack.c.bf16 %v3021_v10, %v3021_v10 }
 0xf5c   : > { %v3024_v14 = vpop.f32.mrb[62].mxu0 }
 0xf5d   : > { %v4295_v15 = vpop.f32.mrb[63].mxu0 }
 0xf5e   : > { %v4506_v15 = vld [vmem:[%s4996_s28] sm:$0xff]  }
 0xf5f   : > { %4335 = vmatpush3.bf16.msra.mxu1 %v4506_v15 }
 0xf60   : > { %4336 = vmatprep.subr.bf16.mxu1 %v4744_v5 }
 0xf8b   : > { %v3064_v18 = vpop.f32.mrb[76].mxu1 }
 0xf8c   : > { %v3157_v23 = vpack.c.bf16 %v3064_v18, %v3064_v18  ;;  %v4300_v26 = vpop.f32.mrb[77].mxu1  ;;  %v4510_v18 = vld [vmem:[%s4996_s28 + $0x20] sm:$0xff]  }
 0xf8d   : > { %v3067_v39 = vpop.f32.mrb[78].mxu1  ;;  %v4513_v26 = vld [vmem:[%s4996_s28 + $0x38] sm:$0xff]  }
 0xf8e   : > { %3161 = vrot.lane.b32.xlu0 %v3157_v23, %s4748_s29  ;;  %v4301_v28 = vpop.f32.mrb[79].mxu1  ;;  %v4512_v23 = vld [vmem:[%s4996_s28 + $0x30] sm:$0xff]   ;;  %v4514_v39 = vld [vmem:[%s5022_s20] sm:$0xff]  }
 0xf8f   : > { %v3107_v53 = vpop.f32.mrb[64].mxu0  ;;  %v4515_v28 = vld [vmem:[%s5022_s20 + $0x8] sm:$0xff]  }
 0xf90   : > { %v3158_v29 = vpack.c.bf16 %v3107_v53, %v3107_v53  ;;  %v4306_v30 = vpop.f32.mrb[65].mxu0  ;;  %v4516_v53 = vld [vmem:[%s5022_s20 + $0x10] sm:$0xff]  }
 0xf91   : > { %v3110_v31 = vpop.f32.mrb[66].mxu0 }
 0xf92   : > { %2719 = vrot.lane.b32.xlu0 %v2713_v25, %s4746_s24  ;;  %3164 = vrot.lane.b32.xlu1 %v3158_v29, %s4746_s24  ;;  %v4307_v43 = vpop.f32.mrb[67].mxu0  ;;  %v4518_v25 = vld [vmem:[%s5022_s20 + $0x20] sm:$0xff]   ;;  %v4519_v29 = vld [vmem:[%s5022_s20 + $0x28] sm:$0xff]  }
 0xfc0   : > { %v3150_v20 = vpop.f32.mrb[80].mxu1 }
 0xfc1   : > { %v3159_v21 = vpack.c.bf16 %v3150_v20, %v3150_v20  ;;  %v4312_v47 = vpop.f32.mrb[81].mxu1 }
 0xfc2   : > { %v3153_v8 = vpop.f32.mrb[82].mxu1 }
 0xfc3   : > { %v4313_v24 = vpop.f32.mrb[83].mxu1  ;;  %3167 = vrot.lane.b32.xlu1 %v3159_v21, %s4747_s27 }
 0xfc7   : > { %2722 = vrot.lane.b32.xlu1 %v2714_v0, %s4747_s27  ;;  %s5760_s27 = sld [smem:[#allocation13_spill]] (!%p3877_p7) }
0x1000   : > { %v3162_v11 = vpop.permute.xlu0 %3161 }
0x1001   : > { %v3171_v41 = vsel %vm942_vm1, %v3156_v35, %v3162_v11  ;;  %v3305_v35 = vrot.slane %v5397_v49, %v1838_v36  ;;  %v4521_v36 = vld [vmem:[%s5022_s20 + $0x38] sm:$0xff]  }
0x1004   : > { %v3165_v34 = vpop.permute.xlu1 %3164  ;;  %v2720_v45 = vpop.permute.xlu0 %2719 }
0x1005   : > { %v3173_v13 = vsel %vm1377_vm4, %v3171_v41, %v3165_v34  ;;  %v2728_v57 = vsel %vm1377_vm4, %v2726_v59, %v2720_v45 }
0x1035   : > { %v3168_v27 = vpop.permute.xlu1 %3167 }
0x1036   : > { %v3175_v46 = vsel %vm1380_vm5, %v3173_v13, %v3168_v27 }
0x1037   : > { %v3177_v9 = vrot.slane %v3175_v46, 4 }
0x1039   : > { %v2723_v52 = vpop.permute.xlu1 %2722 }
0x103a   : > { %v2730_v19 = vsel %vm1380_vm5, %v2728_v57, %v2723_v52 }
0x103b   : > { %v3179_v55 = vsel %vm1179_vm2, %v2730_v19, %v3177_v9  ;;  %v4520_v19 = vld [vmem:[%s5022_s20 + $0x30] sm:$0xff]  }
0x103c   : > { %4331 = vmatmul.mubr.bf16.vlgmr.msra.gmra.mrb[68].mxu0 %v3179_v55  ;;  %v3860_v55 = vld [vmem:[%s547_s23] ss:$0 sm:$0xff] }
0x103d   : > { %4370 = vmatprep.mubr.msk.bf16.mxu0 %vm4745_vm0, %v4744_v5  ;;  %4355 = vmatpush3.bf16.msra.mxu0 %v4514_v39 }
0x103e   : > { %4356 = vmatprep.subr.bf16.mxu0 %v4744_v5 }
0x1041   : > { %4357 = vmatpush3.bf16.msra.mxu0 %v4515_v28 }
0x1042   : > { %4358 = vmatprep.subr.bf16.mxu0 %v4744_v5 }
0x1045   : > { %4359 = vmatpush3.bf16.msra.mxu0 %v4516_v53 }
0x1046   : > { %4360 = vmatprep.subr.bf16.mxu0 %v4744_v5 }
0x1049   : > { %4361 = vmatpush3.bf16.msra.mxu0 %v4517_v2 }
0x104a   : > { %4362 = vmatprep.subr.bf16.mxu0 %v4744_v5 }
0x104d   : > { %4363 = vmatpush3.bf16.msra.mxu0 %v4518_v25 }
0x104e   : > { %4364 = vmatprep.subr.bf16.mxu0 %v4744_v5 }
0x1051   : > { %4365 = vmatpush3.bf16.msra.mxu0 %v4519_v29 }
0x1052   : > { %4366 = vmatprep.subr.bf16.mxu0 %v4744_v5 }
0x1055   : > { %4367 = vmatpush3.bf16.msra.mxu0 %v4520_v19 }
0x1056   : > { %4368 = vmatprep.subr.bf16.mxu0 %v4744_v5 }
0x1059   : > { %4369 = vmatpush3.bf16.msra.mxu0 %v4521_v36 }
0x110f   : > { %v3267_v60 = vpop.f32.mrb[68].mxu0 }
0x1110   : > { %v3268_v63 = vadd.f32 %v3267_v60, %v3184_v6  ;;  %v4332_v1 = vpop.f32.mrb[69].mxu0 }
0x1111   : > { %v3270_v56 = vpop.f32.mrb[70].mxu0 }
0x1112   : > { %v5628_v3 = vadd.f32 %v3268_v63, %v5408_v62  ;;  %v3271_v10 = vadd.f32 %v3270_v56, %v3184_v6  ;;  %v4333_v12 = vpop.f32.mrb[71].mxu0 }
0x1114   : > { %v5631_v14 = vadd.f32 %v3271_v10, %v5406_v61  ;;  %3276 = vadd.xlane.f32.xlu0 %v5628_v3  ;;  %v3282_v33 = vmul.f32 %v5628_v3, %v5628_v3  ;;  %v4507_v61 = vld [vmem:[%s4996_s28 + $0x8] sm:$0xff]  }
0x1115   : > { %4337 = vmatpush3.bf16.msra.mxu1 %v4507_v61  ;;  %v4603_v10 = vld [vmem:[%s5016_s30 + $0x8] sm:$0xff] }
0x1116   : > { %3278 = vadd.xlane.f32.xlu1 %v5631_v14  ;;  %v3283_v62 = vmul.f32 %v5631_v14, %v5631_v14  ;;  %4338 = vmatprep.subr.bf16.mxu1 %v4744_v5 }
0x1118   : > { %3284 = vadd.xlane.f32.xlu0 %v3282_v33 }
0x1119   : > { %4339 = vmatpush3.bf16.msra.mxu1 %v4508_v16 }
0x111a   : > { %4340 = vmatprep.subr.bf16.mxu1 %v4744_v5 }
0x111c   : > { %3286 = vadd.xlane.f32.xlu0 %v3283_v62 }
0x111d   : > { %4341 = vmatpush3.bf16.msra.mxu1 %v4509_v17 }
0x111e   : > { %4342 = vmatprep.subr.bf16.mxu1 %v4744_v5 }
0x1121   : > { %4343 = vmatpush3.bf16.msra.mxu1 %v4510_v18 }
0x1122   : > { %4344 = vmatprep.subr.bf16.mxu1 %v4744_v5 }
0x1125   : > { %4345 = vmatpush3.bf16.msra.mxu1 %v4511_v22 }
0x1126   : > { %4346 = vmatprep.subr.bf16.mxu1 %v4744_v5 }
0x1129   : > { %4347 = vmatpush3.bf16.msra.mxu1 %v4512_v23 }
0x112a   : > { %4348 = vmatprep.subr.bf16.mxu1 %v4744_v5  ;;  %v3448_v5 = vrot.slane %v4603_v10, %v5092_v38 }
0x112d   : > { %4349 = vmatpush3.bf16.msra.mxu1 %v4513_v26 }
0x11a1   : > { %v3277_v30 = vpop.xlane.xlu0 %3276 }
0x11a2   : > { %v3280_v31 = vmul.f32 0.015625, %v3277_v30 }
0x11a3   : > { %v3279_v43 = vpop.xlane.xlu1 %3278 }
0x11a4   : > { %v3290_v51 = vmul.f32 %v3280_v31, %v3280_v31  ;;  %v3281_v48 = vmul.f32 0.015625, %v3279_v43  ;;  %v3294_v11 = vsub.f32 %v5628_v3, %v3280_v31 }
0x11a5   : > { %v3285_v4 = vpop.xlane.xlu0 %3284 }
0x11a6   : > { %v3288_v54 = vmul.f32 0.015625, %v3285_v4  ;;  %v3291_v47 = vmul.f32 %v3281_v48, %v3281_v48  ;;  %v3295_v13 = vsub.f32 %v5631_v14, %v3281_v48 }
0x11a8   : > { %v3292_v20 = vsub.f32 %v3288_v54, %v3290_v51  ;;  %v3569_v54 = vrot.slane %v4603_v10, %v2073_v7 }
0x11a9   : > { %v3287_v21 = vpop.xlane.xlu0 %3286 }
0x11aa   : > { %v3296_v8 = vadd.f32 1e-05, %v3292_v20  ;;  %v3289_v24 = vmul.f32 0.015625, %v3287_v21 }
0x11ac   : > { %4590 = vrsqrt.f32 %v3296_v8  ;;  %v3293_v0 = vsub.f32 %v3289_v24, %v3291_v47  ;;  %v3575_v47 = vrot.slane %v4603_v10, %v2176_v50 }
0x11ae   : > { %v3297_v44 = vadd.f32 1e-05, %v3293_v0 }
0x11b0   : > { %4592 = vrsqrt.f32 %v3297_v44 }
0x11b6   : > { %v4591_v34 = vpop.eup %4590 }
0x11b7   : > { %v3300_v41 = vmul.f32 %v4591_v34, %v3294_v11 }
0x11b9   : > { %v3306_v46 = vmul.f32 %v3305_v35, %v3300_v41 }
0x11ba   : > { %v4593_v27 = vpop.eup %4592 }
0x11bb   : > { %v3301_v45 = vmul.f32 %v4593_v27, %v3295_v13  ;;  %v3312_v57 = vadd.f32 %v3311_v42, %v3306_v46 }
0x11bd   : > { %v3307_v59 = vmul.f32 %v3305_v35, %v3301_v45 }
0x11bf   : > { %v3313_v9 = vadd.f32 %v3311_v42, %v3307_v59 }
0x11c1   : > { %v3314_v52 = vpack.c.bf16 %v3313_v9, %v3312_v57 }
0x11c3   : > { %4351 = vmatmul.mubr.bf16.vlgmr.msra.gmra.mrb[84].mxu1 %v3314_v52 }
0x1296   : > { %v3419_v49 = vpop.f32.mrb[84].mxu1 }
0x1297   : > { %v3420_v32 = vadd.f32 %v3860_v55, %v3419_v49  ;;  %v4352_v58 = vpop.f32.mrb[85].mxu1 }
0x1298   : > { %v3422_v6 = vpop.f32.mrb[86].mxu1 }
0x1299   : > { %v3423_v60 = vadd.f32 %v3860_v55, %v3422_v6  ;;  %v4353_v63 = vpop.f32.mrb[87].mxu1  ;;  %v3426_v1 = vmax.f32 %v3420_v32, 0.0  ;;  %v3584_v32 = vld [vmem:[%s5760_s27] sm:$0x3] (!%p3877_p7) }
0x129a   : > { %v3614_v6 = vrot.slane (!%p3877_p7), %v3584_v32, %v5092_v38 }
0x129b   : > { %v3427_v56 = vmax.f32 %v3423_v60, 0.0 }
0x129d   : > { %v3428_v3 = vpack.c.bf16 %v3427_v56, %v3426_v1  ;;  %v3620_v1 = vrot.slane (!%p3877_p7), %v3584_v32, %v5098_v40 }
0x129f   : > { %4371 = vmatmul.mubr.bf16.vlgmr.msra.gmra.mrb[72].mxu0 %v3428_v3 }
0x1372   : > { %v3531_v12 = vpop.f32.mrb[72].mxu0 }
0x1373   : > { %v3532_v14 = vadd.f32 %v3531_v12, %v3448_v5  ;;  %v4372_v33 = vpop.f32.mrb[73].mxu0 }
0x1374   : > { %v3534_v62 = vpop.f32.mrb[74].mxu0 }
0x1375   : > { %v3538_v15 = vadd.f32 %v3532_v14, %v3312_v57  ;;  %v3535_v61 = vadd.f32 %v3534_v62, %v3448_v5  ;;  %v4373_v16 = vpop.f32.mrb[75].mxu0 }
0x1377   : > { %v3539_v17 = vadd.f32 %v3535_v61, %v3313_v9  ;;  %3540 = vadd.xlane.f32.xlu1 %v3538_v15  ;;  %v3546_v18 = vmul.f32 %v3538_v15, %v3538_v15 }
0x1379   : > { %3542 = vadd.xlane.f32.xlu0 %v3539_v17  ;;  %v3547_v22 = vmul.f32 %v3539_v17, %v3539_v17 }
0x137b   : > { %3548 = vadd.xlane.f32.xlu1 %v3546_v18 }
0x137d   : > { %3550 = vadd.xlane.f32.xlu0 %v3547_v22 }
0x1404   : > { %v3541_v23 = vpop.xlane.xlu1 %3540 }
0x1405   : > { %v3544_v26 = vmul.f32 0.015625, %v3541_v23 }
0x1406   : > { %v3543_v39 = vpop.xlane.xlu0 %3542 }
0x1407   : > { %v3545_v28 = vmul.f32 0.015625, %v3543_v39  ;;  %v3554_v2 = vmul.f32 %v3544_v26, %v3544_v26  ;;  %v3558_v20 = vsub.f32 %v3538_v15, %v3544_v26 }
0x1408   : > { %v3549_v53 = vpop.xlane.xlu1 %3548 }
0x1409   : > { %v3552_v25 = vmul.f32 0.015625, %v3549_v53  ;;  %v3555_v30 = vmul.f32 %v3545_v28, %v3545_v28  ;;  %v3559_v8 = vsub.f32 %v3539_v17, %v3545_v28 }
0x140a   : > { %v3551_v29 = vpop.xlane.xlu0 %3550 }
0x140b   : > { %v3556_v31 = vsub.f32 %v3552_v25, %v3554_v2  ;;  %v3553_v43 = vmul.f32 0.015625, %v3551_v29 }
0x140d   : > { %v3560_v4 = vadd.f32 1e-05, %v3556_v31  ;;  %v3557_v51 = vsub.f32 %v3553_v43, %v3555_v30 }
0x140f   : > { %4594 = vrsqrt.f32 %v3560_v4  ;;  %v3561_v48 = vadd.f32 1e-05, %v3557_v51 }
0x1411   : > { %4596 = vrsqrt.f32 %v3561_v48 }
0x1419   : > { %v4595_v21 = vpop.eup %4594 }
0x141a   : > { %v3564_v24 = vmul.f32 %v4595_v21, %v3558_v20 }
0x141b   : > { %v4597_v0 = vpop.eup %4596 }
0x141c   : > { %v3570_v44 = vmul.f32 %v3569_v54, %v3564_v24  ;;  %v3565_v11 = vmul.f32 %v4597_v0, %v3559_v8  ;;  %3583 = sbr.rel (%p3877_p7) target bundleno = 5324 (0x14cc), region = 84 }
0x141e   : > { %v3576_v34 = vadd.f32 %v3575_v47, %v3570_v44  ;;  %v3571_v35 = vmul.f32 %v3569_v54, %v3565_v11 }
0x1420   : > { %3578 = vst [vmem:[%s5731_s12] sm:$0xff] %v3576_v34  ;;  %v3577_v41 = vadd.f32 %v3575_v47, %v3571_v35  ;;  %3585 = vadd.xlane.f32.xlu0 (!%p3877_p7), %v3576_v34  ;;  %v3591_v37 = vmul.f32 (!%p3877_p7), %v3576_v34, %v3576_v34 }
0x1422   : > { %3579 = vst [vmem:[%s5731_s12 + $0x8] sm:$0xff] %v3577_v41  ;;  %3593 = vadd.xlane.f32.xlu1 (!%p3877_p7), %v3591_v37  ;;  %v3592_v7 = vmul.f32 (!%p3877_p7), %v3577_v41, %v3577_v41 }
0x1424   : > { %3587 = vadd.xlane.f32.xlu0 %v3577_v41 }
0x1426   : > { %3595 = vadd.xlane.f32.xlu1 %v3592_v7 }
0x14ad   : > { %v3586_v50 = vpop.xlane.xlu0 %3585 }
0x14ae   : > { %v3589_v13 = vmul.f32 0.015625, %v3586_v50 }
0x14af   : > { %v3594_v27 = vpop.xlane.xlu1 %3593 }
0x14b0   : > { %v3599_v42 = vmul.f32 %v3589_v13, %v3589_v13  ;;  %v3597_v45 = vmul.f32 0.015625, %v3594_v27  ;;  %v3603_v58 = vsub.f32 %v3576_v34, %v3589_v13 }
0x14b1   : > { %v3588_v46 = vpop.xlane.xlu0 %3587 }
0x14b2   : > { %v3601_v59 = vsub.f32 %v3597_v45, %v3599_v42  ;;  %v3590_v57 = vmul.f32 0.015625, %v3588_v46 }
0x14b3   : > { %v3596_v9 = vpop.xlane.xlu1 %3595 }
0x14b4   : > { %v3605_v52 = vadd.f32 1e-05, %v3601_v59  ;;  %v3600_v19 = vmul.f32 %v3590_v57, %v3590_v57  ;;  %v3598_v36 = vmul.f32 0.015625, %v3596_v9  ;;  %v3604_v3 = vsub.f32 %v3577_v41, %v3590_v57 }
0x14b6   : > { %4604 = vrsqrt.f32 %v3605_v52  ;;  %v3602_v55 = vsub.f32 %v3598_v36, %v3600_v19 }
0x14b8   : > { %v3606_v49 = vadd.f32 1e-05, %v3602_v55 }
0x14ba   : > { %4606 = vrsqrt.f32 %v3606_v49 }
0x14c0   : > { %v4605_v60 = vpop.eup %4604 }
0x14c1   : > { %v3609_v63 = vmul.f32 %v4605_v60, %v3603_v58 }
0x14c3   : > { %v3615_v56 = vmul.f32 %v3614_v6, %v3609_v63 }
0x14c4   : > { %v4607_v10 = vpop.eup %4606 }
0x14c5   : > { %v3621_v5 = vadd.f32 %v3620_v1, %v3615_v56  ;;  %v3610_v12 = vmul.f32 %v4607_v10, %v3604_v3 }
0x14c7   : > { %3623 = vst [vmem:[%s5761_s16] sm:$0xff] %v3621_v5  ;;  %v3616_v14 = vmul.f32 %v3614_v6, %v3610_v12 }
0x14c9   : > { %v3622_v33 = vadd.f32 %v3620_v1, %v3616_v14 }
0x14cb   : > { %3624 = vst [vmem:[%s5761_s16 + $0x8] sm:$0xff] %v3622_v33 }
0x14cc PF: > { %s5762_s24 = sld [smem:[#allocation10_spill]]  ;;  %s5763_s26 = sld [smem:[#allocation9_spill]] }
0x14cd   : > { %s5764_s23 = sld [smem:[#allocation11_spill]]  ;;  %s5765_s21 = smov %s4728_s22 }
0x14d2   : > { %p26_p12 = scmp.ge.s32.totalorder %s5762_s24, 4   ;;  %s5766_s22 = smov %s5763_s26 }
0x14d4   :  { %28 = sbr.rel (!%p26_p12) target bundleno = 9 (0x9), region = 149 }
0x14db   :  { %3642 = vsyncpa [#allocation3], 1 }
0x14dc   :  { %3644 = vsyncpa [#allocation3 + $0x1], 1 }
0x14dd   :  { %3645 = vsyncpa [#allocation5], 1 }
0x14de   :  { %3647 = vsyncpa [#allocation5 + $0x1], 1 }

</bundles_post_ra>
